<compile_context>
chip_gen: v6e
topology: v6e:2x2x1
jax: 0.10.0
libtpu: 0.0.40
codegen_flags: <defaults>
</compile_context>

<pallas_src>
import math
import numpy as np
import jax
import jax.numpy as jnp
from jax.experimental import pallas as pl
from jax.experimental.pallas import tpu as pltpu


# ----------------------------- Pallas kernels ------------------------------

def _conv3x3_bn_relu_kernel(x_ref, w_ref, s_ref, b_ref, o_ref, xpad_ref):
    """3x3 conv (stride=1), pad=1 done in-kernel, folded BN + ReLU.

    x_ref   : (1, 1, H, W, Cin)   bf16, one (head, batch) element
    w_ref   : (1, 3, 3, Cin, Cout) bf16 HWIO weights for this head
    s_ref   : (1, 1, Cout)        f32 folded BN scale
    b_ref   : (1, 1, Cout)        f32 folded BN bias
    o_ref   : (1, 1, H*W, Cout)   bf16, lane/sublane-dense flat output
    xpad_ref: (H+2, W+2, Cin)     bf16 VMEM scratch with 1-px zero halo
    """
    _, _, H, W, Cin = x_ref.shape
    Cout = o_ref.shape[-1]

    # Zero-pad into VMEM scratch; avoids an extra HBM read+write via jnp.pad.
    xpad_ref[...] = jnp.zeros((H + 2, W + 2, Cin), xpad_ref.dtype)
    xpad_ref[1:H + 1, 1:W + 1, :] = x_ref[0, 0]

    acc = jnp.zeros((H * W, Cout), jnp.float32)
    for dy in range(3):
        for dx in range(3):
            patch = xpad_ref[dy:dy + H, dx:dx + W, :].reshape(H * W, Cin)
            acc = acc + jnp.dot(patch, w_ref[0, dy, dx],
                                preferred_element_type=jnp.float32)
    y = jnp.maximum(acc * s_ref[0] + b_ref[0], 0.0)
    o_ref[0, 0] = y.astype(o_ref.dtype)


def _upsample4x_kernel(xc0_ref, xc1_ref, wj_ref, r_ref, o_ref):
    """Bilinear 4x upsample (align_corners=True) for one (head, batch, row-tile).

    xc0_ref, xc1_ref: (1, 1, Hin, Wout*C) bf16 column-selected maps
    wj_ref          : (1, Wout*C)         f32 column fractional weights
    r_ref           : (tH, Hin)           f32 row-interpolation matrix tile
    o_ref           : (1, 1, tH, Wout*C)  f32 output row tile (lane-dense)
    """
    w1 = wj_ref[...]                                   # (1, Wout*C)
    x0 = xc0_ref[0, 0].astype(jnp.float32)             # (Hin, Wout*C)
    x1 = xc1_ref[0, 0].astype(jnp.float32)
    mid = x0 * (1.0 - w1) + x1 * w1                    # column blend (VPU)
    # Row interpolation + row expansion as one MXU matmul (f32, tiny K).
    o_ref[0, 0] = jnp.dot(r_ref[...], mid, preferred_element_type=jnp.float32)


# ------------------------------ Pallas wrappers -----------------------------

def conv3x3_bn_relu(x, w, scale, bias):
    """x: (NH, B, H, W, Cin) bf16 -> (NH, B, H, W, Cout) bf16."""
    NH, B, H, W, Cin = x.shape
    Cout = w.shape[-1]
    out = pl.pallas_call(
        _conv3x3_bn_relu_kernel,
        out_shape=jax.ShapeDtypeStruct((NH, B, H * W, Cout), jnp.bfloat16),
        grid=(NH, B),
        in_specs=[
            pl.BlockSpec((1, 1, H, W, Cin), lambda h, b: (h, b, 0, 0, 0)),
            pl.BlockSpec((1, 3, 3, Cin, Cout), lambda h, b: (h, 0, 0, 0, 0)),
            pl.BlockSpec((1, 1, Cout), lambda h, b: (h, 0, 0)),
            pl.BlockSpec((1, 1, Cout), lambda h, b: (h, 0, 0)),
        ],
        out_specs=pl.BlockSpec((1, 1, H * W, Cout), lambda h, b: (h, b, 0, 0)),
        scratch_shapes=[pltpu.VMEM((H + 2, W + 2, Cin), jnp.bfloat16)],
        compiler_params=pltpu.CompilerParams(
            dimension_semantics=("parallel", "parallel")),
    )(x, w, scale, bias)
    return out.reshape(NH, B, H, W, Cout)


def _interp_idx(n_in, n_out):
    # torch bilinear, align_corners=True
    f = np.arange(n_out, dtype=np.float64) * (n_in - 1) / max(n_out - 1, 1)
    i0 = np.clip(np.floor(f).astype(np.int32), 0, n_in - 1)
    i1 = np.minimum(i0 + 1, n_in - 1)
    t = (f - i0).astype(np.float32)
    return i0, i1, t


def upsample4x_concat(y):
    """y: (NH, B, H, W, C) bf16 -> NCHW (B, NH*C, 4H, 4W) f32 (concat fused)."""
    NH, B, H, W, C = y.shape
    Hout, Wout = 4 * H, 4 * W
    N = Wout * C

    j0, j1, tj = _interp_idx(W, Wout)
    i0, i1, ti = _interp_idx(H, Hout)

    # Static row-interpolation matrix (Hout, H): at most 2 nonzeros per row.
    R = np.zeros((Hout, H), np.float32)
    R[np.arange(Hout), i0] += (1.0 - ti)
    R[np.arange(Hout), i1] += ti

    # Only the two column-selected maps are gathered in XLA (input-height
    # resolution, bf16): no full-resolution corner maps, no broadcast weights.
    xc0 = jnp.take(y, jnp.asarray(j0, jnp.int32), axis=3).reshape(NH, B, H, N)
    xc1 = jnp.take(y, jnp.asarray(j1, jnp.int32), axis=3).reshape(NH, B, H, N)
    wj = jnp.asarray(np.repeat(tj, C).reshape(1, N), jnp.float32)
    Rm = jnp.asarray(R)

    tH = 32 if (Hout % 32 == 0 and Hout > 32) else Hout   # row tiling
    n_rt = Hout // tH

    up = pl.pallas_call(
        _upsample4x_kernel,
        out_shape=jax.ShapeDtypeStruct((NH, B, Hout, N), jnp.float32),
        grid=(NH, B, n_rt),
        in_specs=[
            pl.BlockSpec((1, 1, H, N), lambda h, b, r: (h, b, 0, 0)),
            pl.BlockSpec((1, 1, H, N), lambda h, b, r: (h, b, 0, 0)),
            pl.BlockSpec((1, N), lambda h, b, r: (0, 0)),
            pl.BlockSpec((tH, H), lambda h, b, r: (r, 0)),
        ],
        out_specs=pl.BlockSpec((1, 1, tH, N), lambda h, b, r: (h, b, r, 0)),
        compiler_params=pltpu.CompilerParams(
            dimension_semantics=("parallel", "parallel", "arbitrary")),
    )(xc0, xc1, wj, Rm)

    up = up.reshape(NH, B, Hout, Wout, C)
    # Fused head-concat: heads are contiguous channel blocks; single NCHW
    # transpose at the end (required by the PyTorch output layout anyway).
    up = jnp.transpose(up, (1, 0, 4, 2, 3)).reshape(B, NH * C, Hout, Wout)
    return up


# ------------------------------ Parameters ----------------------------------

def init_params(key, mla_channels=256, mlahead_channels=128, num_heads=4):
    def conv_bn(k, cin, cout):
        kw, kg, kb, km, kv = jax.random.split(k, 5)
        fan_in = 9 * cin
        w = jax.random.normal(kw, (num_heads, 3, 3, cin, cout),
                              jnp.float32) / math.sqrt(fan_in)
        gamma = 1.0 + 0.1 * jax.random.normal(kg, (num_heads, cout), jnp.float32)
        beta = 0.1 * jax.random.normal(kb, (num_heads, cout), jnp.float32)
        mean = 0.1 * jax.random.normal(km, (num_heads, cout), jnp.float32)
        var = 1.0 + 0.1 * jax.random.uniform(kv, (num_heads, cout), jnp.float32)
        scale = gamma / jnp.sqrt(var + 1e-5)            # eval-mode BN folded
        bias = beta - mean * scale
        return w, scale.reshape(num_heads, 1, cout), bias.reshape(num_heads, 1, cout)

    k1, k2 = jax.random.split(key)
    w1, s1, b1 = conv_bn(k1, mla_channels, mlahead_channels)
    w2, s2, b2 = conv_bn(k2, mlahead_channels, mlahead_channels)
    return dict(w1=w1, s1=s1, b1=b1, w2=w2, s2=s2, b2=b2)


# ------------------------------ Forward pass ---------------------------------

def mla_head_forward(params, mla_p2, mla_p3, mla_p4, mla_p5):
    """Inputs: 4 x NCHW (B, mla_channels, H, W) f32.  Output: NCHW f32."""
    x = jnp.stack([mla_p2, mla_p3, mla_p4, mla_p5], axis=0)       # (4,B,Cin,H,W)
    x = jnp.transpose(x, (0, 1, 3, 4, 2)).astype(jnp.bfloat16)    # NHWC, bf16
    y = conv3x3_bn_relu(x, params["w1"].astype(jnp.bfloat16),
                        params["s1"], params["b1"])
    y = conv3x3_bn_relu(y, params["w2"].astype(jnp.bfloat16),
                        params["s2"], params["b2"])
    return upsample4x_concat(y)                                   # (B,4C,4H,4W)


# ------------------------- Pure-JAX reference (check) ------------------------

def _conv_ref(x, w, scale, bias):
    B, H, W, _ = x.shape
    xp = jnp.pad(x, ((0, 0), (1, 1), (1, 1), (0, 0)))
    acc = jnp.zeros((B, H, W, w.shape[-1]), jnp.float32)
    for dy in range(3):
        for dx in range(3):
            acc = acc + jnp.einsum("bhwc,co->bhwo",
                                   xp[:, dy:dy + H, dx:dx + W, :], w[dy, dx])
    return jnp.maximum(acc * scale + bias, 0.0)


def _upsample_ref(x, s=4):
    B, H, W, C = x.shape
    Hout, Wout = s * H, s * W
    i0, i1, ti = _interp_idx(H, Hout)
    j0, j1, tj = _interp_idx(W, Wout)
    x00 = x[:, i0][:, :, j0]
    x01 = x[:, i0][:, :, j1]
    x10 = x[:, i1][:, :, j0]
    x11 = x[:, i1][:, :, j1]
    wi = jnp.asarray(ti, jnp.float32)[None, :, None, None]
    wj = jnp.asarray(tj, jnp.float32)[None, None, :, None]
    return (x00 * (1 - wi) * (1 - wj) + x01 * (1 - wi) * wj
            + x10 * wi * (1 - wj) + x11 * wi * wj)


def mla_head_ref(params, *mla_ps):
    outs = []
    for h, p in enumerate(mla_ps):
        x = jnp.transpose(p, (0, 2, 3, 1))
        x = _conv_ref(x, params["w1"][h], params["s1"][h], params["b1"][h])
        x = _conv_ref(x, params["w2"][h], params["s2"][h], params["b2"][h])
        outs.append(_upsample_ref(x))
    out = jnp.concatenate(outs, axis=-1)
    return jnp.transpose(out, (0, 3, 1, 2))


# ----------------------------------- Main ------------------------------------

if __name__ == "__main__":
    key = jax.random.PRNGKey(0)
    kp, k2, k3, k4, k5 = jax.random.split(key, 5)
    params = init_params(kp)

    B, C_mla, H, W = 2, 256, 8, 8
    mla_p2 = jax.random.normal(k2, (B, C_mla, H, W), jnp.float32)
    mla_p3 = jax.random.normal(k3, (B, C_mla, H, W), jnp.float32)
    mla_p4 = jax.random.normal(k4, (B, C_mla, H, W), jnp.float32)
    mla_p5 = jax.random.normal(k5, (B, C_mla, H, W), jnp.float32)

    out = jax.jit(mla_head_forward)(params, mla_p2, mla_p3, mla_p4, mla_p5)
    out = jax.block_until_ready(out)

    assert out.shape == (B, 4 * 128, 4 * H, 4 * W), out.shape
    assert bool(jnp.all(jnp.isfinite(out)))

    ref = jax.block_until_ready(mla_head_ref(params, mla_p2, mla_p3, mla_p4, mla_p5))
    max_err = float(jnp.max(jnp.abs(out - ref)))
    denom = float(jnp.max(jnp.abs(ref))) + 1e-6
    assert max_err / denom < 2e-2, (max_err, denom)

    print("KERNEL_OK")
</pallas_src>

<mosaic_0001>
module attributes {stable_mosaic.version = 11 : i64} {
  func.func @_conv3x3_bn_relu_kernel(%arg0: i32, %arg1: i32, %arg2: memref<1x1x8x8x128xbf16, #tpu.memory_space<vmem>>, %arg3: memref<1x3x3x128x128xbf16, #tpu.memory_space<vmem>>, %arg4: memref<1x1x128xf32, #tpu.memory_space<vmem>>, %arg5: memref<1x1x128xf32, #tpu.memory_space<vmem>>, %arg6: memref<1x1x64x128xbf16, #tpu.memory_space<vmem>>, %arg7: memref<10x10x128xbf16, #tpu.memory_space<vmem>>) attributes {dimension_semantics = [#tpu.dimension_semantics<parallel>, #tpu.dimension_semantics<parallel>], iteration_bounds = array<i64: 4, 2>, scalar_prefetch = 0 : i64, scratch_operands = 1 : i64, tpu.core_type = #tpu.core_type<tc>, window_params = [{transform_indices = @transform_0, window_bounds = array<i64: 1, 1, 8, 8, 128>}, {transform_indices = @transform_1, window_bounds = array<i64: 1, 3, 3, 128, 128>}, {transform_indices = @transform_2, window_bounds = array<i64: 1, 1, 128>}, {transform_indices = @transform_3, window_bounds = array<i64: 1, 1, 128>}, {transform_indices = @transform_4, window_bounds = array<i64: 1, 1, 64, 128>}]} {
    %cst = arith.constant 0.000000e+00 : bf16
    %0 = vector.broadcast %cst : bf16 to vector<10x10x128xbf16>
    %c0 = arith.constant 0 : index
    %c0_0 = arith.constant 0 : index
    %c0_1 = arith.constant 0 : index
    %1 = vector.load %arg7[%c0, %c0_0, %c0_1] : memref<10x10x128xbf16, #tpu.memory_space<vmem>>, vector<10x10x128xbf16>
    tpu.vector_store %arg7[%c0, %c0_0, %c0_1], %0 {strides = array<i32>} : memref<10x10x128xbf16, #tpu.memory_space<vmem>>, vector<10x10x128xbf16>,
    %c0_2 = arith.constant 0 : index
    %c0_3 = arith.constant 0 : index
    %c0_4 = arith.constant 0 : index
    %c0_5 = arith.constant 0 : index
    %c0_6 = arith.constant 0 : index
    %2 = vector.load %arg2[%c0_2, %c0_3, %c0_4, %c0_5, %c0_6] : memref<1x1x8x8x128xbf16, #tpu.memory_space<vmem>>, vector<1x1x8x8x128xbf16>
    %3 = vector.shape_cast %2 : vector<1x1x8x8x128xbf16> to vector<8x8x128xbf16>
    %c1 = arith.constant 1 : index
    %c1_7 = arith.constant 1 : index
    %c0_8 = arith.constant 0 : index
    %4 = vector.load %arg7[%c1, %c1_7, %c0_8] : memref<10x10x128xbf16, #tpu.memory_space<vmem>>, vector<8x8x128xbf16>
    tpu.vector_store %arg7[%c1, %c1_7, %c0_8], %3 {strides = array<i32>} : memref<10x10x128xbf16, #tpu.memory_space<vmem>>, vector<8x8x128xbf16>,
    %cst_9 = arith.constant 0.000000e+00 : f32
    %5 = vector.broadcast %cst_9 : f32 to vector<64x128xf32>
    %c0_10 = arith.constant 0 : index
    %c0_11 = arith.constant 0 : index
    %c0_12 = arith.constant 0 : index
    %6 = vector.load %arg7[%c0_10, %c0_11, %c0_12] : memref<10x10x128xbf16, #tpu.memory_space<vmem>>, vector<8x8x128xbf16>
    %7 = vector.shape_cast %6 : vector<8x8x128xbf16> to vector<64x128xbf16>
    %c0_13 = arith.constant 0 : index
    %c0_14 = arith.constant 0 : index
    %c0_15 = arith.constant 0 : index
    %c0_16 = arith.constant 0 : index
    %c0_17 = arith.constant 0 : index
    %8 = vector.load %arg3[%c0_13, %c0_14, %c0_15, %c0_16, %c0_17] : memref<1x3x3x128x128xbf16, #tpu.memory_space<vmem>>, vector<1x1x1x128x128xbf16>
    %9 = vector.shape_cast %8 : vector<1x1x1x128x128xbf16> to vector<128x128xbf16>
    %cst_18 = arith.constant dense<0.000000e+00> : vector<64x128xf32>
    %10 = tpu.matmul %7, %9, %cst_18 {dimension_numbers = #tpu.dot_dimension_numbers<[1], [0], [0], [1], [0, 0, 1, 1], [], []>} : vector<64x128xbf16>, vector<128x128xbf16>, vector<64x128xf32> -> vector<64x128xf32>
    %11 = arith.addf %5, %10 : vector<64x128xf32>
    %c0_19 = arith.constant 0 : index
    %c1_20 = arith.constant 1 : index
    %c0_21 = arith.constant 0 : index
    %12 = vector.load %arg7[%c0_19, %c1_20, %c0_21] : memref<10x10x128xbf16, #tpu.memory_space<vmem>>, vector<8x8x128xbf16>
    %13 = vector.shape_cast %12 : vector<8x8x128xbf16> to vector<64x128xbf16>
    %c0_22 = arith.constant 0 : index
    %c0_23 = arith.constant 0 : index
    %c1_24 = arith.constant 1 : index
    %c0_25 = arith.constant 0 : index
    %c0_26 = arith.constant 0 : index
    %14 = vector.load %arg3[%c0_22, %c0_23, %c1_24, %c0_25, %c0_26] : memref<1x3x3x128x128xbf16, #tpu.memory_space<vmem>>, vector<1x1x1x128x128xbf16>
    %15 = vector.shape_cast %14 : vector<1x1x1x128x128xbf16> to vector<128x128xbf16>
    %cst_27 = arith.constant dense<0.000000e+00> : vector<64x128xf32>
    %16 = tpu.matmul %13, %15, %cst_27 {dimension_numbers = #tpu.dot_dimension_numbers<[1], [0], [0], [1], [0, 0, 1, 1], [], []>} : vector<64x128xbf16>, vector<128x128xbf16>, vector<64x128xf32> -> vector<64x128xf32>
    %17 = arith.addf %11, %16 : vector<64x128xf32>
    %c0_28 = arith.constant 0 : index
    %c2 = arith.constant 2 : index
    %c0_29 = arith.constant 0 : index
    %18 = vector.load %arg7[%c0_28, %c2, %c0_29] : memref<10x10x128xbf16, #tpu.memory_space<vmem>>, vector<8x8x128xbf16>
    %19 = vector.shape_cast %18 : vector<8x8x128xbf16> to vector<64x128xbf16>
    %c0_30 = arith.constant 0 : index
    %c0_31 = arith.constant 0 : index
    %c2_32 = arith.constant 2 : index
    %c0_33 = arith.constant 0 : index
    %c0_34 = arith.constant 0 : index
    %20 = vector.load %arg3[%c0_30, %c0_31, %c2_32, %c0_33, %c0_34] : memref<1x3x3x128x128xbf16, #tpu.memory_space<vmem>>, vector<1x1x1x128x128xbf16>
    %21 = vector.shape_cast %20 : vector<1x1x1x128x128xbf16> to vector<128x128xbf16>
    %cst_35 = arith.constant dense<0.000000e+00> : vector<64x128xf32>
    %22 = tpu.matmul %19, %21, %cst_35 {dimension_numbers = #tpu.dot_dimension_numbers<[1], [0], [0], [1], [0, 0, 1, 1], [], []>} : vector<64x128xbf16>, vector<128x128xbf16>, vector<64x128xf32> -> vector<64x128xf32>
    %23 = arith.addf %17, %22 : vector<64x128xf32>
    %c1_36 = arith.constant 1 : index
    %c0_37 = arith.constant 0 : index
    %c0_38 = arith.constant 0 : index
    %24 = vector.load %arg7[%c1_36, %c0_37, %c0_38] : memref<10x10x128xbf16, #tpu.memory_space<vmem>>, vector<8x8x128xbf16>
    %25 = vector.shape_cast %24 : vector<8x8x128xbf16> to vector<64x128xbf16>
    %c0_39 = arith.constant 0 : index
    %c1_40 = arith.constant 1 : index
    %c0_41 = arith.constant 0 : index
    %c0_42 = arith.constant 0 : index
    %c0_43 = arith.constant 0 : index
    %26 = vector.load %arg3[%c0_39, %c1_40, %c0_41, %c0_42, %c0_43] : memref<1x3x3x128x128xbf16, #tpu.memory_space<vmem>>, vector<1x1x1x128x128xbf16>
    %27 = vector.shape_cast %26 : vector<1x1x1x128x128xbf16> to vector<128x128xbf16>
    %cst_44 = arith.constant dense<0.000000e+00> : vector<64x128xf32>
    %28 = tpu.matmul %25, %27, %cst_44 {dimension_numbers = #tpu.dot_dimension_numbers<[1], [0], [0], [1], [0, 0, 1, 1], [], []>} : vector<64x128xbf16>, vector<128x128xbf16>, vector<64x128xf32> -> vector<64x128xf32>
    %29 = arith.addf %23, %28 : vector<64x128xf32>
    %c1_45 = arith.constant 1 : index
    %c1_46 = arith.constant 1 : index
    %c0_47 = arith.constant 0 : index
    %30 = vector.load %arg7[%c1_45, %c1_46, %c0_47] : memref<10x10x128xbf16, #tpu.memory_space<vmem>>, vector<8x8x128xbf16>
    %31 = vector.shape_cast %30 : vector<8x8x128xbf16> to vector<64x128xbf16>
    %c0_48 = arith.constant 0 : index
    %c1_49 = arith.constant 1 : index
    %c1_50 = arith.constant 1 : index
    %c0_51 = arith.constant 0 : index
    %c0_52 = arith.constant 0 : index
    %32 = vector.load %arg3[%c0_48, %c1_49, %c1_50, %c0_51, %c0_52] : memref<1x3x3x128x128xbf16, #tpu.memory_space<vmem>>, vector<1x1x1x128x128xbf16>
    %33 = vector.shape_cast %32 : vector<1x1x1x128x128xbf16> to vector<128x128xbf16>
    %cst_53 = arith.constant dense<0.000000e+00> : vector<64x128xf32>
    %34 = tpu.matmul %31, %33, %cst_53 {dimension_numbers = #tpu.dot_dimension_numbers<[1], [0], [0], [1], [0, 0, 1, 1], [], []>} : vector<64x128xbf16>, vector<128x128xbf16>, vector<64x128xf32> -> vector<64x128xf32>
    %35 = arith.addf %29, %34 : vector<64x128xf32>
    %c1_54 = arith.constant 1 : index
    %c2_55 = arith.constant 2 : index
    %c0_56 = arith.constant 0 : index
    %36 = vector.load %arg7[%c1_54, %c2_55, %c0_56] : memref<10x10x128xbf16, #tpu.memory_space<vmem>>, vector<8x8x128xbf16>
    %37 = vector.shape_cast %36 : vector<8x8x128xbf16> to vector<64x128xbf16>
    %c0_57 = arith.constant 0 : index
    %c1_58 = arith.constant 1 : index
    %c2_59 = arith.constant 2 : index
    %c0_60 = arith.constant 0 : index
    %c0_61 = arith.constant 0 : index
    %38 = vector.load %arg3[%c0_57, %c1_58, %c2_59, %c0_60, %c0_61] : memref<1x3x3x128x128xbf16, #tpu.memory_space<vmem>>, vector<1x1x1x128x128xbf16>
    %39 = vector.shape_cast %38 : vector<1x1x1x128x128xbf16> to vector<128x128xbf16>
    %cst_62 = arith.constant dense<0.000000e+00> : vector<64x128xf32>
    %40 = tpu.matmul %37, %39, %cst_62 {dimension_numbers = #tpu.dot_dimension_numbers<[1], [0], [0], [1], [0, 0, 1, 1], [], []>} : vector<64x128xbf16>, vector<128x128xbf16>, vector<64x128xf32> -> vector<64x128xf32>
    %41 = arith.addf %35, %40 : vector<64x128xf32>
    %c2_63 = arith.constant 2 : index
    %c0_64 = arith.constant 0 : index
    %c0_65 = arith.constant 0 : index
    %42 = vector.load %arg7[%c2_63, %c0_64, %c0_65] : memref<10x10x128xbf16, #tpu.memory_space<vmem>>, vector<8x8x128xbf16>
    %43 = vector.shape_cast %42 : vector<8x8x128xbf16> to vector<64x128xbf16>
    %c0_66 = arith.constant 0 : index
    %c2_67 = arith.constant 2 : index
    %c0_68 = arith.constant 0 : index
    %c0_69 = arith.constant 0 : index
    %c0_70 = arith.constant 0 : index
    %44 = vector.load %arg3[%c0_66, %c2_67, %c0_68, %c0_69, %c0_70] : memref<1x3x3x128x128xbf16, #tpu.memory_space<vmem>>, vector<1x1x1x128x128xbf16>
    %45 = vector.shape_cast %44 : vector<1x1x1x128x128xbf16> to vector<128x128xbf16>
    %cst_71 = arith.constant dense<0.000000e+00> : vector<64x128xf32>
    %46 = tpu.matmul %43, %45, %cst_71 {dimension_numbers = #tpu.dot_dimension_numbers<[1], [0], [0], [1], [0, 0, 1, 1], [], []>} : vector<64x128xbf16>, vector<128x128xbf16>, vector<64x128xf32> -> vector<64x128xf32>
    %47 = arith.addf %41, %46 : vector<64x128xf32>
    %c2_72 = arith.constant 2 : index
    %c1_73 = arith.constant 1 : index
    %c0_74 = arith.constant 0 : index
    %48 = vector.load %arg7[%c2_72, %c1_73, %c0_74] : memref<10x10x128xbf16, #tpu.memory_space<vmem>>, vector<8x8x128xbf16>
    %49 = vector.shape_cast %48 : vector<8x8x128xbf16> to vector<64x128xbf16>
    %c0_75 = arith.constant 0 : index
    %c2_76 = arith.constant 2 : index
    %c1_77 = arith.constant 1 : index
    %c0_78 = arith.constant 0 : index
    %c0_79 = arith.constant 0 : index
    %50 = vector.load %arg3[%c0_75, %c2_76, %c1_77, %c0_78, %c0_79] : memref<1x3x3x128x128xbf16, #tpu.memory_space<vmem>>, vector<1x1x1x128x128xbf16>
    %51 = vector.shape_cast %50 : vector<1x1x1x128x128xbf16> to vector<128x128xbf16>
    %cst_80 = arith.constant dense<0.000000e+00> : vector<64x128xf32>
    %52 = tpu.matmul %49, %51, %cst_80 {dimension_numbers = #tpu.dot_dimension_numbers<[1], [0], [0], [1], [0, 0, 1, 1], [], []>} : vector<64x128xbf16>, vector<128x128xbf16>, vector<64x128xf32> -> vector<64x128xf32>
    %53 = arith.addf %47, %52 : vector<64x128xf32>
    %c2_81 = arith.constant 2 : index
    %c2_82 = arith.constant 2 : index
    %c0_83 = arith.constant 0 : index
    %54 = vector.load %arg7[%c2_81, %c2_82, %c0_83] : memref<10x10x128xbf16, #tpu.memory_space<vmem>>, vector<8x8x128xbf16>
    %55 = vector.shape_cast %54 : vector<8x8x128xbf16> to vector<64x128xbf16>
    %c0_84 = arith.constant 0 : index
    %c2_85 = arith.constant 2 : index
    %c2_86 = arith.constant 2 : index
    %c0_87 = arith.constant 0 : index
    %c0_88 = arith.constant 0 : index
    %56 = vector.load %arg3[%c0_84, %c2_85, %c2_86, %c0_87, %c0_88] : memref<1x3x3x128x128xbf16, #tpu.memory_space<vmem>>, vector<1x1x1x128x128xbf16>
    %57 = vector.shape_cast %56 : vector<1x1x1x128x128xbf16> to vector<128x128xbf16>
    %cst_89 = arith.constant dense<0.000000e+00> : vector<64x128xf32>
    %58 = tpu.matmul %55, %57, %cst_89 {dimension_numbers = #tpu.dot_dimension_numbers<[1], [0], [0], [1], [0, 0, 1, 1], [], []>} : vector<64x128xbf16>, vector<128x128xbf16>, vector<64x128xf32> -> vector<64x128xf32>
    %59 = arith.addf %53, %58 : vector<64x128xf32>
    %c0_90 = arith.constant 0 : index
    %c0_91 = arith.constant 0 : index
    %c0_92 = arith.constant 0 : index
    %60 = vector.load %arg4[%c0_90, %c0_91, %c0_92] : memref<1x1x128xf32, #tpu.memory_space<vmem>>, vector<1x1x128xf32>
    %61 = vector.shape_cast %60 : vector<1x1x128xf32> to vector<1x128xf32>
    %62 = vector.broadcast %61 : vector<1x128xf32> to vector<64x128xf32>
    %63 = arith.mulf %59, %62 : vector<64x128xf32>
    %c0_93 = arith.constant 0 : index
    %c0_94 = arith.constant 0 : index
    %c0_95 = arith.constant 0 : index
    %64 = vector.load %arg5[%c0_93, %c0_94, %c0_95] : memref<1x1x128xf32, #tpu.memory_space<vmem>>, vector<1x1x128xf32>
    %65 = vector.shape_cast %64 : vector<1x1x128xf32> to vector<1x128xf32>
    %66 = vector.broadcast %65 : vector<1x128xf32> to vector<64x128xf32>
    %67 = arith.addf %63, %66 : vector<64x128xf32>
    %cst_96 = arith.constant 0.000000e+00 : f32
    %68 = vector.broadcast %cst_96 : f32 to vector<64x128xf32>
    %69 = arith.maximumf %67, %68 : vector<64x128xf32>
    %70 = arith.truncf %69 : vector<64x128xf32> to vector<64x128xbf16>
    %c0_97 = arith.constant 0 : index
    %c0_98 = arith.constant 0 : index
    %c0_99 = arith.constant 0 : index
    %c0_100 = arith.constant 0 : index
    %71 = vector.load %arg6[%c0_97, %c0_98, %c0_99, %c0_100] : memref<1x1x64x128xbf16, #tpu.memory_space<vmem>>, vector<1x1x64x128xbf16>
    %72 = vector.shape_cast %71 : vector<1x1x64x128xbf16> to vector<64x128xbf16>
    %73 = vector.shape_cast %70 : vector<64x128xbf16> to vector<1x1x64x128xbf16>
    tpu.vector_store %arg6[%c0_97, %c0_98, %c0_99, %c0_100], %73 {strides = array<i32>} : memref<1x1x64x128xbf16, #tpu.memory_space<vmem>>, vector<1x1x64x128xbf16>,
    return
  }
  func.func @transform_0(%arg0: i32, %arg1: i32) -> (i32, i32, i32, i32, i32) {
    %c0_i32 = arith.constant 0 : i32
    %c0_i32_0 = arith.constant 0 : i32
    %c0_i32_1 = arith.constant 0 : i32
    %c0_i32_2 = arith.constant 0 : i32
    return %arg0, %arg1, %c0_i32, %c0_i32_0, %c0_i32_1 : i32, i32, i32, i32, i32
  }
  func.func @transform_1(%arg0: i32, %arg1: i32) -> (i32, i32, i32, i32, i32) {
    %c0_i32 = arith.constant 0 : i32
    %c0_i32_0 = arith.constant 0 : i32
    %c0_i32_1 = arith.constant 0 : i32
    %c0_i32_2 = arith.constant 0 : i32
    %c0_i32_3 = arith.constant 0 : i32
    return %arg0, %c0_i32, %c0_i32_0, %c0_i32_1, %c0_i32_2 : i32, i32, i32, i32, i32
  }
  func.func @transform_2(%arg0: i32, %arg1: i32) -> (i32, i32, i32) {
    %c0_i32 = arith.constant 0 : i32
    %c0_i32_0 = arith.constant 0 : i32
    %c0_i32_1 = arith.constant 0 : i32
    return %arg0, %c0_i32, %c0_i32_0 : i32, i32, i32
  }
  func.func @transform_3(%arg0: i32, %arg1: i32) -> (i32, i32, i32) {
    %c0_i32 = arith.constant 0 : i32
    %c0_i32_0 = arith.constant 0 : i32
    %c0_i32_1 = arith.constant 0 : i32
    return %arg0, %c0_i32, %c0_i32_0 : i32, i32, i32
  }
  func.func @transform_4(%arg0: i32, %arg1: i32) -> (i32, i32, i32, i32) {
    %c0_i32 = arith.constant 0 : i32
    %c0_i32_0 = arith.constant 0 : i32
    %c0_i32_1 = arith.constant 0 : i32
    return %arg0, %arg1, %c0_i32, %c0_i32_0 : i32, i32, i32, i32
  }
}

module attributes {stable_mosaic.version = 11 : i64} {
  func.func @_conv3x3_bn_relu_kernel(%arg0: i32, %arg1: i32, %arg2: memref<1x1x8x8x256xbf16, #tpu.memory_space<vmem>>, %arg3: memref<1x3x3x256x128xbf16, #tpu.memory_space<vmem>>, %arg4: memref<1x1x128xf32, #tpu.memory_space<vmem>>, %arg5: memref<1x1x128xf32, #tpu.memory_space<vmem>>, %arg6: memref<1x1x64x128xbf16, #tpu.memory_space<vmem>>, %arg7: memref<10x10x256xbf16, #tpu.memory_space<vmem>>) attributes {dimension_semantics = [#tpu.dimension_semantics<parallel>, #tpu.dimension_semantics<parallel>], iteration_bounds = array<i64: 4, 2>, scalar_prefetch = 0 : i64, scratch_operands = 1 : i64, tpu.core_type = #tpu.core_type<tc>, window_params = [{transform_indices = @transform_0, window_bounds = array<i64: 1, 1, 8, 8, 256>}, {transform_indices = @transform_1, window_bounds = array<i64: 1, 3, 3, 256, 128>}, {transform_indices = @transform_2, window_bounds = array<i64: 1, 1, 128>}, {transform_indices = @transform_3, window_bounds = array<i64: 1, 1, 128>}, {transform_indices = @transform_4, window_bounds = array<i64: 1, 1, 64, 128>}]} {
    %cst = arith.constant 0.000000e+00 : bf16
    %0 = vector.broadcast %cst : bf16 to vector<10x10x256xbf16>
    %c0 = arith.constant 0 : index
    %c0_0 = arith.constant 0 : index
    %c0_1 = arith.constant 0 : index
    %1 = vector.load %arg7[%c0, %c0_0, %c0_1] : memref<10x10x256xbf16, #tpu.memory_space<vmem>>, vector<10x10x256xbf16>
    tpu.vector_store %arg7[%c0, %c0_0, %c0_1], %0 {strides = array<i32>} : memref<10x10x256xbf16, #tpu.memory_space<vmem>>, vector<10x10x256xbf16>,
    %c0_2 = arith.constant 0 : index
    %c0_3 = arith.constant 0 : index
    %c0_4 = arith.constant 0 : index
    %c0_5 = arith.constant 0 : index
    %c0_6 = arith.constant 0 : index
    %2 = vector.load %arg2[%c0_2, %c0_3, %c0_4, %c0_5, %c0_6] : memref<1x1x8x8x256xbf16, #tpu.memory_space<vmem>>, vector<1x1x8x8x256xbf16>
    %3 = vector.shape_cast %2 : vector<1x1x8x8x256xbf16> to vector<8x8x256xbf16>
    %c1 = arith.constant 1 : index
    %c1_7 = arith.constant 1 : index
    %c0_8 = arith.constant 0 : index
    %4 = vector.load %arg7[%c1, %c1_7, %c0_8] : memref<10x10x256xbf16, #tpu.memory_space<vmem>>, vector<8x8x256xbf16>
    tpu.vector_store %arg7[%c1, %c1_7, %c0_8], %3 {strides = array<i32>} : memref<10x10x256xbf16, #tpu.memory_space<vmem>>, vector<8x8x256xbf16>,
    %cst_9 = arith.constant 0.000000e+00 : f32
    %5 = vector.broadcast %cst_9 : f32 to vector<64x128xf32>
    %c0_10 = arith.constant 0 : index
    %c0_11 = arith.constant 0 : index
    %c0_12 = arith.constant 0 : index
    %6 = vector.load %arg7[%c0_10, %c0_11, %c0_12] : memref<10x10x256xbf16, #tpu.memory_space<vmem>>, vector<8x8x256xbf16>
    %7 = vector.shape_cast %6 : vector<8x8x256xbf16> to vector<64x256xbf16>
    %c0_13 = arith.constant 0 : index
    %c0_14 = arith.constant 0 : index
    %c0_15 = arith.constant 0 : index
    %c0_16 = arith.constant 0 : index
    %c0_17 = arith.constant 0 : index
    %8 = vector.load %arg3[%c0_13, %c0_14, %c0_15, %c0_16, %c0_17] : memref<1x3x3x256x128xbf16, #tpu.memory_space<vmem>>, vector<1x1x1x256x128xbf16>
    %9 = vector.shape_cast %8 : vector<1x1x1x256x128xbf16> to vector<256x128xbf16>
    %cst_18 = arith.constant dense<0.000000e+00> : vector<64x128xf32>
    %10 = tpu.matmul %7, %9, %cst_18 {dimension_numbers = #tpu.dot_dimension_numbers<[1], [0], [0], [1], [0, 0, 1, 1], [], []>} : vector<64x256xbf16>, vector<256x128xbf16>, vector<64x128xf32> -> vector<64x128xf32>
    %11 = arith.addf %5, %10 : vector<64x128xf32>
    %c0_19 = arith.constant 0 : index
    %c1_20 = arith.constant 1 : index
    %c0_21 = arith.constant 0 : index
    %12 = vector.load %arg7[%c0_19, %c1_20, %c0_21] : memref<10x10x256xbf16, #tpu.memory_space<vmem>>, vector<8x8x256xbf16>
    %13 = vector.shape_cast %12 : vector<8x8x256xbf16> to vector<64x256xbf16>
    %c0_22 = arith.constant 0 : index
    %c0_23 = arith.constant 0 : index
    %c1_24 = arith.constant 1 : index
    %c0_25 = arith.constant 0 : index
    %c0_26 = arith.constant 0 : index
    %14 = vector.load %arg3[%c0_22, %c0_23, %c1_24, %c0_25, %c0_26] : memref<1x3x3x256x128xbf16, #tpu.memory_space<vmem>>, vector<1x1x1x256x128xbf16>
    %15 = vector.shape_cast %14 : vector<1x1x1x256x128xbf16> to vector<256x128xbf16>
    %cst_27 = arith.constant dense<0.000000e+00> : vector<64x128xf32>
    %16 = tpu.matmul %13, %15, %cst_27 {dimension_numbers = #tpu.dot_dimension_numbers<[1], [0], [0], [1], [0, 0, 1, 1], [], []>} : vector<64x256xbf16>, vector<256x128xbf16>, vector<64x128xf32> -> vector<64x128xf32>
    %17 = arith.addf %11, %16 : vector<64x128xf32>
    %c0_28 = arith.constant 0 : index
    %c2 = arith.constant 2 : index
    %c0_29 = arith.constant 0 : index
    %18 = vector.load %arg7[%c0_28, %c2, %c0_29] : memref<10x10x256xbf16, #tpu.memory_space<vmem>>, vector<8x8x256xbf16>
    %19 = vector.shape_cast %18 : vector<8x8x256xbf16> to vector<64x256xbf16>
    %c0_30 = arith.constant 0 : index
    %c0_31 = arith.constant 0 : index
    %c2_32 = arith.constant 2 : index
    %c0_33 = arith.constant 0 : index
    %c0_34 = arith.constant 0 : index
    %20 = vector.load %arg3[%c0_30, %c0_31, %c2_32, %c0_33, %c0_34] : memref<1x3x3x256x128xbf16, #tpu.memory_space<vmem>>, vector<1x1x1x256x128xbf16>
    %21 = vector.shape_cast %20 : vector<1x1x1x256x128xbf16> to vector<256x128xbf16>
    %cst_35 = arith.constant dense<0.000000e+00> : vector<64x128xf32>
    %22 = tpu.matmul %19, %21, %cst_35 {dimension_numbers = #tpu.dot_dimension_numbers<[1], [0], [0], [1], [0, 0, 1, 1], [], []>} : vector<64x256xbf16>, vector<256x128xbf16>, vector<64x128xf32> -> vector<64x128xf32>
    %23 = arith.addf %17, %22 : vector<64x128xf32>
    %c1_36 = arith.constant 1 : index
    %c0_37 = arith.constant 0 : index
    %c0_38 = arith.constant 0 : index
    %24 = vector.load %arg7[%c1_36, %c0_37, %c0_38] : memref<10x10x256xbf16, #tpu.memory_space<vmem>>, vector<8x8x256xbf16>
    %25 = vector.shape_cast %24 : vector<8x8x256xbf16> to vector<64x256xbf16>
    %c0_39 = arith.constant 0 : index
    %c1_40 = arith.constant 1 : index
    %c0_41 = arith.constant 0 : index
    %c0_42 = arith.constant 0 : index
    %c0_43 = arith.constant 0 : index
    %26 = vector.load %arg3[%c0_39, %c1_40, %c0_41, %c0_42, %c0_43] : memref<1x3x3x256x128xbf16, #tpu.memory_space<vmem>>, vector<1x1x1x256x128xbf16>
    %27 = vector.shape_cast %26 : vector<1x1x1x256x128xbf16> to vector<256x128xbf16>
    %cst_44 = arith.constant dense<0.000000e+00> : vector<64x128xf32>
    %28 = tpu.matmul %25, %27, %cst_44 {dimension_numbers = #tpu.dot_dimension_numbers<[1], [0], [0], [1], [0, 0, 1, 1], [], []>} : vector<64x256xbf16>, vector<256x128xbf16>, vector<64x128xf32> -> vector<64x128xf32>
    %29 = arith.addf %23, %28 : vector<64x128xf32>
    %c1_45 = arith.constant 1 : index
    %c1_46 = arith.constant 1 : index
    %c0_47 = arith.constant 0 : index
    %30 = vector.load %arg7[%c1_45, %c1_46, %c0_47] : memref<10x10x256xbf16, #tpu.memory_space<vmem>>, vector<8x8x256xbf16>
    %31 = vector.shape_cast %30 : vector<8x8x256xbf16> to vector<64x256xbf16>
    %c0_48 = arith.constant 0 : index
    %c1_49 = arith.constant 1 : index
    %c1_50 = arith.constant 1 : index
    %c0_51 = arith.constant 0 : index
    %c0_52 = arith.constant 0 : index
    %32 = vector.load %arg3[%c0_48, %c1_49, %c1_50, %c0_51, %c0_52] : memref<1x3x3x256x128xbf16, #tpu.memory_space<vmem>>, vector<1x1x1x256x128xbf16>
    %33 = vector.shape_cast %32 : vector<1x1x1x256x128xbf16> to vector<256x128xbf16>
    %cst_53 = arith.constant dense<0.000000e+00> : vector<64x128xf32>
    %34 = tpu.matmul %31, %33, %cst_53 {dimension_numbers = #tpu.dot_dimension_numbers<[1], [0], [0], [1], [0, 0, 1, 1], [], []>} : vector<64x256xbf16>, vector<256x128xbf16>, vector<64x128xf32> -> vector<64x128xf32>
    %35 = arith.addf %29, %34 : vector<64x128xf32>
    %c1_54 = arith.constant 1 : index
    %c2_55 = arith.constant 2 : index
    %c0_56 = arith.constant 0 : index
    %36 = vector.load %arg7[%c1_54, %c2_55, %c0_56] : memref<10x10x256xbf16, #tpu.memory_space<vmem>>, vector<8x8x256xbf16>
    %37 = vector.shape_cast %36 : vector<8x8x256xbf16> to vector<64x256xbf16>
    %c0_57 = arith.constant 0 : index
    %c1_58 = arith.constant 1 : index
    %c2_59 = arith.constant 2 : index
    %c0_60 = arith.constant 0 : index
    %c0_61 = arith.constant 0 : index
    %38 = vector.load %arg3[%c0_57, %c1_58, %c2_59, %c0_60, %c0_61] : memref<1x3x3x256x128xbf16, #tpu.memory_space<vmem>>, vector<1x1x1x256x128xbf16>
    %39 = vector.shape_cast %38 : vector<1x1x1x256x128xbf16> to vector<256x128xbf16>
    %cst_62 = arith.constant dense<0.000000e+00> : vector<64x128xf32>
    %40 = tpu.matmul %37, %39, %cst_62 {dimension_numbers = #tpu.dot_dimension_numbers<[1], [0], [0], [1], [0, 0, 1, 1], [], []>} : vector<64x256xbf16>, vector<256x128xbf16>, vector<64x128xf32> -> vector<64x128xf32>
    %41 = arith.addf %35, %40 : vector<64x128xf32>
    %c2_63 = arith.constant 2 : index
    %c0_64 = arith.constant 0 : index
    %c0_65 = arith.constant 0 : index
    %42 = vector.load %arg7[%c2_63, %c0_64, %c0_65] : memref<10x10x256xbf16, #tpu.memory_space<vmem>>, vector<8x8x256xbf16>
    %43 = vector.shape_cast %42 : vector<8x8x256xbf16> to vector<64x256xbf16>
    %c0_66 = arith.constant 0 : index
    %c2_67 = arith.constant 2 : index
    %c0_68 = arith.constant 0 : index
    %c0_69 = arith.constant 0 : index
    %c0_70 = arith.constant 0 : index
    %44 = vector.load %arg3[%c0_66, %c2_67, %c0_68, %c0_69, %c0_70] : memref<1x3x3x256x128xbf16, #tpu.memory_space<vmem>>, vector<1x1x1x256x128xbf16>
    %45 = vector.shape_cast %44 : vector<1x1x1x256x128xbf16> to vector<256x128xbf16>
    %cst_71 = arith.constant dense<0.000000e+00> : vector<64x128xf32>
    %46 = tpu.matmul %43, %45, %cst_71 {dimension_numbers = #tpu.dot_dimension_numbers<[1], [0], [0], [1], [0, 0, 1, 1], [], []>} : vector<64x256xbf16>, vector<256x128xbf16>, vector<64x128xf32> -> vector<64x128xf32>
    %47 = arith.addf %41, %46 : vector<64x128xf32>
    %c2_72 = arith.constant 2 : index
    %c1_73 = arith.constant 1 : index
    %c0_74 = arith.constant 0 : index
    %48 = vector.load %arg7[%c2_72, %c1_73, %c0_74] : memref<10x10x256xbf16, #tpu.memory_space<vmem>>, vector<8x8x256xbf16>
    %49 = vector.shape_cast %48 : vector<8x8x256xbf16> to vector<64x256xbf16>
    %c0_75 = arith.constant 0 : index
    %c2_76 = arith.constant 2 : index
    %c1_77 = arith.constant 1 : index
    %c0_78 = arith.constant 0 : index
    %c0_79 = arith.constant 0 : index
    %50 = vector.load %arg3[%c0_75, %c2_76, %c1_77, %c0_78, %c0_79] : memref<1x3x3x256x128xbf16, #tpu.memory_space<vmem>>, vector<1x1x1x256x128xbf16>
    %51 = vector.shape_cast %50 : vector<1x1x1x256x128xbf16> to vector<256x128xbf16>
    %cst_80 = arith.constant dense<0.000000e+00> : vector<64x128xf32>
    %52 = tpu.matmul %49, %51, %cst_80 {dimension_numbers = #tpu.dot_dimension_numbers<[1], [0], [0], [1], [0, 0, 1, 1], [], []>} : vector<64x256xbf16>, vector<256x128xbf16>, vector<64x128xf32> -> vector<64x128xf32>
    %53 = arith.addf %47, %52 : vector<64x128xf32>
    %c2_81 = arith.constant 2 : index
    %c2_82 = arith.constant 2 : index
    %c0_83 = arith.constant 0 : index
    %54 = vector.load %arg7[%c2_81, %c2_82, %c0_83] : memref<10x10x256xbf16, #tpu.memory_space<vmem>>, vector<8x8x256xbf16>
    %55 = vector.shape_cast %54 : vector<8x8x256xbf16> to vector<64x256xbf16>
    %c0_84 = arith.constant 0 : index
    %c2_85 = arith.constant 2 : index
    %c2_86 = arith.constant 2 : index
    %c0_87 = arith.constant 0 : index
    %c0_88 = arith.constant 0 : index
    %56 = vector.load %arg3[%c0_84, %c2_85, %c2_86, %c0_87, %c0_88] : memref<1x3x3x256x128xbf16, #tpu.memory_space<vmem>>, vector<1x1x1x256x128xbf16>
    %57 = vector.shape_cast %56 : vector<1x1x1x256x128xbf16> to vector<256x128xbf16>
    %cst_89 = arith.constant dense<0.000000e+00> : vector<64x128xf32>
    %58 = tpu.matmul %55, %57, %cst_89 {dimension_numbers = #tpu.dot_dimension_numbers<[1], [0], [0], [1], [0, 0, 1, 1], [], []>} : vector<64x256xbf16>, vector<256x128xbf16>, vector<64x128xf32> -> vector<64x128xf32>
    %59 = arith.addf %53, %58 : vector<64x128xf32>
    %c0_90 = arith.constant 0 : index
    %c0_91 = arith.constant 0 : index
    %c0_92 = arith.constant 0 : index
    %60 = vector.load %arg4[%c0_90, %c0_91, %c0_92] : memref<1x1x128xf32, #tpu.memory_space<vmem>>, vector<1x1x128xf32>
    %61 = vector.shape_cast %60 : vector<1x1x128xf32> to vector<1x128xf32>
    %62 = vector.broadcast %61 : vector<1x128xf32> to vector<64x128xf32>
    %63 = arith.mulf %59, %62 : vector<64x128xf32>
    %c0_93 = arith.constant 0 : index
    %c0_94 = arith.constant 0 : index
    %c0_95 = arith.constant 0 : index
    %64 = vector.load %arg5[%c0_93, %c0_94, %c0_95] : memref<1x1x128xf32, #tpu.memory_space<vmem>>, vector<1x1x128xf32>
    %65 = vector.shape_cast %64 : vector<1x1x128xf32> to vector<1x128xf32>
    %66 = vector.broadcast %65 : vector<1x128xf32> to vector<64x128xf32>
    %67 = arith.addf %63, %66 : vector<64x128xf32>
    %cst_96 = arith.constant 0.000000e+00 : f32
    %68 = vector.broadcast %cst_96 : f32 to vector<64x128xf32>
    %69 = arith.maximumf %67, %68 : vector<64x128xf32>
    %70 = arith.truncf %69 : vector<64x128xf32> to vector<64x128xbf16>
    %c0_97 = arith.constant 0 : index
    %c0_98 = arith.constant 0 : index
    %c0_99 = arith.constant 0 : index
    %c0_100 = arith.constant 0 : index
    %71 = vector.load %arg6[%c0_97, %c0_98, %c0_99, %c0_100] : memref<1x1x64x128xbf16, #tpu.memory_space<vmem>>, vector<1x1x64x128xbf16>
    %72 = vector.shape_cast %71 : vector<1x1x64x128xbf16> to vector<64x128xbf16>
    %73 = vector.shape_cast %70 : vector<64x128xbf16> to vector<1x1x64x128xbf16>
    tpu.vector_store %arg6[%c0_97, %c0_98, %c0_99, %c0_100], %73 {strides = array<i32>} : memref<1x1x64x128xbf16, #tpu.memory_space<vmem>>, vector<1x1x64x128xbf16>,
    return
  }
  func.func @transform_0(%arg0: i32, %arg1: i32) -> (i32, i32, i32, i32, i32) {
    %c0_i32 = arith.constant 0 : i32
    %c0_i32_0 = arith.constant 0 : i32
    %c0_i32_1 = arith.constant 0 : i32
    %c0_i32_2 = arith.constant 0 : i32
    return %arg0, %arg1, %c0_i32, %c0_i32_0, %c0_i32_1 : i32, i32, i32, i32, i32
  }
  func.func @transform_1(%arg0: i32, %arg1: i32) -> (i32, i32, i32, i32, i32) {
    %c0_i32 = arith.constant 0 : i32
    %c0_i32_0 = arith.constant 0 : i32
    %c0_i32_1 = arith.constant 0 : i32
    %c0_i32_2 = arith.constant 0 : i32
    %c0_i32_3 = arith.constant 0 : i32
    return %arg0, %c0_i32, %c0_i32_0, %c0_i32_1, %c0_i32_2 : i32, i32, i32, i32, i32
  }
  func.func @transform_2(%arg0: i32, %arg1: i32) -> (i32, i32, i32) {
    %c0_i32 = arith.constant 0 : i32
    %c0_i32_0 = arith.constant 0 : i32
    %c0_i32_1 = arith.constant 0 : i32
    return %arg0, %c0_i32, %c0_i32_0 : i32, i32, i32
  }
  func.func @transform_3(%arg0: i32, %arg1: i32) -> (i32, i32, i32) {
    %c0_i32 = arith.constant 0 : i32
    %c0_i32_0 = arith.constant 0 : i32
    %c0_i32_1 = arith.constant 0 : i32
    return %arg0, %c0_i32, %c0_i32_0 : i32, i32, i32
  }
  func.func @transform_4(%arg0: i32, %arg1: i32) -> (i32, i32, i32, i32) {
    %c0_i32 = arith.constant 0 : i32
    %c0_i32_0 = arith.constant 0 : i32
    %c0_i32_1 = arith.constant 0 : i32
    return %arg0, %arg1, %c0_i32, %c0_i32_0 : i32, i32, i32, i32
  }
}

module attributes {stable_mosaic.version = 11 : i64} {
  func.func @_upsample4x_kernel(%arg0: i32, %arg1: i32, %arg2: i32, %arg3: memref<1x1x8x4096xbf16, #tpu.memory_space<vmem>>, %arg4: memref<1x1x8x4096xbf16, #tpu.memory_space<vmem>>, %arg5: memref<1x4096xf32, #tpu.memory_space<vmem>>, %arg6: memref<32x8xf32, #tpu.memory_space<vmem>>, %arg7: memref<1x1x32x4096xf32, #tpu.memory_space<vmem>>) attributes {dimension_semantics = [#tpu.dimension_semantics<parallel>, #tpu.dimension_semantics<parallel>, #tpu.dimension_semantics<arbitrary>], iteration_bounds = array<i64: 4, 2, 1>, scalar_prefetch = 0 : i64, scratch_operands = 0 : i64, tpu.core_type = #tpu.core_type<tc>, window_params = [{transform_indices = @transform_0, window_bounds = array<i64: 1, 1, 8, 4096>}, {transform_indices = @transform_1, window_bounds = array<i64: 1, 1, 8, 4096>}, {pipeline_mode = #tpu.pipeline_mode<synchronous>, transform_indices = @transform_2, window_bounds = array<i64: 1, 4096>}, {transform_indices = @transform_3, window_bounds = array<i64: 32, 8>}, {transform_indices = @transform_4, window_bounds = array<i64: 1, 1, 32, 4096>}]} {
    %c0 = arith.constant 0 : index
    %c0_0 = arith.constant 0 : index
    %0 = vector.load %arg5[%c0, %c0_0] : memref<1x4096xf32, #tpu.memory_space<vmem>>, vector<1x4096xf32>
    %c0_1 = arith.constant 0 : index
    %c0_2 = arith.constant 0 : index
    %c0_3 = arith.constant 0 : index
    %c0_4 = arith.constant 0 : index
    %1 = vector.load %arg3[%c0_1, %c0_2, %c0_3, %c0_4] : memref<1x1x8x4096xbf16, #tpu.memory_space<vmem>>, vector<1x1x8x4096xbf16>
    %2 = vector.shape_cast %1 : vector<1x1x8x4096xbf16> to vector<8x4096xbf16>
    %3 = arith.extf %2 : vector<8x4096xbf16> to vector<8x4096xf32>
    %c0_5 = arith.constant 0 : index
    %c0_6 = arith.constant 0 : index
    %c0_7 = arith.constant 0 : index
    %c0_8 = arith.constant 0 : index
    %4 = vector.load %arg4[%c0_5, %c0_6, %c0_7, %c0_8] : memref<1x1x8x4096xbf16, #tpu.memory_space<vmem>>, vector<1x1x8x4096xbf16>
    %5 = vector.shape_cast %4 : vector<1x1x8x4096xbf16> to vector<8x4096xbf16>
    %6 = arith.extf %5 : vector<8x4096xbf16> to vector<8x4096xf32>
    %cst = arith.constant 1.000000e+00 : f32
    %7 = vector.broadcast %cst : f32 to vector<1x4096xf32>
    %8 = arith.subf %7, %0 : vector<1x4096xf32>
    %9 = vector.broadcast %8 : vector<1x4096xf32> to vector<8x4096xf32>
    %10 = arith.mulf %3, %9 : vector<8x4096xf32>
    %11 = vector.broadcast %0 : vector<1x4096xf32> to vector<8x4096xf32>
    %12 = arith.mulf %6, %11 : vector<8x4096xf32>
    %13 = arith.addf %10, %12 : vector<8x4096xf32>
    %c0_9 = arith.constant 0 : index
    %c0_10 = arith.constant 0 : index
    %14 = vector.load %arg6[%c0_9, %c0_10] : memref<32x8xf32, #tpu.memory_space<vmem>>, vector<32x8xf32>
    %cst_11 = arith.constant dense<0.000000e+00> : vector<32x4096xf32>
    %15 = tpu.matmul %14, %13, %cst_11 {dimension_numbers = #tpu.dot_dimension_numbers<[1], [0], [0], [1], [0, 0, 1, 1], [], []>} : vector<32x8xf32>, vector<8x4096xf32>, vector<32x4096xf32> -> vector<32x4096xf32>
    %c0_12 = arith.constant 0 : index
    %c0_13 = arith.constant 0 : index
    %c0_14 = arith.constant 0 : index
    %c0_15 = arith.constant 0 : index
    %16 = vector.load %arg7[%c0_12, %c0_13, %c0_14, %c0_15] : memref<1x1x32x4096xf32, #tpu.memory_space<vmem>>, vector<1x1x32x4096xf32>
    %17 = vector.shape_cast %16 : vector<1x1x32x4096xf32> to vector<32x4096xf32>
    %18 = vector.shape_cast %15 : vector<32x4096xf32> to vector<1x1x32x4096xf32>
    tpu.vector_store %arg7[%c0_12, %c0_13, %c0_14, %c0_15], %18 {strides = array<i32>} : memref<1x1x32x4096xf32, #tpu.memory_space<vmem>>, vector<1x1x32x4096xf32>,
    return
  }
  func.func @transform_0(%arg0: i32, %arg1: i32, %arg2: i32) -> (i32, i32, i32, i32) {
    %c0_i32 = arith.constant 0 : i32
    %c0_i32_0 = arith.constant 0 : i32
    %c0_i32_1 = arith.constant 0 : i32
    return %arg0, %arg1, %c0_i32, %c0_i32_0 : i32, i32, i32, i32
  }
  func.func @transform_1(%arg0: i32, %arg1: i32, %arg2: i32) -> (i32, i32, i32, i32) {
    %c0_i32 = arith.constant 0 : i32
    %c0_i32_0 = arith.constant 0 : i32
    %c0_i32_1 = arith.constant 0 : i32
    return %arg0, %arg1, %c0_i32, %c0_i32_0 : i32, i32, i32, i32
  }
  func.func @transform_2(%arg0: i32, %arg1: i32, %arg2: i32) -> (i32, i32) {
    %c0_i32 = arith.constant 0 : i32
    %c0_i32_0 = arith.constant 0 : i32
    %c0_i32_1 = arith.constant 0 : i32
    return %c0_i32, %c0_i32_0 : i32, i32
  }
  func.func @transform_3(%arg0: i32, %arg1: i32, %arg2: i32) -> (i32, i32) {
    %c0_i32 = arith.constant 0 : i32
    %c0_i32_0 = arith.constant 0 : i32
    return %arg2, %c0_i32 : i32, i32
  }
  func.func @transform_4(%arg0: i32, %arg1: i32, %arg2: i32) -> (i32, i32, i32, i32) {
    %c0_i32 = arith.constant 0 : i32
    %c0_i32_0 = arith.constant 0 : i32
    return %arg0, %arg1, %arg2, %c0_i32 : i32, i32, i32, i32
  }
}

</mosaic_0001>

<bundles_post_ra>
// kernel: mla_head_forward.4
= control target key start
LH: loop header
LB: loop body
LE: loop exit
PB: predicated region body
PF: predicated region fallthrough
CT: control target
= control target key end

     0   :  { %s3464_s15 = smov 0   ;;  %s3466_s16 = smov 0   ;;  %s3968_s0 = inlined_call_operand.vmem [shape: bf16[4,2,8,8,128], index: 0, kind: input, shape index: {}]   ;;  %s3969_s1 = inlined_call_operand.vmem [shape: bf16[4,3,3,128,128], index: 1, kind: input, shape index: {}]   ;;  %s3970_s2 = inlined_call_operand.vmem [shape: f32[4,1,128], index: 2, kind: input, shape index: {}]   ;;  %s3971_s3 = inlined_call_operand.vmem [shape: f32[4,1,128], index: 3, kind: input, shape index: {}]   ;;  %s3972_s4 = inlined_call_operand.vmem [shape: bf16[4,2,64,128], index: 4, kind: output, shape index: {}]  }
   0x1   :  { %s3468_s17 = smov 0   ;;  %s3470_s18 = smov 0  }
   0x2   :  { %s3472_s19 = smov 0  }
   0x3 LB: > { %s23_s20 = sadd.s32 1, %s3428_s17  ;;  %s26_s21 = sadd.s32 1, %s3432_s18  ;;  %s3436_s19 = sphi %s3472_s19, %s14_s19   ;;  %s3432_s18 = sphi %s3470_s18, %s3996_s18   ;;  %s3428_s17 = sphi %s3468_s17, %s3995_s17   ;;  %s3424_s16 = sphi %s3466_s16, %s3994_s16   ;;  %s3420_s15 = sphi %s3464_s15, %s3993_s15  }
   0x4   : > { %p24_p0 = scmp.ge.s32.totalorder %s23_s20, 2  ;;  %p2621_p1 = scmp.ge.s32.totalorder %s3436_s19, 1 }
   0x5   : > { %p208_p2 = scmp.lt.s32.totalorder %s3436_s19, 9 }
   0x6   : > { %s3998_s20 = smov (%p24_p0, %s23_s20), 0  ;;  %s4000_s21 = smov (!%p24_p0, %s26_s21), %s3432_s18 }
   0x7   : > { %p209_p3 = pnand %p2621_p1, %p208_p2  ;;  %p28_p4 = scmp.ge.s32.totalorder %s4000_s21, 4 }
   0x9   : > { %s4002_s21 = smov (%p28_p4, %s4000_s21), 0  ;;  %212 = sbr.rel (%p209_p3) target bundleno = 394 (0x18a), region = 36 }
   0xe   : > { %p253_p5 = scmp.lt.s32.totalorder %s3424_s16, 3  ;;  %v3438_v0 = vmov 0   ;;  %p255_p6 = scmp.lt.s32.totalorder %s3420_s15, 1  ;;  %vm393_vm0 = vsmask.f32 7938  ;;  %vm392_vm1 = vcmask 1043456  }
   0xf   : > { %283 = vst [vmem:[#allocation2] sm:$0xf] %v3438_v0  ;;  %284 = vst [vmem:[#allocation2 + $0x4] sm:$0x1] %v3438_v0  ;;  %vm399_vm2 = vsmask.f32 256 }
  0x10   : > { %285 = vst [vmem:[#allocation2 + $0x8] sm:$0xf] %v3438_v0  ;;  %286 = vst [vmem:[#allocation2 + $0xc] sm:$0x1] %v3438_v0  ;;  %s4004_s16 = smov (!%p253_p5, %s3424_s16), 3  ;;  %s4006_s15 = smov (!%p255_p6, %s3420_s15), 1 }
  0x11   : > { %287 = vst [vmem:[#allocation2 + $0x10] sm:$0xf] %v3438_v0  ;;  %288 = vst [vmem:[#allocation2 + $0x14] sm:$0x1] %v3438_v0  ;;  %s3272_s22 = smul.u32 576, %s4004_s16  ;;  %s2623_s26 = sshll.u32 %s4004_s16, 4 }
  0x12   : > { %289 = vst [vmem:[#allocation2 + $0x18] sm:$0xf] %v3438_v0  ;;  %290 = vst [vmem:[#allocation2 + $0x1c] sm:$0x1] %v3438_v0  ;;  %s2622_s27 = sshll.u32 %s4006_s15, 3  ;;  %vm398_vm3 = vcmask 1040384   ;;  %s269_s9 = scalar_lea.vmem %s3970_s2, %s4004_s16 }
  0x13   : > { %291 = vst [vmem:[#allocation2 + $0x20] sm:$0xf] %v3438_v0  ;;  %292 = vst [vmem:[#allocation2 + $0x24] sm:$0x1] %v3438_v0  ;;  %s3509_s25 = scalar_lea.vmem %s3969_s1, %s3272_s22  ;;  %s3519_s28 = sadd.s32 %s2623_s26, %s2622_s27  ;;  %vm478_vm6 = vsmask.f32 3328 }
  0x14   : > { %293 = vst [vmem:[#allocation2 + $0x28] sm:$0xf] %v3438_v0  ;;  %294 = vst [vmem:[#allocation2 + $0x2c] sm:$0x1] %v3438_v0  ;;  %v3314_v1 = vld [vmem:[%s3509_s25 + $0x78] sm:$0xff]   ;;  %v3316_v3 = vld [vmem:[%s3509_s25 + $0x70] sm:$0xff]   ;;  %s272_s12 = scalar_lea.vmem %s3971_s3, %s4004_s16 }
  0x15   : > { %295 = vst [vmem:[#allocation2 + $0x30] sm:$0xf] %v3438_v0  ;;  %296 = vst [vmem:[#allocation2 + $0x34] sm:$0x1] %v3438_v0  ;;  %v3315_v2 = vld [vmem:[%s3509_s25 + $0x38] sm:$0xff]   ;;  %3040 = vmatprep.subr.bf16.mxu0 %v3314_v1  ;;  %v3317_v4 = vld [vmem:[%s3509_s25 + $0x30] sm:$0xff]  }
  0x16   : > { %297 = vst [vmem:[#allocation2 + $0x38] sm:$0xf] %v3438_v0  ;;  %298 = vst [vmem:[#allocation2 + $0x3c] sm:$0x1] %v3438_v0  ;;  %3064 = vmatprep.subr.bf16.mxu1 %v3315_v2  ;;  %3041 = vmatpush3.bf16.msra.mxu0 %v3314_v1  ;;  %v3318_v5 = vld [vmem:[%s3509_s25 + $0x68] sm:$0xff]   ;;  %v3320_v7 = vld [vmem:[%s3509_s25 + $0x60] sm:$0xff]  }
  0x17   : > { %299 = vst [vmem:[#allocation2 + $0x40] sm:$0xf] %v3438_v0  ;;  %300 = vst [vmem:[#allocation2 + $0x44] sm:$0x1] %v3438_v0  ;;  %3065 = vmatpush3.bf16.msra.mxu1 %v3315_v2  ;;  %3042 = vmatprep.subr.bf16.mxu0 %v3316_v3  ;;  %v3319_v6 = vld [vmem:[%s3509_s25 + $0x28] sm:$0xff]   ;;  %v3321_v8 = vld [vmem:[%s3509_s25 + $0x20] sm:$0xff]  }
  0x18   : > { %301 = vst [vmem:[#allocation2 + $0x48] sm:$0xf] %v3438_v0  ;;  %302 = vst [vmem:[#allocation2 + $0x4c] sm:$0x1] %v3438_v0  ;;  %3066 = vmatprep.subr.bf16.mxu1 %v3317_v4  ;;  %s2624_s29 = sshll.u32 %s3519_s28, 2  ;;  %v3322_v9 = vld [vmem:[%s3509_s25 + $0x58] sm:$0xff]  }
  0x19   : > { %v3323_v10 = vld [vmem:[%s3509_s25 + $0x18] sm:$0xff]   ;;  %s3531_s6 = scalar_lea.vmem %s3968_s0, %s2624_s29  ;;  %v3324_v11 = vld [vmem:[%s3509_s25 + $0x50] sm:$0xff]   ;;  %v3536_v16 = vld [vmem:[#allocation2] sm:$0xf]  ;;  %vm479_vm7 = vsmask.f32 7440  ;;  %s281_s15 = scalar_lea.vmem %s3972_s4, %s2624_s29 }
  0x1a   : > { %3043 = vmatpush3.bf16.msra.mxu0 %v3316_v3  ;;  %v303_v12 = vld [vmem:[%s3531_s6] sm:$0xf]  ;;  %v3325_v13 = vld [vmem:[%s3509_s25 + $0x10] sm:$0xff]   ;;  %v395_v17 = vld [vmem:[#allocation2 + $0x8] sm:$0xf]  ;;  %v482_v18 = vshrl.u32 %v3536_v16, 16 }
  0x1b   : > { %3067 = vmatpush3.bf16.msra.mxu1 %v3317_v4  ;;  %3044 = vmatprep.subr.bf16.mxu0 %v3318_v5  ;;  %v312_v14 = vshrl.u32 %v303_v12, 16  ;;  %v315_v15 = vshll.u32 %v303_v12, 16  ;;  %v304_v19 = vld [vmem:[%s3531_s6 + $0x4] sm:$0xf]  ;;  %v3326_v20 = vld [vmem:[%s3509_s25 + $0x48] sm:$0xff]   ;;  %vm3542_vm4 = vmand %vm392_vm1, %vm393_vm0  ;;  %v485_v28 = vshll.u32 %v3536_v16, 16 }
  0x1c   : > { %3068 = vmatprep.subr.bf16.mxu1 %v3319_v6  ;;  %v305_v23 = vld [vmem:[%s3531_s6 + $0x8] sm:$0xf]  ;;  %v320_v24 = vshrl.u32 %v304_v19, 16  ;;  %v323_v25 = vshll.u32 %v304_v19, 16  ;;  %vm3548_vm5 = vmand %vm398_vm3, %vm399_vm2  ;;  %v401_v27 = vld [vmem:[#allocation2 + $0xc] sm:$0x1] }
  0x1d   : > { %v314_v21 = vrot.slane %v312_v14, 7  ;;  %v328_v29 = vshrl.u32 %v305_v23, 16  ;;  %v404_v30 = vld [vmem:[#allocation2 + $0x10] sm:$0xf]  ;;  %v3327_v31 = vld [vmem:[%s3509_s25 + $0x8] sm:$0xff]   ;;  %v331_v35 = vshll.u32 %v305_v23, 16  ;;  %vm3584_vm8 = vmor %vm478_vm6, %vm479_vm7 }
  0x1e   : > { %3045 = vmatpush3.bf16.msra.mxu0 %v3318_v5  ;;  %v322_v34 = vrot.slane %v320_v24, 7  ;;  %v407_v36 = vld [vmem:[#allocation2 + $0x14] sm:$0x1]  ;;  %v3328_v37 = vld [vmem:[%s3509_s25 + $0x40] sm:$0xff]   ;;  %v484_v39 = vrot.slane %v482_v18, 4  ;;  %v487_v48 = vrot.slane %v485_v28, 5 }
  0x1f   : > { %3069 = vmatpush3.bf16.msra.mxu1 %v3319_v6  ;;  %3046 = vmatprep.subr.bf16.mxu0 %v3320_v7  ;;  %v317_v32 = vor.u32 %v315_v15, %v314_v21  ;;  %v318_v33 = vrot.slane %v314_v21, 4  ;;  %v3555_v38 = vld [vmem:[#allocation2 + $0x4] sm:$0x1]  ;;  %v330_v40 = vrot.slane %v328_v29, 7  ;;  %v410_v41 = vld [vmem:[#allocation2 + $0x18] sm:$0xf] }
  0x20   : > { %3070 = vmatprep.subr.bf16.mxu1 %v3321_v8  ;;  %v413_v42 = vld [vmem:[#allocation2 + $0x1c] sm:$0x1]  ;;  %v3329_v43 = vld [vmem:[%s3509_s25] sm:$0xff]   ;;  %v325_v46 = vor.u32 %v323_v25, %v322_v34  ;;  %v326_v47 = vrot.slane %v322_v34, 4  ;;  %v491_v55 = vshll.u32 %v3555_v38, 16  ;;  %v488_v56 = vor.u32 %v487_v48, %v484_v39  ;;  %v3373_v26 = vld [vmem:[%s3509_s25 + $0x1f0] sm:$0xff]  }
  0x21   : > { %v396_v44 = vsel %vm3542_vm4, %v317_v32, %v395_v17  ;;  %v402_v45 = vsel %vm3548_vm5, %v318_v33, %v401_v27  ;;  %v333_v49 = vor.u32 %v331_v35, %v330_v40  ;;  %v334_v50 = vrot.slane %v330_v40, 4  ;;  %v3572_v57 = vld [vmem:[%s3509_s25 + $0xb8] sm:$0xff]   ;;  %v306_v19 = vld [vmem:[%s3531_s6 + $0xc] sm:$0xf]  ;;  %v307_v25 = vld [vmem:[%s3531_s6 + $0x10] sm:$0xf] }
  0x22   : > { %3047 = vmatpush3.bf16.msra.mxu0 %v3320_v7  ;;  %397 = vst [vmem:[#allocation2 + $0x8] sm:$0xf] %v396_v44  ;;  %403 = vst [vmem:[#allocation2 + $0xc] sm:$0x1] %v402_v45  ;;  %v405_v51 = vsel %vm3542_vm4, %v325_v46, %v404_v30  ;;  %v408_v52 = vsel %vm3548_vm5, %v326_v47, %v407_v36  ;;  %v3333_v58 = vld [vmem:[%s3509_s25 + $0xf8] sm:$0xff]   ;;  %v493_v61 = vrot.slane %v491_v55, 5 }
  0x23   : > { %3071 = vmatpush3.bf16.msra.mxu1 %v3321_v8  ;;  %3048 = vmatprep.subr.bf16.mxu0 %v3322_v9  ;;  %406 = vst [vmem:[#allocation2 + $0x10] sm:$0xf] %v405_v51  ;;  %409 = vst [vmem:[#allocation2 + $0x14] sm:$0x1] %v408_v52  ;;  %v411_v53 = vsel %vm3542_vm4, %v333_v49, %v410_v41  ;;  %v414_v54 = vsel %vm3548_vm5, %v334_v50, %v413_v42  ;;  %v489_v62 = vrot.slane %v488_v56, 4  ;;  %v3337_v46 = vld [vmem:[%s3509_s25 + $0xe8] sm:$0xff]  }
  0x24   : > { %3072 = vmatprep.subr.bf16.mxu1 %v3323_v10  ;;  %412 = vst [vmem:[#allocation2 + $0x18] sm:$0xf] %v411_v53  ;;  %415 = vst [vmem:[#allocation2 + $0x1c] sm:$0x1] %v414_v54  ;;  %v336_v34 = vshrl.u32 %v306_v19, 16  ;;  %v339_v35 = vshll.u32 %v306_v19, 16 }
  0x25   : > { %v347_v39 = vshll.u32 %v307_v25, 16  ;;  %v416_v40 = vld [vmem:[#allocation2 + $0x20] sm:$0xf]  ;;  %v419_v41 = vld [vmem:[#allocation2 + $0x24] sm:$0x1]  ;;  %vm900_vm9 = vcmask 1042432  }
  0x26   : > { %3049 = vmatpush3.bf16.msra.mxu0 %v3322_v9  ;;  %v308_v42 = vld [vmem:[%s3531_s6 + $0x14] sm:$0xf]  ;;  %v338_v47 = vrot.slane %v336_v34, 7  ;;  %v422_v48 = vld [vmem:[#allocation2 + $0x28] sm:$0xf]  ;;  %vm901_vm10 = vcmask 1046532  }
  0x27   : > { %3073 = vmatpush3.bf16.msra.mxu1 %v3323_v10  ;;  %3050 = vmatprep.subr.bf16.mxu0 %v3324_v11  ;;  %v309_v49 = vld [vmem:[%s3531_s6 + $0x18] sm:$0xf]  ;;  %v425_v51 = vld [vmem:[#allocation2 + $0x2c] sm:$0x1]  ;;  %v352_v52 = vshrl.u32 %v308_v42, 16  ;;  %v355_v53 = vshll.u32 %v308_v42, 16  ;;  %vm3652_vm11 = vmor %vm900_vm9, %vm901_vm10 }
  0x28   : > { %3074 = vmatprep.subr.bf16.mxu1 %v3325_v13  ;;  %v360_v54 = vshrl.u32 %v309_v49, 16  ;;  %v3363_v22 = vld [vmem:[%s3509_s25 + $0x158] sm:$0xff]  }
  0x29   : > { %v447_v59 = vld [vmem:[#allocation2 + $0x8] sm:$0xf]  ;;  %v3575_v60 = vld [vmem:[#allocation2 + $0xc] sm:$0x1] }
  0x2a   : > { %3051 = vmatpush3.bf16.msra.mxu0 %v3324_v11  ;;  %v496_v63 = vshrl.u32 %v447_v59, 16  ;;  %v499_v0 = vshll.u32 %v447_v59, 16  ;;  %v505_v1 = vshll.u32 %v3575_v60, 16  ;;  %v2657_v2 = vcombine.low %v3536_v16, %v447_v59  ;;  %v448_v3 = vld [vmem:[#allocation2 + $0x10] sm:$0xf] }
  0x2b   : > { %3075 = vmatpush3.bf16.msra.mxu1 %v3325_v13  ;;  %3052 = vmatprep.subr.bf16.mxu0 %v3326_v20  ;;  %v3580_v4 = vld [vmem:[#allocation2 + $0x14] sm:$0x1]  ;;  %v449_v8 = vld [vmem:[#allocation2 + $0x18] sm:$0xf]  ;;  %v510_v9 = vshrl.u32 %v448_v3, 16  ;;  %v513_v11 = vshll.u32 %v448_v3, 16 }
  0x2c   : > { %3076 = vmatprep.subr.bf16.mxu1 %v3327_v31  ;;  %v498_v6 = vrot.slane %v496_v63, 4  ;;  %v501_v7 = vrot.slane %v499_v0, 5  ;;  %3080 = vmatprep.mubr.bf16.mxu1 %v2657_v2  ;;  %v3588_v10 = vld [vmem:[#allocation2 + $0x1c] sm:$0x1]  ;;  %v519_v12 = vshll.u32 %v3580_v4, 16  ;;  %v524_v13 = vshrl.u32 %v449_v8, 16 }
  0x2d   : > { %v527_v14 = vshll.u32 %v449_v8, 16  ;;  %v507_v16 = vrot.slane %v505_v1, 5  ;;  %v512_v17 = vrot.slane %v510_v9, 4  ;;  %v533_v18 = vshll.u32 %v3588_v10, 16  ;;  %v3334_v59 = vld [vmem:[%s3509_s25 + $0xb0] sm:$0xff]  }
  0x2e   : > { %3053 = vmatpush3.bf16.msra.mxu0 %v3326_v20  ;;  %v502_v15 = vor.u32 %v501_v7, %v498_v6  ;;  %v494_v20 = vsel %vm3584_vm8, %v489_v62, %v493_v61  ;;  %v515_v21 = vrot.slane %v513_v11, 5  ;;  %v526_v23 = vrot.slane %v524_v13, 4  ;;  %v428_v62 = vld [vmem:[#allocation2 + $0x30] sm:$0xf]  ;;  %v431_v63 = vld [vmem:[#allocation2 + $0x34] sm:$0x1] }
  0x2f   : > { %3077 = vmatpush3.bf16.msra.mxu1 %v3327_v31  ;;  %3054 = vmatprep.subr.bf16.mxu0 %v3328_v37  ;;  %v529_v24 = vrot.slane %v527_v14, 5  ;;  %v521_v28 = vrot.slane %v519_v12, 5  ;;  %v535_v29 = vrot.slane %v533_v18, 5  ;;  %v2658_v30 = vcombine.low %v448_v3, %v449_v8  ;;  %v3335_v31 = vld [vmem:[%s3509_s25 + $0xf0] sm:$0xff]   ;;  %v434_v6 = vld [vmem:[#allocation2 + $0x38] sm:$0xf] }
  0x30   : > { %3078 = vmatprep.subr.bf16.mxu1 %v3329_v43  ;;  %v503_v27 = vrot.slane %v502_v15, 4  ;;  %v516_v32 = vor.u32 %v515_v21, %v512_v17  ;;  %v341_v61 = vor.u32 %v339_v35, %v338_v47  ;;  %v354_v3 = vrot.slane %v352_v52, 7  ;;  %v437_v7 = vld [vmem:[#allocation2 + $0x3c] sm:$0x1]  ;;  %v3339_v13 = vld [vmem:[%s3509_s25 + $0xe0] sm:$0xff]   ;;  %v3336_v18 = vld [vmem:[%s3509_s25 + $0xa8] sm:$0xff]  }
  0x31   : > { %v530_v33 = vor.u32 %v529_v24, %v526_v23  ;;  %v362_v11 = vrot.slane %v360_v54, 7  ;;  %v363_v12 = vshll.u32 %v309_v49, 16  ;;  %v3340_v35 = vld [vmem:[%s3509_s25 + $0x98] sm:$0xff]  }
  0x32   : > { %3055 = vmatpush3.bf16.msra.mxu0 %v3328_v37  ;;  %v508_v36 = vsel %vm3584_vm8, %v503_v27, %v507_v16  ;;  %v344_v37 = vshrl.u32 %v307_v25, 16  ;;  %v517_v44 = vrot.slane %v516_v32, 4  ;;  %v417_v8 = vsel %vm3542_vm4, %v341_v61, %v416_v40  ;;  %v3341_v25 = vld [vmem:[%s3509_s25 + $0xd8] sm:$0xff]   ;;  %v3627_v27 = vld [vmem:[#allocation2] sm:$0xe] }
  0x33   : > { %3079 = vmatpush3.bf16.msra.mxu1 %v3329_v43  ;;  %3088 = vmatprep.subr.bf16.mxu0 %v3572_v57  ;;  %v2645_v43 = vcombine.low %v494_v20, %v508_v36  ;;  %v531_v45 = vrot.slane %v530_v33, 4  ;;  %418 = vst [vmem:[#allocation2 + $0x20] sm:$0xf] %v417_v8  ;;  %v357_v16 = vor.u32 %v355_v53, %v354_v3  ;;  %v358_v17 = vrot.slane %v354_v3, 4  ;;  %v3345_v33 = vld [vmem:[%s3509_s25 + $0xd0] sm:$0xff]  }
  0x34   : > { %3112 = vmatprep.subr.bf16.mxu1 %v3333_v58  ;;  %v346_v50 = vrot.slane %v344_v37, 7  ;;  %v522_v55 = vsel %vm3584_vm8, %v517_v44, %v521_v28  ;;  %v365_v19 = vor.u32 %v363_v12, %v362_v11  ;;  %v366_v20 = vrot.slane %v362_v11, 4  ;;  %v3349_v12 = vld [vmem:[%s3509_s25 + $0xc0] sm:$0xff]  }
  0x35   : > { %3056 = vmatprep.mubr.bf16.mxu0 %v2645_v43  ;;  %v536_v56 = vsel %vm3584_vm8, %v531_v45, %v535_v29  ;;  %v429_v21 = vsel %vm3542_vm4, %v357_v16, %v428_v62  ;;  %v432_v23 = vsel %vm3548_vm5, %v358_v17, %v431_v63  ;;  %v905_v28 = vrot.slane %v3555_v38, 5  ;;  %v877_v45 = vld [vmem:[#allocation2 + $0x8] sm:$0xe] }
  0x36   : > { %3081 = vmatmul.mubr.bf16.vlgmr.msra.gmra.mxu1 %v2658_v30  ;;  %v2646_v0 = vcombine.low %v522_v55, %v536_v56  ;;  %v349_v1 = vor.u32 %v347_v39, %v346_v50  ;;  %v350_v2 = vrot.slane %v346_v50, 4  ;;  %430 = vst [vmem:[#allocation2 + $0x30] sm:$0xf] %v429_v21  ;;  %433 = vst [vmem:[#allocation2 + $0x34] sm:$0x1] %v432_v23  ;;  %v909_v29 = vrot.slane %v3575_v60, 5 }
  0x37   : > { %3113 = vmatpush3.bf16.msra.mxu1 %v3333_v58  ;;  %v342_v58 = vrot.slane %v338_v47, 4  ;;  %v435_v24 = vsel %vm3542_vm4, %v365_v19, %v434_v6  ;;  %v3338_v30 = vld [vmem:[%s3509_s25 + $0xa0] sm:$0xff]   ;;  %v2669_v34 = vrot.slane %v3627_v27, 9  ;;  %v3347_v63 = vld [vmem:[%s3509_s25 + $0xc8] sm:$0xff]   ;;  %v3344_v6 = vld [vmem:[%s3509_s25 + $0x90] sm:$0xff]  }
  0x38   : > { %3114 = vmatprep.subr.bf16.mxu1 %v3335_v31  ;;  %3057 = vmatmul.mubr.bf16.vlgmr.msra.gmra.mxu0 %v2646_v0  ;;  %v423_v14 = vsel %vm3542_vm4, %v349_v1, %v422_v48  ;;  %v426_v15 = vsel %vm3548_vm5, %v350_v2, %v425_v51  ;;  %436 = vst [vmem:[#allocation2 + $0x38] sm:$0xf] %v435_v24  ;;  %v878_v19 = vld [vmem:[#allocation2 + $0x10] sm:$0xe] }
  0x39   : > { %v420_v9 = vsel %vm3548_vm5, %v342_v58, %v419_v41  ;;  %3089 = vmatpush3.bf16.msra.mxu0 %v3572_v57  ;;  %424 = vst [vmem:[#allocation2 + $0x28] sm:$0xf] %v423_v14  ;;  %427 = vst [vmem:[#allocation2 + $0x2c] sm:$0x1] %v426_v15  ;;  %v438_v57 = vsel %vm3548_vm5, %v366_v20, %v437_v7  ;;  %v3350_v7 = vld [vmem:[#allocation2 + $0x8] ss:$8 sps:$4 sm:$0xff]  }
  0x3a   : > { %421 = vst [vmem:[#allocation2 + $0x24] sm:$0x1] %v420_v9  ;;  %3090 = vmatprep.subr.bf16.mxu0 %v3334_v59  ;;  %439 = vst [vmem:[#allocation2 + $0x3c] sm:$0x1] %v438_v57  ;;  %v879_v20 = vld [vmem:[#allocation2 + $0x18] sm:$0xe] }
  0x3b   : > { %3115 = vmatpush3.bf16.msra.mxu1 %v3335_v31  ;;  %v450_v31 = vld [vmem:[#allocation2 + $0x20] sm:$0xf]  ;;  %v2671_v60 = vrot.slane %v878_v19, 9  ;;  %v1259_v19 = vld [vmem:[#allocation2 + $0x8] sm:$0xf] }
  0x3c   : > { %3116 = vmatprep.subr.bf16.mxu1 %v3337_v46  ;;  %v538_v39 = vshrl.u32 %v450_v31, 16  ;;  %v541_v40 = vshll.u32 %v450_v31, 16 }
  0x3d   : > { %3091 = vmatpush3.bf16.msra.mxu0 %v3334_v59  ;;  %v452_v49 = vld [vmem:[#allocation2 + $0x30] sm:$0xf]  ;;  %v3641_v50 = vld [vmem:[#allocation2 + $0x34] sm:$0x1] }
  0x3e   : > { %3092 = vmatprep.subr.bf16.mxu0 %v3336_v18  ;;  %v543_v47 = vrot.slane %v541_v40, 5  ;;  %v566_v61 = vshrl.u32 %v452_v49, 16  ;;  %v569_v58 = vshll.u32 %v452_v49, 16  ;;  %v575_v62 = vshll.u32 %v3641_v50, 16  ;;  %v880_v40 = vld [vmem:[#allocation2 + $0x20] sm:$0xe] }
  0x3f   : > { %3117 = vmatpush3.bf16.msra.mxu1 %v3337_v46  ;;  %v540_v46 = vrot.slane %v538_v39, 4  ;;  %v453_v55 = vld [vmem:[#allocation2 + $0x38] sm:$0xf]  ;;  %v906_v39 = vsel %vm3652_vm11, %v2669_v34, %v905_v28  ;;  %v3348_v28 = vld [vmem:[%s3509_s25 + $0x80] sm:$0xff]   ;;  %v2672_v34 = vrot.slane %v879_v20, 9 }
  0x40   : > { %3118 = vmatprep.subr.bf16.mxu1 %v3339_v13  ;;  %v451_v36 = vld [vmem:[#allocation2 + $0x28] sm:$0xf]  ;;  %v3637_v37 = vld [vmem:[#allocation2 + $0x2c] sm:$0x1]  ;;  %v580_v1 = vshrl.u32 %v453_v55, 16  ;;  %v583_v2 = vshll.u32 %v453_v55, 16  ;;  %v2660_v24 = vcombine.low %v452_v49, %v453_v55 }
  0x41   : > { %v3632_v32 = vld [vmem:[#allocation2 + $0x24] sm:$0x1]  ;;  %3093 = vmatpush3.bf16.msra.mxu0 %v3336_v18  ;;  %v552_v42 = vshrl.u32 %v451_v36, 16  ;;  %v555_v43 = vshll.u32 %v451_v36, 16  ;;  %v561_v44 = vshll.u32 %v3637_v37, 16  ;;  %v2659_v48 = vcombine.low %v450_v31, %v451_v36  ;;  %v3346_v36 = vld [vmem:[%s3509_s25 + $0x88] sm:$0xff]  }
  0x42   : > { %v547_v41 = vshll.u32 %v3632_v32, 16  ;;  %3094 = vmatprep.subr.bf16.mxu0 %v3338_v30  ;;  %v544_v56 = vor.u32 %v543_v47, %v540_v46  ;;  %v3643_v59 = vld [vmem:[#allocation2 + $0x3c] sm:$0x1]  ;;  %v568_v9 = vrot.slane %v566_v61, 4  ;;  %v571_v11 = vrot.slane %v569_v58, 5 }
  0x43   : > { %3119 = vmatpush3.bf16.msra.mxu1 %v3339_v13  ;;  %v554_v52 = vrot.slane %v552_v42, 4  ;;  %v557_v53 = vrot.slane %v555_v43, 5  ;;  %v563_v54 = vrot.slane %v561_v44, 5  ;;  %3084 = vmatprep.mubr.bf16.mxu1 %v2659_v48  ;;  %v589_v3 = vshll.u32 %v3643_v59, 16  ;;  %v881_v38 = vld [vmem:[#allocation2 + $0x28] sm:$0xe] }
  0x44   : > { %3120 = vmatprep.subr.bf16.mxu1 %v3341_v25  ;;  %v549_v51 = vrot.slane %v547_v41, 5  ;;  %v545_v8 = vrot.slane %v544_v56, 4  ;;  %v2670_v13 = vrot.slane %v877_v45, 9  ;;  %v577_v15 = vrot.slane %v575_v62, 5  ;;  %3085 = vmatmul.mubr.bf16.gmra.mxu1 %v2660_v24  ;;  %v3353_v44 = vld [vmem:[%s3509_s25 + $0x178] sm:$0xff]  }
  0x45   : > { %3095 = vmatpush3.bf16.msra.mxu0 %v3338_v30  ;;  %v558_v0 = vor.u32 %v557_v53, %v554_v52  ;;  %v582_v16 = vrot.slane %v580_v1, 4  ;;  %v585_v17 = vrot.slane %v583_v2, 5  ;;  %v572_v23 = vor.u32 %v571_v11, %v568_v9  ;;  %3128 = vmatprep.mubr.bf16.mxu1 %v3350_v7  ;;  %v3352_v52 = vld [vmem:[%s3509_s25 + $0x138] sm:$0xff]   ;;  %v882_v53 = vld [vmem:[#allocation2 + $0x30] sm:$0xe]  ;;  %v3357_v2 = vld [vmem:[%s3509_s25 + $0x168] sm:$0xff]  }
  0x46   : > { %3096 = vmatprep.subr.bf16.mxu0 %v3340_v35  ;;  %v550_v21 = vsel %vm3584_vm8, %v545_v8, %v549_v51  ;;  %v591_v30 = vrot.slane %v589_v3, 5  ;;  %v913_v41 = vrot.slane %v3580_v4, 5  ;;  %v917_v42 = vrot.slane %v3588_v10, 5  ;;  %v3355_v51 = vld [vmem:[%s3509_s25 + $0x170] sm:$0xff]   ;;  %v310_v56 = vld [vmem:[%s3531_s6 + $0x1c] sm:$0xf] }
  0x47   : > { %3121 = vmatpush3.bf16.msra.mxu1 %v3341_v25  ;;  %v559_v14 = vrot.slane %v558_v0, 4  ;;  %v586_v25 = vor.u32 %v585_v17, %v582_v16  ;;  %v2673_v45 = vrot.slane %v880_v40, 9  ;;  %v921_v46 = vrot.slane %v3632_v32, 5  ;;  %v3358_v55 = vld [vmem:[#allocation2 + $0x28] ss:$8 sps:$4 sm:$0xff]  }
  0x48   : > { %3122 = vmatprep.subr.bf16.mxu1 %v3345_v33  ;;  %v2674_v48 = vrot.slane %v881_v38, 9  ;;  %v925_v49 = vrot.slane %v3637_v37, 5  ;;  %v914_v32 = vsel %vm3652_vm11, %v2671_v60, %v913_v41  ;;  %v918_v61 = vsel %vm3652_vm11, %v2672_v34, %v917_v42  ;;  %v440_v7 = vld [vmem:[#allocation2 + $0x40] sm:$0xf]  ;;  %v3356_v16 = vld [vmem:[%s3509_s25 + $0x128] sm:$0xff]  }
  0x49   : > { %3097 = vmatpush3.bf16.msra.mxu0 %v3340_v35  ;;  %v564_v57 = vsel %vm3584_vm8, %v559_v14, %v563_v54  ;;  %v910_v35 = vsel %vm3652_vm11, %v2670_v13, %v909_v29  ;;  %v587_v43 = vrot.slane %v586_v25, 4  ;;  %v3351_v29 = vld [vmem:[#allocation2 + $0x18] ss:$8 sps:$4 sm:$0xff]   ;;  %v368_v58 = vshrl.u32 %v310_v56, 16  ;;  %v1261_v24 = vld [vmem:[#allocation2 + $0x10] sm:$0xf] }
  0x4a   : > { %v2647_v31 = vcombine.low %v550_v21, %v564_v57  ;;  %3098 = vmatprep.subr.bf16.mxu0 %v3344_v6  ;;  %v2693_v10 = vcombine.low %v906_v39, %v910_v35  ;;  %v883_v54 = vld [vmem:[#allocation2 + $0x38] sm:$0xe]  ;;  %v371_v37 = vshll.u32 %v310_v56, 16  ;;  %v922_v62 = vsel %vm3652_vm11, %v2673_v45, %v921_v46  ;;  %v3361_v13 = vld [vmem:[%s3509_s25 + $0x160] sm:$0xff]   ;;  %v1262_v57 = vld [vmem:[#allocation2 + $0x14] sm:$0x1] }
  0x4b   : > { %3123 = vmatpush3.bf16.msra.mxu1 %v3345_v33  ;;  %v573_v33 = vrot.slane %v572_v23, 4  ;;  %v592_v4 = vsel %vm3584_vm8, %v587_v43, %v591_v30  ;;  %v929_v0 = vrot.slane %v3641_v50, 5  ;;  %v933_v1 = vrot.slane %v3643_v59, 5  ;;  %v3354_v50 = vld [vmem:[%s3509_s25 + $0x130] sm:$0xff]   ;;  %v3360_v21 = vld [vmem:[%s3509_s25 + $0x120] sm:$0xff]  }
  0x4c   : > { %3124 = vmatprep.subr.bf16.mxu1 %v3347_v63  ;;  %3060 = vmatprep.mubr.bf16.mxu0 %v2647_v31  ;;  %v3695_v3 = vrot.slane %v368_v58, 7  ;;  %v2675_v9 = vrot.slane %v882_v53, 9  ;;  %v2676_v11 = vrot.slane %v883_v54, 9  ;;  %v1260_v23 = vld [vmem:[#allocation2 + $0xc] sm:$0x1]  ;;  %v1276_v25 = vshrl.u32 %v1259_v19, 16 }
  0x4d   : > { %v578_v27 = vsel %vm3584_vm8, %v573_v33, %v577_v15  ;;  %3099 = vmatpush3.bf16.msra.mxu0 %v3344_v6  ;;  %v2694_v6 = vcombine.low %v914_v32, %v918_v61  ;;  %v1279_v30 = vshll.u32 %v1259_v19, 16  ;;  %v1285_v31 = vshll.u32 %v1260_v23, 16  ;;  %v3365_v39 = vld [vmem:[%s3509_s25 + $0x150] sm:$0xff]   ;;  %v1266_v53 = vld [vmem:[#allocation2 + $0x24] sm:$0x1] }
  0x4e   : > { %v2648_v47 = vcombine.low %v578_v27, %v592_v4  ;;  %3100 = vmatprep.subr.bf16.mxu0 %v3346_v36  ;;  %v930_v14 = vsel %vm3652_vm11, %v2675_v9, %v929_v0  ;;  %v934_v15 = vsel %vm3652_vm11, %v2676_v11, %v933_v1  ;;  %v374_v17 = vrot.slane %v3695_v3, 4  ;;  %v1542_v41 = vld [vmem:[#allocation2 + $0x10] sm:$0xe]  ;;  %v1263_v4 = vld [vmem:[#allocation2 + $0x18] sm:$0xf] }
  0x4f   : > { %3125 = vmatpush3.bf16.msra.mxu1 %v3347_v63  ;;  %v926_v63 = vsel %vm3652_vm11, %v2674_v48, %v925_v49  ;;  %v2696_v20 = vcombine.low %v930_v14, %v934_v15  ;;  %v1290_v33 = vshrl.u32 %v1261_v24, 16  ;;  %v1293_v35 = vshll.u32 %v1261_v24, 16  ;;  %v1264_v48 = vld [vmem:[#allocation2 + $0x1c] sm:$0x1]  ;;  %v1265_v49 = vld [vmem:[#allocation2 + $0x20] sm:$0xf] }
  0x50   : > { %3126 = vmatprep.subr.bf16.mxu1 %v3349_v12  ;;  %3061 = vmatmul.mubr.bf16.gmra.mxu0 %v2648_v47  ;;  %v2695_v8 = vcombine.low %v922_v62, %v926_v63  ;;  %v1299_v40 = vshll.u32 %v1262_v57, 16  ;;  %v1567_v43 = vrot.slane %v1260_v23, 5  ;;  %v1278_v27 = vrot.slane %v1276_v25, 4  ;;  %v1543_v62 = vld [vmem:[#allocation2 + $0x18] sm:$0xe]  ;;  %v3367_v63 = vld [vmem:[%s3509_s25 + $0x148] sm:$0xff]  }
  0x51   : > { %3101 = vmatpush3.bf16.msra.mxu0 %v3346_v36  ;;  %3104 = vmatprep.mubr.bf16.mxu0 %v2693_v10  ;;  %v1541_v36 = vld [vmem:[#allocation2 + $0x8] sm:$0xe]  ;;  %v1287_v60 = vrot.slane %v1285_v31, 5  ;;  %v1292_v34 = vrot.slane %v1290_v33, 4  ;;  %v2762_v46 = vrot.slane %v1542_v41, 9  ;;  %v1571_v47 = vrot.slane %v1262_v57, 5 }
  0x52   : > { %3102 = vmatprep.subr.bf16.mxu0 %v3348_v28  ;;  %v2761_v42 = vrot.slane %v1541_v36, 9  ;;  %v1304_v54 = vshrl.u32 %v1263_v4, 16  ;;  %v1313_v56 = vshll.u32 %v1264_v48, 16  ;;  %v1318_v58 = vshrl.u32 %v1265_v49, 16  ;;  %v3366_v25 = vld [vmem:[%s3509_s25 + $0x108] sm:$0xff]  }
  0x53   : > { %3127 = vmatpush3.bf16.msra.mxu1 %v3349_v12  ;;  %v373_v12 = vor.u32 %v371_v37, %v3695_v3  ;;  %v1572_v61 = vsel %vm3652_vm11, %v2762_v46, %v1571_v47  ;;  %v1321_v37 = vshll.u32 %v1265_v49, 16  ;;  %v1327_v14 = vshll.u32 %v1266_v53, 16  ;;  %v1267_v36 = vld [vmem:[#allocation2 + $0x28] sm:$0xf]  ;;  %v3753_v49 = vld [vmem:[#allocation2 + $0x3c] sm:$0x1] }
  0x54   : > { %3160 = vmatprep.subr.bf16.mxu1 %v3353_v44  ;;  %v1568_v45 = vsel %vm3652_vm11, %v2761_v42, %v1567_v43  ;;  %v3720_v11 = vrot.slane %v1313_v56, 5  ;;  %v2763_v15 = vrot.slane %v1543_v62, 9  ;;  %v1575_v19 = vrot.slane %v1264_v48, 5  ;;  %v3743_v42 = vld [vmem:[#allocation2 + $0x34] sm:$0x1]  ;;  %v3370_v3 = vld [vmem:[%s3509_s25 + $0x1b8] sm:$0xff]  }
  0x55   : > { %3103 = vmatpush3.bf16.msra.mxu0 %v3348_v28  ;;  %v441_v59 = vsel %vm3542_vm4, %v373_v12, %v440_v7  ;;  %v1281_v28 = vrot.slane %v1279_v30, 5  ;;  %v2785_v1 = vcombine.low %v1568_v45, %v1572_v61  ;;  %v1544_v7 = vld [vmem:[#allocation2 + $0x20] sm:$0xe]  ;;  %v1320_v12 = vrot.slane %v1318_v58, 4 }
  0x56   : > { %3129 = vmatmul.mubr.bf16.vlgmr.msra.gmra.mxu1 %v3351_v29  ;;  %3136 = vmatprep.subr.bf16.mxu0 %v3352_v52  ;;  %442 = vst [vmem:[#allocation2 + $0x40] sm:$0xf] %v441_v59  ;;  %v1295_v29 = vrot.slane %v1293_v35, 5  ;;  %v3727_v24 = vrot.slane %v1327_v14, 5  ;;  %v1579_v57 = vrot.slane %v1266_v53, 5  ;;  %v1576_v31 = vsel %vm3652_vm11, %v2763_v15, %v1575_v19 }
  0x57   : > { %3161 = vmatpush3.bf16.msra.mxu1 %v3353_v44  ;;  %3132 = vmatprep.mubr.bf16.mxu1 %v3358_v55  ;;  %v1301_v44 = vrot.slane %v1299_v40, 5  ;;  %v1282_v10 = vor.u32 %v1281_v28, %v1278_v27  ;;  %v1307_v55 = vshll.u32 %v1263_v4, 16  ;;  %v1269_v35 = vld [vmem:[#allocation2 + $0x30] sm:$0xf]  ;;  %v1332_v43 = vshrl.u32 %v1267_v36, 16 }
  0x58   : > { %3162 = vmatprep.subr.bf16.mxu1 %v3355_v51  ;;  %3105 = vmatmul.mubr.bf16.vlgmr.msra.gmra.mxu0 %v2694_v6  ;;  %v443_v27 = vld [vmem:[#allocation2 + $0x44] sm:$0x1]  ;;  %v1271_v4 = vld [vmem:[#allocation2 + $0x38] sm:$0xf]  ;;  %v1355_v47 = vshll.u32 %v3743_v42, 16  ;;  %v1369_v58 = vshll.u32 %v3753_v49, 16 }
  0x59   : > { %3137 = vmatpush3.bf16.msra.mxu0 %v3352_v52  ;;  %3108 = vmatprep.mubr.bf16.mxu0 %v2695_v8  ;;  %v1296_v52 = vor.u32 %v1295_v29, %v1292_v34  ;;  %v1283_v32 = vrot.slane %v1282_v10, 4  ;;  %v1309_v6 = vrot.slane %v1307_v55, 5  ;;  %v3364_v8 = vld [vmem:[%s3509_s25 + $0x110] sm:$0xff]   ;;  %v1346_v29 = vshrl.u32 %v1269_v35, 16  ;;  %v3368_v10 = vld [vmem:[%s3509_s25 + $0x100] sm:$0xff]  }
  0x5a   : > { %3138 = vmatprep.subr.bf16.mxu0 %v3354_v50  ;;  %v1334_v45 = vrot.slane %v1332_v43, 4  ;;  %v444_v48 = vsel %vm3548_vm5, %v374_v17, %v443_v27  ;;  %v1360_v55 = vshrl.u32 %v1271_v4, 16  ;;  %v1363_v61 = vshll.u32 %v1271_v4, 16  ;;  %v1545_v14 = vld [vmem:[#allocation2 + $0x28] sm:$0xe]  ;;  %v3377_v43 = vld [vmem:[%s3509_s25 + $0x1e0] sm:$0xff]  }
  0x5b   : > { %3163 = vmatpush3.bf16.msra.mxu1 %v3355_v51  ;;  %v3362_v51 = vld [vmem:[%s3509_s25 + $0x118] sm:$0xff]   ;;  %v1297_v0 = vrot.slane %v1296_v52, 4  ;;  %v1288_v9 = vsel %vm3584_vm8, %v1283_v32, %v1287_v60  ;;  %v1348_v52 = vrot.slane %v1346_v29, 4  ;;  %445 = vst [vmem:[#allocation2 + $0x44] sm:$0x1] %v444_v48  ;;  %v1357_v32 = vrot.slane %v1355_v47, 5 }
  0x5c   : > { %3164 = vmatprep.subr.bf16.mxu1 %v3357_v2  ;;  %v3371_v60 = vld [vmem:[%s3509_s25 + $0x1f8] sm:$0xff]   ;;  %v1546_v15 = vld [vmem:[#allocation2 + $0x30] sm:$0xe]  ;;  %v3374_v27 = vld [vmem:[%s3509_s25 + $0x1a8] sm:$0xff]  }
  0x5d   : > { %3139 = vmatpush3.bf16.msra.mxu0 %v3354_v50  ;;  %v3359_v38 = vld [vmem:[#allocation2 + $0x38] ss:$8 sps:$4 sm:$0xff]   ;;  %v1323_v50 = vrot.slane %v1321_v37, 5  ;;  %v1302_v59 = vsel %vm3584_vm8, %v1297_v0, %v1301_v44  ;;  %v1349_v44 = vshll.u32 %v1269_v35, 16  ;;  %v1362_v37 = vrot.slane %v1360_v55, 4  ;;  %v3381_v47 = vld [vmem:[%s3509_s25 + $0x1d0] sm:$0xff]  }
  0x5e   : > { %3140 = vmatprep.subr.bf16.mxu0 %v3356_v16  ;;  %3133 = vmatmul.mubr.bf16.gmra.mxu1 %v3359_v38  ;;  %v1335_v38 = vshll.u32 %v1267_v36, 16  ;;  %v3386_v48 = vld [vmem:[#allocation2 + $0x10] ss:$8 sps:$4 sm:$0xff]  }
  0x5f   : > { %3165 = vmatpush3.bf16.msra.mxu1 %v3357_v2  ;;  %v1306_v2 = vrot.slane %v1304_v54, 4  ;;  %3176 = vmatprep.mubr.bf16.mxu1 %v2785_v1  ;;  %v1351_v53 = vrot.slane %v1349_v44, 5  ;;  %v1273_v54 = vld [vmem:[#allocation2 + $0x40] sm:$0xf]  ;;  %v1365_v1 = vrot.slane %v1363_v61, 5  ;;  %v3378_v61 = vld [vmem:[%s3509_s25 + $0x198] sm:$0xff]  }
  0x60   : > { %3166 = vmatprep.subr.bf16.mxu1 %v3361_v13  ;;  %3109 = vmatmul.mubr.bf16.gmra.mxu0 %v2696_v20  ;;  %v2764_v20 = vrot.slane %v1544_v7, 9  ;;  %v1337_v46 = vrot.slane %v1335_v38, 5  ;;  %v1374_v62 = vshrl.u32 %v1273_v54, 16 }
  0x61   : > { %3141 = vmatpush3.bf16.msra.mxu0 %v3356_v16  ;;  %v2749_v16 = vcombine.low %v1288_v9, %v1302_v59  ;;  %v1352_v17 = vor.u32 %v1351_v53, %v1348_v52  ;;  %v1924_v52 = vld [vmem:[#allocation2 + $0x18] sm:$0xf]  ;;  %v3786_v53 = vld [vmem:[#allocation2 + $0x1c] sm:$0x1] }
  0x62   : > { %3142 = vmatprep.subr.bf16.mxu0 %v3360_v21  ;;  %v1580_v33 = vsel %vm3652_vm11, %v2764_v20, %v1579_v57  ;;  %v1338_v56 = vor.u32 %v1337_v46, %v1334_v45  ;;  %v2765_v20 = vrot.slane %v1545_v14, 9  ;;  %v3379_v45 = vld [vmem:[%s3509_s25 + $0x1d8] sm:$0xff]   ;;  %v3376_v46 = vld [vmem:[%s3509_s25 + $0x1a0] sm:$0xff]  }
  0x63   : > { %3167 = vmatpush3.bf16.msra.mxu1 %v3361_v13  ;;  %v1310_v13 = vor.u32 %v1309_v6, %v1306_v2  ;;  %3152 = vmatprep.mubr.bf16.mxu0 %v2749_v16  ;;  %v2786_v28 = vcombine.low %v1576_v31, %v1580_v33  ;;  %v1371_v2 = vrot.slane %v1369_v58, 5  ;;  %v1353_v7 = vrot.slane %v1352_v17, 4  ;;  %v1547_v16 = vld [vmem:[#allocation2 + $0x38] sm:$0xe]  ;;  %v3383_v58 = vld [vmem:[%s3509_s25 + $0x1c8] sm:$0xff]  }
  0x64   : > { %3168 = vmatprep.subr.bf16.mxu1 %v3363_v22  ;;  %v1339_v0 = vrot.slane %v1338_v56, 4  ;;  %v2767_v31 = vrot.slane %v1547_v16, 9  ;;  %v1591_v33 = vrot.slane %v3753_v49, 5  ;;  %v1922_v49 = vld [vmem:[#allocation2 + $0x10] sm:$0xf] }
  0x65   : > { %3143 = vmatpush3.bf16.msra.mxu0 %v3360_v21  ;;  %v3369_v21 = vld [vmem:[%s3509_s25 + $0x140] sm:$0xff]   ;;  %v3725_v23 = vrot.slane %v1310_v13, 4  ;;  %v1366_v13 = vor.u32 %v1365_v1, %v1362_v37  ;;  %v1942_v55 = vshll.u32 %v1922_v49, 16 }
  0x66   : > { %3144 = vmatprep.subr.bf16.mxu0 %v3362_v51 }
  0x67   : > { %3169 = vmatpush3.bf16.msra.mxu1 %v3363_v22  ;;  %v1324_v22 = vor.u32 %v1323_v50, %v1320_v12  ;;  %v1316_v40 = vsel %vm3584_vm8, %v3725_v23, %v3720_v11  ;;  %v3375_v11 = vld [vmem:[%s3509_s25 + $0x1e8] sm:$0xff]   ;;  %v1587_v12 = vrot.slane %v3743_v42, 5  ;;  %v1548_v23 = vld [vmem:[#allocation2 + $0x40] sm:$0xe]  ;;  %v1944_v37 = vrot.slane %v1942_v55, 5 }
  0x68   : > { %3170 = vmatprep.subr.bf16.mxu1 %v3365_v39  ;;  %v2768_v42 = vrot.slane %v1548_v23, 9  ;;  %v3822_v55 = vld [vmem:[#allocation2 + $0x44] sm:$0x1] }
  0x69   : > { %3145 = vmatpush3.bf16.msra.mxu0 %v3362_v51  ;;  %v1325_v30 = vrot.slane %v1324_v22, 4  ;;  %v1358_v22 = vsel %vm3584_vm8, %v1353_v7, %v1357_v32  ;;  %v1953_v32 = vshrl.u32 %v1924_v52, 16  ;;  %v1928_v7 = vld [vmem:[#allocation2 + $0x28] sm:$0xf] }
  0x6a   : > { %3146 = vmatprep.subr.bf16.mxu0 %v3364_v8  ;;  %v1981_v14 = vshrl.u32 %v1928_v7, 16 }
  0x6b   : > { %3171 = vmatpush3.bf16.msra.mxu1 %v3365_v39  ;;  %v3734_v39 = vld [vmem:[#allocation2 + $0x2c] sm:$0x1]  ;;  %v1330_v41 = vsel %vm3584_vm8, %v1325_v30, %v3727_v24  ;;  %v3372_v24 = vld [vmem:[%s3509_s25 + $0x1b0] sm:$0xff]   ;;  %v1367_v30 = vrot.slane %v1366_v13, 4 }
  0x6c   : > { %3172 = vmatprep.subr.bf16.mxu1 %v3367_v63  ;;  %v1341_v34 = vshll.u32 %v3734_v39, 16  ;;  %v1583_v6 = vrot.slane %v3734_v39, 5  ;;  %v2750_v50 = vcombine.low %v1316_v40, %v1330_v41 }
  0x6d   : > { %3147 = vmatpush3.bf16.msra.mxu0 %v3364_v8  ;;  %v1376_v8 = vrot.slane %v1374_v62, 4 }
  0x6e   : > { %3148 = vmatprep.subr.bf16.mxu0 %v3366_v25  ;;  %v1343_v51 = vrot.slane %v1341_v34, 5  ;;  %v1584_v35 = vsel %vm3652_vm11, %v2765_v20, %v1583_v6  ;;  %v1372_v34 = vsel %vm3584_vm8, %v1367_v30, %v1371_v2  ;;  %v3792_v6 = vld [vmem:[#allocation2 + $0x24] sm:$0x1] }
  0x6f   : > { %3173 = vmatpush3.bf16.msra.mxu1 %v3367_v63  ;;  %v1377_v63 = vshll.u32 %v1273_v54, 16  ;;  %v1939_v54 = vshrl.u32 %v1922_v49, 16 }
  0x70   : > { %3174 = vmatprep.subr.bf16.mxu1 %v3369_v21  ;;  %v1344_v59 = vsel %vm3584_vm8, %v1339_v0, %v1343_v51  ;;  %v3784_v51 = vld [vmem:[#allocation2 + $0x14] sm:$0x1]  ;;  %v1926_v0 = vld [vmem:[#allocation2 + $0x20] sm:$0xf] }
  0x71   : > { %3149 = vmatpush3.bf16.msra.mxu0 %v3366_v25  ;;  %v1379_v9 = vrot.slane %v1377_v63, 5  ;;  %v2751_v57 = vcombine.low %v1344_v59, %v1358_v22  ;;  %v1274_v25 = vld [vmem:[#allocation2 + $0x44] sm:$0x1]  ;;  %v1948_v56 = vshll.u32 %v3784_v51, 16  ;;  %v1941_v17 = vrot.slane %v1939_v54, 4  ;;  %v3380_v59 = vld [vmem:[%s3509_s25 + $0x190] sm:$0xff]  }
  0x72   : > { %3150 = vmatprep.subr.bf16.mxu0 %v3368_v10  ;;  %v1383_v39 = vshll.u32 %v1274_v25, 16  ;;  %v1955_v63 = vrot.slane %v1953_v32, 4  ;;  %v3385_v22 = vld [vmem:[%s3509_s25 + $0x1c0] sm:$0xff]  }
  0x73   : > { %3175 = vmatpush3.bf16.msra.mxu1 %v3369_v21  ;;  %v1380_v19 = vor.u32 %v1379_v9, %v1376_v8  ;;  %v2766_v21 = vrot.slane %v1546_v15, 9  ;;  %v1950_v62 = vrot.slane %v1948_v56, 5  ;;  %v1945_v8 = vor.u32 %v1944_v37, %v1941_v17  ;;  %v3794_v9 = vld [vmem:[#allocation2 + $0x2c] sm:$0x1] }
  0x74   : > { %3208 = vmatprep.subr.bf16.mxu1 %v3371_v60  ;;  %v1385_v38 = vrot.slane %v1383_v39, 5  ;;  %v1984_v15 = vshll.u32 %v1928_v7, 16  ;;  %v1990_v16 = vshll.u32 %v3794_v9, 16  ;;  %v2032_v7 = vshll.u32 %v3822_v55, 16 }
  0x75   : > { %3151 = vmatpush3.bf16.msra.mxu0 %v3368_v10  ;;  %v1381_v36 = vrot.slane %v1380_v19, 4  ;;  %v1588_v40 = vsel %vm3652_vm11, %v2766_v21, %v1587_v12  ;;  %v1970_v12 = vshll.u32 %v1926_v0, 16  ;;  %v1946_v19 = vrot.slane %v1945_v8, 4 }
  0x76   : > { %3177 = vmatmul.mubr.bf16.vlgmr.msra.gmra.mxu1 %v2786_v28  ;;  %3184 = vmatprep.subr.bf16.mxu0 %v3370_v3  ;;  %v2787_v41 = vcombine.low %v1584_v35, %v1588_v40  ;;  %v1592_v28 = vsel %vm3652_vm11, %v2767_v31, %v1591_v33  ;;  %v3382_v33 = vld [vmem:[%s3509_s25 + $0x188] sm:$0xff]   ;;  %v1992_v35 = vrot.slane %v1990_v16, 5 }
  0x77   : > { %3209 = vmatpush3.bf16.msra.mxu1 %v3371_v60  ;;  %v1595_v60 = vrot.slane %v1274_v25, 5  ;;  %v1386_v29 = vsel %vm3584_vm8, %v1381_v36, %v1385_v38  ;;  %v1972_v21 = vrot.slane %v1970_v12, 5  ;;  %v1986_v25 = vrot.slane %v1984_v15, 5  ;;  %v1930_v38 = vld [vmem:[#allocation2 + $0x30] sm:$0xf] }
  0x78   : > { %3210 = vmatprep.subr.bf16.mxu1 %v3373_v26  ;;  %3153 = vmatmul.mubr.bf16.vlgmr.msra.gmra.mxu0 %v2750_v50  ;;  %v2752_v10 = vcombine.low %v1372_v34, %v1386_v29  ;;  %v1976_v50 = vshll.u32 %v3792_v6, 16  ;;  %v1951_v30 = vsel %vm3584_vm8, %v1946_v19, %v1950_v62  ;;  %v3812_v34 = vld [vmem:[#allocation2 + $0x3c] sm:$0x1]  ;;  %v3384_v29 = vld [vmem:[%s3509_s25 + $0x180] sm:$0xff]   ;;  %v3825_v62 = vld [vmem:[#allocation2 + $0x4c] sm:$0x1] }
  0x79   : > { %3185 = vmatpush3.bf16.msra.mxu0 %v3370_v3  ;;  %3156 = vmatprep.mubr.bf16.mxu0 %v2751_v57  ;;  %v1596_v44 = vsel %vm3652_vm11, %v2768_v42, %v1595_v60  ;;  %v1956_v3 = vshll.u32 %v1924_v52, 16  ;;  %v1983_v57 = vrot.slane %v1981_v14, 4  ;;  %v1932_v60 = vld [vmem:[#allocation2 + $0x38] sm:$0xf]  ;;  %v2018_v54 = vshll.u32 %v3812_v34, 16  ;;  %v3392_v14 = vld [vmem:[%s3509_s25 + $0x228] sm:$0xff]  }
  0x7a   : > { %3186 = vmatprep.subr.bf16.mxu0 %v3372_v24  ;;  %3180 = vmatprep.mubr.bf16.mxu1 %v2787_v41  ;;  %v2788_v4 = vcombine.low %v1592_v28, %v1596_v44  ;;  %v3810_v28 = vld [vmem:[#allocation2 + $0x34] sm:$0x1]  ;;  %v2009_v49 = vshrl.u32 %v1932_v60, 16  ;;  %v2012_v52 = vshll.u32 %v1932_v60, 16 }
  0x7b   : > { %3211 = vmatpush3.bf16.msra.mxu1 %v3373_v26  ;;  %v1962_v26 = vshll.u32 %v3786_v53, 16  ;;  %v1958_v1 = vrot.slane %v1956_v3, 5  ;;  %v1987_v39 = vor.u32 %v1986_v25, %v1983_v57  ;;  %v2020_v37 = vrot.slane %v2018_v54, 5  ;;  %v3393_v57 = vld [vmem:[%s3509_s25 + $0x220] sm:$0xff]   ;;  %v3395_v54 = vld [vmem:[%s3509_s25 + $0x210] sm:$0xff]  }
  0x7c   : > { %3212 = vmatprep.subr.bf16.mxu1 %v3375_v11  ;;  %v2014_v17 = vrot.slane %v2012_v52, 5  ;;  %v2230_v25 = vrot.slane %v3784_v51, 5 }
  0x7d   : > { %3187 = vmatpush3.bf16.msra.mxu0 %v3372_v24  ;;  %v1964_v2 = vrot.slane %v1962_v26, 5  ;;  %v1959_v13 = vor.u32 %v1958_v1, %v1955_v63  ;;  %v1978_v24 = vrot.slane %v1976_v50, 5  ;;  %v1988_v42 = vrot.slane %v1987_v39, 4 }
  0x7e   : > { %3181 = vmatmul.mubr.bf16.gmra.mxu1 %v2788_v4  ;;  %3188 = vmatprep.subr.bf16.mxu0 %v3374_v27  ;;  %v1995_v4 = vshrl.u32 %v1930_v38, 16  ;;  %v2011_v26 = vrot.slane %v2009_v49, 4 }
  0x7f   : > { %3213 = vmatpush3.bf16.msra.mxu1 %v3375_v11  ;;  %v1967_v11 = vshrl.u32 %v1926_v0, 16  ;;  %v1960_v23 = vrot.slane %v1959_v13, 4  ;;  %v1993_v44 = vsel %vm3584_vm8, %v1988_v42, %v1992_v35  ;;  %v3387_v0 = vld [vmem:[#allocation2 + $0x20] ss:$8 sps:$4 sm:$0xff]   ;;  %v2046_v13 = vshll.u32 %v3825_v62, 16 }
  0x80   : > { %3214 = vmatprep.subr.bf16.mxu1 %v3377_v43  ;;  %3157 = vmatmul.mubr.bf16.gmra.mxu0 %v2752_v10  ;;  %v1998_v10 = vshll.u32 %v1930_v38, 16  ;;  %v1997_v56 = vrot.slane %v1995_v4, 4  ;;  %v2015_v12 = vor.u32 %v2014_v17, %v2011_v26  ;;  %v2204_v35 = vld [vmem:[#allocation2 + $0x10] sm:$0xe]  ;;  %v3397_v17 = vld [vmem:[%s3509_s25 + $0x200] sm:$0xff]  }
  0x81   : > { %3189 = vmatpush3.bf16.msra.mxu0 %v3374_v27  ;;  %3200 = vmatprep.mubr.bf16.mxu0 %v3386_v48  ;;  %v1969_v20 = vrot.slane %v1967_v11, 4  ;;  %v1965_v36 = vsel %vm3584_vm8, %v1960_v23, %v1964_v2  ;;  %v3819_v48 = vld [vmem:[%s3509_s25 + $0x230] sm:$0xff]   ;;  %v2853_v42 = vrot.slane %v2204_v35, 9 }
  0x82   : > { %3190 = vmatprep.subr.bf16.mxu0 %v3376_v46  ;;  %v2841_v40 = vcombine.low %v1951_v30, %v1965_v36  ;;  %v2000_v32 = vrot.slane %v1998_v10, 5  ;;  %v3390_v11 = vld [vmem:[#allocation2 + $0x30] ss:$8 sps:$4 sm:$0xff]   ;;  %v2234_v36 = vrot.slane %v3786_v53, 5 }
  0x83   : > { %3215 = vmatpush3.bf16.msra.mxu1 %v3377_v43  ;;  %v1973_v31 = vor.u32 %v1972_v21, %v1969_v20  ;;  %v3806_v43 = vld [vmem:[%s3509_s25 + $0x238] sm:$0xff]   ;;  %v2034_v20 = vrot.slane %v2032_v7, 5  ;;  %v2208_v38 = vld [vmem:[#allocation2 + $0x30] sm:$0xe]  ;;  %v2231_v4 = vsel %vm3652_vm11, %v2853_v42, %v2230_v25  ;;  %v2242_v7 = vrot.slane %v3794_v9, 5 }
  0x84   : > { %3216 = vmatprep.subr.bf16.mxu1 %v3379_v45  ;;  %3224 = vmatprep.mubr.bf16.mxu1 %v2841_v40  ;;  %v2001_v1 = vor.u32 %v2000_v32, %v1997_v56  ;;  %v2209_v53 = vld [vmem:[#allocation2 + $0x38] sm:$0xe]  ;;  %v2857_v60 = vrot.slane %v2208_v38, 9  ;;  %v2210_v56 = vld [vmem:[#allocation2 + $0x40] sm:$0xe] }
  0x85   : > { %3191 = vmatpush3.bf16.msra.mxu0 %v3376_v46  ;;  %v1974_v41 = vrot.slane %v1973_v31, 4  ;;  %v1934_v46 = vld [vmem:[#allocation2 + $0x40] sm:$0xf]  ;;  %v2858_v10 = vrot.slane %v2209_v53, 9  ;;  %v2211_v32 = vld [vmem:[#allocation2 + $0x48] sm:$0xe] }
  0x86   : > { %3192 = vmatprep.subr.bf16.mxu0 %v3378_v61  ;;  %v2023_v3 = vshrl.u32 %v1934_v46, 16  ;;  %v2026_v63 = vshll.u32 %v1934_v46, 16  ;;  %v2002_v15 = vrot.slane %v2001_v1, 4  ;;  %v2860_v26 = vrot.slane %v2211_v32, 9 }
  0x87   : > { %3217 = vmatpush3.bf16.msra.mxu1 %v3379_v45  ;;  %v1979_v27 = vsel %vm3584_vm8, %v1974_v41, %v1978_v24  ;;  %v2004_v45 = vshll.u32 %v3810_v28, 16  ;;  %v2048_v24 = vrot.slane %v2046_v13, 5  ;;  %v2205_v41 = vld [vmem:[#allocation2 + $0x18] sm:$0xe] }
  0x88   : > { %3218 = vmatprep.subr.bf16.mxu1 %v3381_v47  ;;  %v2025_v2 = vrot.slane %v2023_v3, 4  ;;  %v2028_v50 = vrot.slane %v2026_v63, 5  ;;  %v2859_v3 = vrot.slane %v2210_v56, 9  ;;  %v2207_v63 = vld [vmem:[#allocation2 + $0x28] sm:$0xe] }
  0x89   : > { %3193 = vmatpush3.bf16.msra.mxu0 %v3378_v61  ;;  %v2006_v61 = vrot.slane %v2004_v45, 5  ;;  %v3391_v45 = vld [vmem:[#allocation2 + $0x40] ss:$8 sps:$4 sm:$0xff]  }
  0x8a   : > { %3194 = vmatprep.subr.bf16.mxu0 %v3380_v59  ;;  %v2029_v19 = vor.u32 %v2028_v50, %v2025_v2  ;;  %v2856_v2 = vrot.slane %v2207_v63, 9 }
  0x8b   : > { %3219 = vmatpush3.bf16.msra.mxu1 %v3381_v47  ;;  %v2842_v47 = vcombine.low %v1979_v27, %v1993_v44  ;;  %v2007_v23 = vsel %vm3584_vm8, %v2002_v15, %v2006_v61  ;;  %v2854_v27 = vrot.slane %v2205_v41, 9  ;;  %v2250_v44 = vrot.slane %v3812_v34, 5 }
  0x8c   : > { %3220 = vmatprep.subr.bf16.mxu1 %v3383_v58  ;;  %v2030_v31 = vrot.slane %v2029_v19, 4  ;;  %v2254_v61 = vrot.slane %v3822_v55, 5 }
  0x8d   : > { %3195 = vmatpush3.bf16.msra.mxu0 %v3380_v59  ;;  %v2235_v49 = vsel %vm3652_vm11, %v2854_v27, %v2234_v36  ;;  %v2251_v34 = vsel %vm3652_vm11, %v2858_v10, %v2250_v44 }
  0x8e   : > { %3196 = vmatprep.subr.bf16.mxu0 %v3382_v33  ;;  %v2035_v40 = vsel %vm3584_vm8, %v2030_v31, %v2034_v20  ;;  %v2877_v5 = vcombine.low %v2231_v4, %v2235_v49 }
  0x8f   : > { %3221 = vmatpush3.bf16.msra.mxu1 %v3383_v58  ;;  %v1936_v58 = vld [vmem:[#allocation2 + $0x48] sm:$0xf] }
  0x90   : > { %3222 = vmatprep.subr.bf16.mxu1 %v3385_v22  ;;  %v2037_v8 = vshrl.u32 %v1936_v58, 16  ;;  %v2040_v59 = vshll.u32 %v1936_v58, 16  ;;  %v2258_v58 = vrot.slane %v3825_v62, 5  ;;  %v2238_v62 = vrot.slane %v3792_v6, 5 }
  0x91   : > { %3197 = vmatpush3.bf16.msra.mxu0 %v3382_v33 }
  0x92   : > { %3198 = vmatprep.subr.bf16.mxu0 %v3384_v29  ;;  %v2039_v16 = vrot.slane %v2037_v8, 4  ;;  %v2042_v21 = vrot.slane %v2040_v59, 5  ;;  %v2259_v1 = vsel %vm3652_vm11, %v2860_v26, %v2258_v58 }
  0x93   : > { %3223 = vmatpush3.bf16.msra.mxu1 %v3385_v22  ;;  %v2016_v22 = vrot.slane %v2015_v12, 4  ;;  %v2243_v12 = vsel %vm3652_vm11, %v2856_v2, %v2242_v7 }
  0x94   : > { %3256 = vmatprep.subr.bf16.mxu1 %v3806_v43  ;;  %v2043_v33 = vor.u32 %v2042_v21, %v2039_v16 }
  0x95   : > { %3199 = vmatpush3.bf16.msra.mxu0 %v3384_v29  ;;  %v2021_v30 = vsel %vm3584_vm8, %v2016_v22, %v2020_v37  ;;  %v2246_v29 = vrot.slane %v3810_v28, 5  ;;  %v2206_v37 = vld [vmem:[#allocation2 + $0x20] sm:$0xe] }
  0x96   : > { %3225 = vmatmul.mubr.bf16.vlgmr.msra.gmra.mxu1 %v2842_v47  ;;  %3232 = vmatprep.subr.bf16.mxu0 %v3806_v43  ;;  %v2843_v39 = vcombine.low %v2007_v23, %v2021_v30  ;;  %v2044_v51 = vrot.slane %v2043_v33, 4  ;;  %v3394_v47 = vld [vmem:[%s3509_s25 + $0x218] sm:$0xff]   ;;  %v2855_v55 = vrot.slane %v2206_v37, 9 }
  0x97   : > { %3264 = vmatpush3.bf16.msra.mxu1 %v3806_v43  ;;  %v2247_v28 = vsel %vm3652_vm11, %v2857_v60, %v2246_v29 }
  0x98   : > { %3257 = vmatprep.subr.bf16.mxu1 %v3819_v48  ;;  %3201 = vmatmul.mubr.bf16.vlgmr.msra.gmra.mxu0 %v3387_v0  ;;  %v2879_v52 = vcombine.low %v2247_v28, %v2251_v34  ;;  %v2255_v0 = vsel %vm3652_vm11, %v2859_v3, %v2254_v61 }
  0x99   : > { %3233 = vmatpush3.bf16.msra.mxu0 %v3806_v43  ;;  %3204 = vmatprep.mubr.bf16.mxu0 %v3390_v11  ;;  %v2049_v43 = vsel %vm3584_vm8, %v2044_v51, %v2048_v24  ;;  %v2880_v8 = vcombine.low %v2255_v0, %v2259_v1  ;;  %v2239_v11 = vsel %vm3652_vm11, %v2855_v55, %v2238_v62 }
  0x9a   : > { %3234 = vmatprep.subr.bf16.mxu0 %v3819_v48  ;;  %3228 = vmatprep.mubr.bf16.mxu1 %v2843_v39  ;;  %v2844_v46 = vcombine.low %v2035_v40, %v2049_v43  ;;  %v2878_v50 = vcombine.low %v2239_v11, %v2243_v12 }
  0x9b   : > { %3265 = vmatpush3.bf16.msra.mxu1 %v3819_v48 }
  0x9c   : > { %3258 = vmatprep.subr.bf16.mxu1 %v3392_v14 }
  0x9d   : > { %3235 = vmatpush3.bf16.msra.mxu0 %v3819_v48  ;;  %v3396_v48 = vld [vmem:[%s3509_s25 + $0x208] sm:$0xff]  }
  0x9e   : > { %3236 = vmatprep.subr.bf16.mxu0 %v3392_v14  ;;  %3229 = vmatmul.mubr.bf16.gmra.mxu1 %v2844_v46 }
  0x9f   : > { %3266 = vmatpush3.bf16.msra.mxu1 %v3392_v14  ;;  %3252 = vmatprep.mubr.bf16.mxu1 %v2879_v52 }
  0xa0   : > { %3259 = vmatprep.subr.bf16.mxu1 %v3393_v57  ;;  %3205 = vmatmul.mubr.bf16.gmra.mxu0 %v3391_v45 }
  0xa1   : > { %3237 = vmatpush3.bf16.msra.mxu0 %v3392_v14  ;;  %3248 = vmatprep.mubr.bf16.mxu0 %v2877_v5 }
  0xa2   : > { %3238 = vmatprep.subr.bf16.mxu0 %v3393_v57 }
  0xa3   : > { %3267 = vmatpush3.bf16.msra.mxu1 %v3393_v57 }
  0xa4   : > { %3260 = vmatprep.subr.bf16.mxu1 %v3394_v47 }
  0xa5   : > { %3239 = vmatpush3.bf16.msra.mxu0 %v3393_v57 }
  0xa6   : > { %3240 = vmatprep.subr.bf16.mxu0 %v3394_v47 }
  0xa7   : > { %3268 = vmatpush3.bf16.msra.mxu1 %v3394_v47 }
  0xa8   : > { %3261 = vmatprep.subr.bf16.mxu1 %v3395_v54 }
  0xa9   : > { %3241 = vmatpush3.bf16.msra.mxu0 %v3394_v47 }
  0xaa   : > { %3242 = vmatprep.subr.bf16.mxu0 %v3395_v54 }
  0xab   : > { %3269 = vmatpush3.bf16.msra.mxu1 %v3395_v54 }
  0xac   : > { %3262 = vmatprep.subr.bf16.mxu1 %v3396_v48 }
  0xad   : > { %3243 = vmatpush3.bf16.msra.mxu0 %v3395_v54 }
  0xae   : > { %3244 = vmatprep.subr.bf16.mxu0 %v3396_v48 }
  0xaf   : > { %3270 = vmatpush3.bf16.msra.mxu1 %v3396_v48 }
  0xb0   : > { %3263 = vmatprep.subr.bf16.mxu1 %v3397_v17 }
  0xb1   : > { %3245 = vmatpush3.bf16.msra.mxu0 %v3396_v48 }
  0xb2   : > { %3246 = vmatprep.subr.bf16.mxu0 %v3397_v17 }
  0xb3   : > { %3271 = vmatpush3.bf16.msra.mxu1 %v3397_v17 }
  0xb5   : > { %3247 = vmatpush3.bf16.msra.mxu0 %v3397_v17 }
  0xb6   : > { %3253 = vmatmul.mubr.bf16.vlgmr.msra.gmra.mxu1 %v2880_v8 }
  0xb8   : > { %3249 = vmatmul.mubr.bf16.vlgmr.msra.gmra.mxu0 %v2878_v50 }
  0xf6   : > { %v3082_v6 = vpop.f32.mrf.mxu1 }
  0xf8   : > { %v3058_v59 = vpop.f32.mrf.mxu0  ;;  %v3876_v9 = vpop.f32.mrf.mxu1 }
  0xf9   : > { %v854_v12 = vadd.f32 %v3082_v6, %v3058_v59 }
  0xfa   : > { %v3874_v13 = vpop.f32.mrf.mxu0  ;;  %v3880_v15 = vpop.f32.mrf.mxu1 }
  0xfc   : > { %v3878_v14 = vpop.f32.mrf.mxu0  ;;  %v3884_v22 = vpop.f32.mrf.mxu1 }
  0xfe   : > { %v3882_v16 = vpop.f32.mrf.mxu0 }
 0x104   : > { %v3086_v19 = vpop.f32.mrf.mxu1 }
 0x106   : > { %v861_v21 = vpop.f32.mrf.mxu1 }
 0x108   : > { %v3087_v24 = vpop.f32.mrf.mxu1 }
 0x10a   : > { %v864_v25 = vpop.f32.mrf.mxu1 }
 0x110   : > { %v3062_v18 = vpop.f32.mrf.mxu0 }
 0x111   : > { %v870_v0 = vadd.f32 %v3086_v19, %v3062_v18  ;;  %v857_v19 = vadd.f32 %v3880_v15, %v3878_v14 }
 0x112   : > { %v724_v20 = vpop.f32.mrf.mxu0 }
 0x113   : > { %v862_v1 = vadd.f32 %v861_v21, %v724_v20 }
 0x114   : > { %v3063_v23 = vpop.f32.mrf.mxu0 }
 0x115   : > { %v873_v7 = vadd.f32 %v3087_v24, %v3063_v23 }
 0x116   : > { %v727_v57 = vpop.f32.mrf.mxu0  ;;  %v3130_v31 = vpop.f32.mrf.mxu1 }
 0x118   : > { %v3106_v30 = vpop.f32.mrf.mxu0  ;;  %v3886_v36 = vpop.f32.mrf.mxu1 }
 0x11a   : > { %v1050_v33 = vpop.f32.mrf.mxu0  ;;  %v3888_v35 = vpop.f32.mrf.mxu1 }
 0x11c   : > { %v3107_v39 = vpop.f32.mrf.mxu0  ;;  %v3892_v51 = vpop.f32.mrf.mxu1 }
 0x11d   : > { %v1084_v59 = vadd.f32 %v3107_v39, %v857_v19 }
 0x11e   : > { %v3890_v40 = vpop.f32.mrf.mxu0  ;;  %v3134_v42 = vpop.f32.mrf.mxu1 }
 0x120   : > { %v3110_v41 = vpop.f32.mrf.mxu0  ;;  %v1236_v27 = vpop.f32.mrf.mxu1 }
 0x121   : > { %v1087_v55 = vadd.f32 %v3110_v41, %v870_v0 }
 0x122   : > { %v1066_v38 = vpop.f32.mrf.mxu0  ;;  %v3135_v60 = vpop.f32.mrf.mxu1 }
 0x123   : > { %v1085_v8 = vadd.f32 %v1066_v38, %v862_v1  ;;  %v1257_v50 = vadd.f32 %v3134_v42, %v1087_v55 }
 0x124   : > { %v3111_v53 = vpop.f32.mrf.mxu0  ;;  %v1239_v44 = vpop.f32.mrf.mxu1 }
 0x126   : > { %v1069_v29 = vpop.f32.mrf.mxu0 }
 0x136   : > { %v3894_v4 = vpop.f32.mrf.mxu1 }
 0x138   : > { %v3154_v43 = vpop.f32.mrf.mxu0  ;;  %v3896_v45 = vpop.f32.mrf.mxu1 }
 0x13a   : > { %v1502_v10 = vpop.f32.mrf.mxu0  ;;  %v3898_v47 = vpop.f32.mrf.mxu1 }
 0x13c   : > { %v3155_v46 = vpop.f32.mrf.mxu0  ;;  %v3902_v28 = vpop.f32.mrf.mxu1 }
 0x13d   : > { %3981 = vst [vmem:[#allocation3_spill] sm:$0xff] %v3902_v28  ;;  %v1088_v28 = vadd.f32 %v3111_v53, %v873_v7 }
 0x13e   : > { %v3900_v49 = vpop.f32.mrf.mxu0  ;;  %v3182_v5 = vpop.f32.mrf.mxu1 }
 0x13f   : > { %v1258_v23 = vadd.f32 %v3135_v60, %v1088_v28 }
 0x140   : > { %v3158_v34 = vpop.f32.mrf.mxu0  ;;  %v1728_v52 = vpop.f32.mrf.mxu1 }
 0x141   : > { %v1539_v18 = vadd.f32 %v3158_v34, %v1257_v50 }
 0x142   : > { %v1518_v54 = vpop.f32.mrf.mxu0  ;;  %v3183_v48 = vpop.f32.mrf.mxu1 }
 0x143   : > { %v1749_v42 = vadd.f32 %v3182_v5, %v1539_v18 }
 0x144   : > { %v3159_v56 = vpop.f32.mrf.mxu0  ;;  %v1731_v32 = vpop.f32.mrf.mxu1 }
 0x146   : > { %v1521_v61 = vpop.f32.mrf.mxu0 }
 0x156   : > { %v3904_v58 = vpop.f32.mrf.mxu1 }
 0x157   : > { %3982 = vst [vmem:[#allocation4_spill] sm:$0xff] %v3904_v58 }
 0x158   : > { %v3202_v3 = vpop.f32.mrf.mxu0  ;;  %v3908_v17 = vpop.f32.mrf.mxu1 }
 0x159   : > { %3984 = vst [vmem:[#allocation6_spill] sm:$0xff] %v3908_v17  ;;  %v846_v17 = vadd.f32 %v3876_v9, %v3874_v13  ;;  %v849_v13 = vadd.f32 %v3884_v22, %v3882_v16 }
 0x15a   : > { %v3906_v26 = vpop.f32.mrf.mxu0  ;;  %v3912_v63 = vpop.f32.mrf.mxu1 }
 0x15b   : > { %3983 = vst [vmem:[#allocation5_spill] sm:$0xff] %v3906_v26  ;;  %3986 = vst [vmem:[#allocation8_spill] sm:$0xff] %v3912_v63  ;;  %v865_v26 = vadd.f32 %v864_v25, %v727_v57  ;;  %v1255_v63 = vadd.f32 %v1236_v27, %v1085_v8  ;;  %v1081_v41 = vadd.f32 %v1050_v33, %v846_v17  ;;  %v3990_v8 = vld [vmem:[#allocation3_spill] sm:$0xff] }
 0x15c   : > { %v3910_v37 = vpop.f32.mrf.mxu0  ;;  %v3916_v2 = vpop.f32.mrf.mxu1  ;;  %v1540_v57 = vadd.f32 %v3159_v56, %v1258_v23  ;;  %v1254_v33 = vadd.f32 %v3888_v35, %v1084_v59  ;;  %v1082_v60 = vadd.f32 %v3890_v40, %v849_v13  ;;  %v2889_v40 = vld [vmem:[%s269_s9] ss:$0 sm:$0xff] }
 0x15d   : > { %3985 = vst [vmem:[#allocation7_spill] sm:$0xff] %v3910_v37  ;;  %v1083_v37 = vadd.f32 %v3106_v30, %v854_v12  ;;  %v1086_v20 = vadd.f32 %v1069_v29, %v865_v26  ;;  %v1537_v24 = vadd.f32 %v1518_v54, %v1255_v63  ;;  %v1251_v30 = vadd.f32 %v3886_v36, %v1081_v41  ;;  %v2890_v63 = vld [vmem:[%s272_s12] ss:$0 sm:$0xff] }
 0x15e   : > { %v3914_v62 = vpop.f32.mrf.mxu0  ;;  %v3230_v11 = vpop.f32.mrf.mxu1  ;;  %v1750_v29 = vadd.f32 %v3183_v48, %v1540_v57  ;;  %v1536_v16 = vadd.f32 %v3155_v46, %v1254_v33  ;;  %v1252_v35 = vadd.f32 %v3892_v51, %v1082_v60 }
 0x15f   : > { %v1253_v6 = vadd.f32 %v3130_v31, %v1083_v37  ;;  %v1256_v9 = vadd.f32 %v1239_v44, %v1086_v20  ;;  %v1747_v14 = vadd.f32 %v1728_v52, %v1537_v24  ;;  %v1533_v31 = vadd.f32 %v1502_v10, %v1251_v30 }
 0x160   : > { %v3206_v58 = vpop.f32.mrf.mxu0  ;;  %v2181_v21 = vpop.f32.mrf.mxu1  ;;  %v1746_v56 = vadd.f32 %v3898_v47, %v1536_v16  ;;  %v3991_v18 = vld [vmem:[#allocation6_spill] sm:$0xff] }
 0x161   : > { %v1535_v27 = vadd.f32 %v3154_v43, %v1253_v6  ;;  %v1920_v15 = vadd.f32 %v3206_v58, %v1749_v42  ;;  %v1538_v39 = vadd.f32 %v1521_v61, %v1256_v9  ;;  %v1743_v10 = vadd.f32 %v3896_v45, %v1533_v31 }
 0x162   : > { %v1899_v38 = vpop.f32.mrf.mxu0  ;;  %v3231_v25 = vpop.f32.mrf.mxu1  ;;  %v3987_v26 = vld [vmem:[#allocation5_spill] sm:$0xff]  ;;  %v3992_v59 = vld [vmem:[#allocation8_spill] sm:$0xff] }
 0x163   : > { %v1918_v28 = vadd.f32 %v1899_v38, %v1747_v14  ;;  %v1745_v36 = vadd.f32 %v3894_v4, %v1535_v27  ;;  %v2202_v44 = vadd.f32 %v3230_v11, %v1920_v15  ;;  %v1748_v34 = vadd.f32 %v1731_v32, %v1538_v39 }
 0x164   : > { %v3207_v53 = vpop.f32.mrf.mxu0  ;;  %v2184_v22 = vpop.f32.mrf.mxu1  ;;  %v1534_v4 = vadd.f32 %v3900_v49, %v1252_v35  ;;  %v1914_v51 = vadd.f32 %v3987_v26, %v1743_v10  ;;  %v3989_v1 = vld [vmem:[#allocation7_spill] sm:$0xff] }
 0x165   : > { %v1921_v43 = vadd.f32 %v3207_v53, %v1750_v29  ;;  %v1916_v54 = vadd.f32 %v3202_v3, %v1745_v36  ;;  %v2200_v48 = vadd.f32 %v2181_v21, %v1918_v28  ;;  %v3988_v3 = vld [vmem:[#allocation4_spill] sm:$0xff]  ;;  %v1917_v55 = vadd.f32 %v3989_v1, %v1746_v56 }
 0x166   : > { %v1902_v5 = vpop.f32.mrf.mxu0  ;;  %v1744_v11 = vadd.f32 %v3990_v8, %v1534_v4  ;;  %v2196_v19 = vadd.f32 %v3991_v18, %v1914_v51 }
 0x167   : > { %v1919_v61 = vadd.f32 %v1902_v5, %v1748_v34  ;;  %v2203_v32 = vadd.f32 %v3231_v25, %v1921_v43  ;;  %v2198_v0 = vadd.f32 %v3988_v3, %v1916_v54  ;;  %v2199_v6 = vadd.f32 %v3992_v59, %v1917_v55 }
 0x168   : > { %v1915_v23 = vadd.f32 %v3914_v62, %v1744_v11 }
 0x169   : > { %v2201_v12 = vadd.f32 %v2184_v22, %v1919_v61 }
 0x16a   : > { %v2197_v53 = vadd.f32 %v3916_v2, %v1915_v23 }
 0x176   : > { %v3254_v52 = vpop.f32.mrf.mxu1 }
 0x177   : > { %v2412_v46 = vadd.f32 %v3254_v52, %v2202_v44 }
 0x178   : > { %v2391_v58 = vpop.f32.mrf.mxu1  ;;  %v3250_v47 = vpop.f32.mrf.mxu0 }
 0x179   : > { %v2427_v17 = vmul.f32 %v2889_v40, %v2412_v46  ;;  %v2410_v37 = vadd.f32 %v2391_v58, %v2200_v48  ;;  %v2408_v20 = vadd.f32 %v3250_v47, %v2198_v0 }
 0x17a   : > { %v3255_v45 = vpop.f32.mrf.mxu1  ;;  %v2375_v24 = vpop.f32.mrf.mxu0 }
 0x17b   : > { %v2413_v7 = vadd.f32 %v3255_v45, %v2203_v32  ;;  %v2425_v50 = vmul.f32 %v2889_v40, %v2410_v37  ;;  %v2442_v21 = vadd.f32 %v2890_v63, %v2427_v17  ;;  %v2423_v42 = vmul.f32 %v2889_v40, %v2408_v20 }
 0x17c   : > { %v2394_v49 = vpop.f32.mrf.mxu1  ;;  %v2406_v57 = vadd.f32 %v2375_v24, %v2196_v19  ;;  %v3251_v25 = vpop.f32.mrf.mxu0 }
 0x17d   : > { %v2428_v41 = vmul.f32 %v2889_v40, %v2413_v7  ;;  %v2411_v38 = vadd.f32 %v2394_v49, %v2201_v12  ;;  %v2440_v9 = vadd.f32 %v2890_v63, %v2425_v50  ;;  %v2450_v27 = vmax.f32 %v2442_v21, 0.0 }
 0x17e   : > { %v2409_v14 = vadd.f32 %v3251_v25, %v2199_v6  ;;  %v2421_v33 = vmul.f32 %v2889_v40, %v2406_v57  ;;  %v2378_v62 = vpop.f32.mrf.mxu0  ;;  %v2438_v39 = vadd.f32 %v2890_v63, %v2423_v42 }
 0x17f   : > { %v2443_v13 = vadd.f32 %v2890_v63, %v2428_v41  ;;  %v2426_v30 = vmul.f32 %v2889_v40, %v2411_v38  ;;  %v2448_v28 = vmax.f32 %v2440_v9, 0.0  ;;  %v2407_v16 = vadd.f32 %v2378_v62, %v2197_v53 }
 0x180   : > { %v2424_v31 = vmul.f32 %v2889_v40, %v2409_v14  ;;  %v2436_v44 = vadd.f32 %v2890_v63, %v2421_v33  ;;  %v2446_v2 = vmax.f32 %v2438_v39, 0.0 }
 0x181   : > { %v2451_v15 = vmax.f32 %v2443_v13, 0.0  ;;  %v2441_v60 = vadd.f32 %v2890_v63, %v2426_v30  ;;  %v2422_v43 = vmul.f32 %v2889_v40, %v2407_v16 }
 0x182   : > { %v2439_v36 = vadd.f32 %v2890_v63, %v2424_v31  ;;  %v2444_v10 = vmax.f32 %v2436_v44, 0.0 }
 0x183   : > { %v2927_v29 = vpack.c.bf16 %v2451_v15, %v2450_v27  ;;  %v2449_v22 = vmax.f32 %v2441_v60, 0.0  ;;  %v2437_v34 = vadd.f32 %v2890_v63, %v2422_v43 }
 0x184   : > { %v2447_v35 = vmax.f32 %v2439_v36, 0.0 }
 0x185   : > { %2931 = vst [vmem:[%s281_s15 + $0x18] sm:$0xff] %v2927_v29   ;;  %v2922_v5 = vpack.c.bf16 %v2449_v22, %v2448_v28  ;;  %v2445_v54 = vmax.f32 %v2437_v34, 0.0 }
 0x186   : > { %v2917_v52 = vpack.c.bf16 %v2447_v35, %v2446_v2 }
 0x187   : > { %2930 = vst [vmem:[%s281_s15 + $0x10] sm:$0xff] %v2922_v5   ;;  %v2912_v48 = vpack.c.bf16 %v2445_v54, %v2444_v10 }
 0x188   : > { %2929 = vst [vmem:[%s281_s15 + $0x8] sm:$0xff] %v2917_v52  }
 0x189   : > { %2913 = vst [vmem:[%s281_s15] sm:$0xff] %v2912_v48  }
 0x18a PF: > { %s14_s19 = sadd.s32 1, %s3436_s19   ;;  %s3993_s15 = smov %s3428_s17 }
 0x18b   : > { %p11_p7 = scmp.ge.s32.totalorder %s14_s19, 10   ;;  %s3994_s16 = smov %s3432_s18 }
 0x18c   : > { %s3995_s17 = smov %s3998_s20  ;;  %s3996_s18 = smov %s4002_s21 }
 0x18d   :  { %13 = sbr.rel (!%p11_p7) target bundleno = 3 (0x3), region = 85 }

// kernel: mla_head_forward.3
= control target key start
LH: loop header
LB: loop body
LE: loop exit
PB: predicated region body
PF: predicated region fallthrough
CT: control target
= control target key end

     0   :  { %s4527_s15 = smov 0   ;;  %s4529_s16 = smov 0   ;;  %s5283_s0 = inlined_call_operand.vmem [shape: bf16[4,2,8,8,256], index: 0, kind: input, shape index: {}]   ;;  %s5284_s1 = inlined_call_operand.vmem [shape: bf16[4,3,3,256,128], index: 1, kind: input, shape index: {}]   ;;  %s5285_s2 = inlined_call_operand.vmem [shape: f32[4,1,128], index: 2, kind: input, shape index: {}]   ;;  %s5286_s3 = inlined_call_operand.vmem [shape: f32[4,1,128], index: 3, kind: input, shape index: {}]   ;;  %s5287_s4 = inlined_call_operand.vmem [shape: bf16[4,2,64,128], index: 4, kind: output, shape index: {}]  }
   0x1   :  { %s4531_s17 = smov 0   ;;  %s4533_s18 = smov 0  }
   0x2   :  { %s4535_s19 = smov 0  }
   0x3 LB: > { %s23_s20 = sadd.s32 1, %s4491_s17  ;;  %s26_s21 = sadd.s32 1, %s4495_s18  ;;  %s4499_s19 = sphi %s4535_s19, %s14_s19   ;;  %s4495_s18 = sphi %s4533_s18, %s5321_s18   ;;  %s4491_s17 = sphi %s4531_s17, %s5320_s17   ;;  %s4487_s16 = sphi %s4529_s16, %s5319_s16   ;;  %s4483_s15 = sphi %s4527_s15, %s5318_s15  }
   0x4   : > { %p24_p0 = scmp.ge.s32.totalorder %s23_s20, 2  ;;  %p3349_p1 = scmp.ge.s32.totalorder %s4499_s19, 1 }
   0x5   : > { %p208_p2 = scmp.lt.s32.totalorder %s4499_s19, 9 }
   0x6   : > { %s5323_s20 = smov (%p24_p0, %s23_s20), 0  ;;  %s5325_s21 = smov (!%p24_p0, %s26_s21), %s4495_s18 }
   0x7   : > { %p209_p3 = pnand %p3349_p1, %p208_p2  ;;  %p28_p4 = scmp.ge.s32.totalorder %s5325_s21, 4 }
   0x9   : > { %s5327_s21 = smov (%p28_p4, %s5325_s21), 0  ;;  %212 = sbr.rel (%p209_p3) target bundleno = 416 (0x1a0), region = 36 }
   0xe   : > { %p253_p5 = scmp.lt.s32.totalorder %s4487_s16, 3  ;;  %v4501_v0 = vmov 0   ;;  %vm393_vm0 = vsmask.f32 7938  ;;  %vm396_vm1 = vsmask.f32 7954 }
   0xf   : > { %283 = vst [vmem:[#allocation2] sm:$0xff] %v4501_v0  ;;  %284 = vst [vmem:[#allocation2 + $0x38] sm:$0x11] %v4501_v0  ;;  %vm403_vm2 = vsmask.f32 256  ;;  %p255_p6 = scmp.lt.s32.totalorder %s4483_s15, 1 }
  0x10   : > { %286 = vst [vmem:[#allocation2 + $0x18] sm:$0x11] %v4501_v0  ;;  %288 = vst [vmem:[#allocation2 + $0x68] sm:$0x11] %v4501_v0  ;;  %s5329_s16 = smov (!%p253_p5, %s4487_s16), 3  ;;  %vm392_vm4 = vcmask 1043456  }
  0x11   : > { %290 = vst [vmem:[#allocation2 + $0x80] sm:$0x11] %v4501_v0  ;;  %292 = vst [vmem:[#allocation2 + $0x88] sm:$0x11] %v4501_v0  ;;  %s4272_s22 = smul.u32 1152, %s5329_s16  ;;  %vm395_vm5 = vcmask 1047556   ;;  %s269_s9 = scalar_lea.vmem %s5285_s2, %s5329_s16 }
  0x12   : > { %294 = vst [vmem:[#allocation2 + $0x40] sm:$0x11] %v4501_v0  ;;  %296 = vst [vmem:[#allocation2 + $0x10] sm:$0x11] %v4501_v0  ;;  %vm406_vm3 = vsmask.f32 4352  ;;  %s272_s12 = scalar_lea.vmem %s5286_s3, %s5329_s16 }
  0x13   : > { %298 = vst [vmem:[#allocation2 + $0x60] sm:$0x11] %v4501_v0  ;;  %300 = vst [vmem:[#allocation2 + $0x48] sm:$0x11] %v4501_v0  ;;  %s4578_s25 = scalar_lea.vmem %s5284_s1, %s4272_s22  ;;  %s5331_s15 = smov (!%p255_p6, %s4483_s15), 1  ;;  %vm402_vm6 = vcmask 1040384  }
  0x14   : > { %301 = vst [vmem:[#allocation2 + $0x70] sm:$0xff] %v4501_v0  ;;  %302 = vst [vmem:[#allocation2 + $0x90] sm:$0x11] %v4501_v0  ;;  %v4314_v1 = vld [vmem:[%s4578_s25 + $0xf8] sm:$0xff]   ;;  %v4318_v5 = vld [vmem:[%s4578_s25 + $0xf0] sm:$0xff]   ;;  %vm405_vm7 = vcmask 1044484  }
  0x15   : > { %v4315_v2 = vld [vmem:[%s4578_s25 + $0x78] sm:$0xff]   ;;  %3896 = vmatprep.subr.bf16.mxu0 %v4314_v1  ;;  %v4319_v6 = vld [vmem:[%s4578_s25 + $0x70] sm:$0xff]   ;;  %v4322_v9 = vld [vmem:[%s4578_s25 + $0xe8] sm:$0xff]   ;;  %s3351_s26 = sshll.u32 %s5329_s16, 5  ;;  %s3350_s27 = sshll.u32 %s5331_s15, 4  ;;  %v508_v42 = vrot.slane %v4501_v0, 4 }
  0x16   : > { %v4316_v3 = vld [vmem:[%s4578_s25 + $0xb8] sm:$0xff]   ;;  %3936 = vmatprep.subr.bf16.mxu1 %v4315_v2  ;;  %v4320_v7 = vld [vmem:[%s4578_s25 + $0xb0] sm:$0xff]   ;;  %v4323_v10 = vld [vmem:[%s4578_s25 + $0x68] sm:$0xff]   ;;  %s259_s28 = sadd.s32 %s3351_s26, %s3350_s27  ;;  %vm502_vm13 = vsmask.f32 3328  ;;  %v511_v44 = vrot.slane %v4501_v0, 5 }
  0x17   : > { %v4317_v4 = vld [vmem:[%s4578_s25 + $0x38] sm:$0xff]   ;;  %3897 = vmatpush3.bf16.msra.mxu0 %v4316_v3  ;;  %v4321_v8 = vld [vmem:[%s4578_s25 + $0x30] sm:$0xff]   ;;  %v4324_v11 = vld [vmem:[%s4578_s25 + $0xa8] sm:$0xff]   ;;  %s3352_s29 = sshll.u32 %s259_s28, 2  ;;  %vm503_vm15 = vsmask.f32 7440 }
  0x18   : > { %3937 = vmatpush3.bf16.msra.mxu1 %v4317_v4  ;;  %3898 = vmatprep.subr.bf16.mxu0 %v4318_v5  ;;  %v4325_v12 = vld [vmem:[%s4578_s25 + $0x28] sm:$0xff]   ;;  %v4326_v13 = vld [vmem:[%s4578_s25 + $0xe0] sm:$0xff]   ;;  %v4330_v17 = vld [vmem:[%s4578_s25 + $0xd8] sm:$0xff]   ;;  %s4642_s6 = scalar_lea.vmem %s5283_s0, %s3352_s29  ;;  %v512_v53 = vor.u32 %v511_v44, %v508_v42  ;;  %s3354_s13 = sshll.u32 %s5331_s15, 3 }
  0x19   : > { %3938 = vmatprep.subr.bf16.mxu1 %v4319_v6  ;;  %v4327_v14 = vld [vmem:[%s4578_s25 + $0x60] sm:$0xff]   ;;  %v4331_v18 = vld [vmem:[%s4578_s25 + $0x58] sm:$0xff]   ;;  %v4334_v21 = vld [vmem:[%s4578_s25 + $0xd0] sm:$0xff]   ;;  %s3355_s14 = sshll.u32 %s5329_s16, 4 }
  0x1a   : > { %v4328_v15 = vld [vmem:[%s4578_s25 + $0xa0] sm:$0xff]   ;;  %v4332_v19 = vld [vmem:[%s4578_s25 + $0x98] sm:$0xff]   ;;  %v4335_v22 = vld [vmem:[%s4578_s25 + $0x50] sm:$0xff]   ;;  %v513_v5 = vrot.slane %v512_v53, 4  ;;  %s5243_s15 = sadd.s32 %s3355_s14, %s3354_s13 }
  0x1b   : > { %3899 = vmatpush3.bf16.msra.mxu0 %v4320_v7  ;;  %v4329_v16 = vld [vmem:[%s4578_s25 + $0x20] sm:$0xff]   ;;  %v4333_v20 = vld [vmem:[%s4578_s25 + $0x18] sm:$0xff]   ;;  %vm4610_vm8 = vmand %vm392_vm4, %vm393_vm0  ;;  %s3356_s16 = sshll.u32 %s5243_s15, 2 }
  0x1c   : > { %3939 = vmatpush3.bf16.msra.mxu1 %v4321_v8  ;;  %3900 = vmatprep.subr.bf16.mxu0 %v4322_v9  ;;  %vm4616_vm9 = vmand %vm395_vm5, %vm396_vm1  ;;  %v4336_v25 = vld [vmem:[%s4578_s25 + $0x90] sm:$0xff]   ;;  %v4338_v29 = vld [vmem:[%s4578_s25 + $0xc8] sm:$0xff]   ;;  %vm1068_vm1 = vcmask 1042432   ;;  %s281_s24 = scalar_lea.vmem %s5287_s4, %s3356_s16 }
  0x1d   : > { %3940 = vmatprep.subr.bf16.mxu1 %v4323_v10  ;;  %vm4623_vm10 = vmand %vm402_vm6, %vm403_vm2  ;;  %v4337_v28 = vld [vmem:[%s4578_s25 + $0x10] sm:$0xff]   ;;  %v4339_v30 = vld [vmem:[%s4578_s25 + $0x48] sm:$0xff]   ;;  %vm1069_vm2 = vcmask 1046532  }
  0x1e   : > { %vm4628_vm11 = vmand %vm405_vm7, %vm406_vm3  ;;  %v4340_v31 = vld [vmem:[%s4578_s25 + $0x88] sm:$0xff]   ;;  %v4342_v33 = vld [vmem:[%s4578_s25 + $0xc0] sm:$0xff]  }
  0x1f   : > { %3901 = vmatpush3.bf16.msra.mxu0 %v4324_v11  ;;  %v4341_v32 = vld [vmem:[%s4578_s25 + $0x8] sm:$0xff]   ;;  %v4343_v34 = vld [vmem:[%s4578_s25 + $0x40] sm:$0xff]   ;;  %vm4651_vm12 = vmor %vm4616_vm9, %vm4610_vm8 }
  0x20   : > { %3941 = vmatpush3.bf16.msra.mxu1 %v4325_v12  ;;  %3902 = vmatprep.subr.bf16.mxu0 %v4326_v13  ;;  %v4344_v35 = vld [vmem:[%s4578_s25 + $0x80] sm:$0xff]   ;;  %vm4659_vm14 = vmor %vm4628_vm11, %vm4623_vm10  ;;  %v409_v43 = vld [vmem:[#allocation2 + $0x18] sm:$0x11] }
  0x21   : > { %3942 = vmatprep.subr.bf16.mxu1 %v4327_v14  ;;  %v4345_v36 = vld [vmem:[%s4578_s25] sm:$0xff]   ;;  %v4346_v45 = vld [vmem:[%s4578_s25 + $0x178] sm:$0xff]   ;;  %v4351_v60 = vld [vmem:[%s4578_s25 + $0x1f0] sm:$0xff]  }
  0x22   : > { %v303_v37 = vld [vmem:[%s4642_s6] sm:$0xff]  ;;  %v4666_v47 = vld [vmem:[#allocation2 + $0x38] sm:$0x11]  ;;  %v304_v61 = vld [vmem:[%s4642_s6 + $0x8] sm:$0xff] }
  0x23   : > { %3903 = vmatpush3.bf16.msra.mxu0 %v4328_v15  ;;  %v312_v39 = vshrl.u32 %v303_v37, 16  ;;  %v315_v40 = vshll.u32 %v303_v37, 16  ;;  %v4347_v48 = vld [vmem:[%s4578_s25 + $0x1f8] sm:$0xff]   ;;  %v515_v54 = vshll.u32 %v4666_v47, 16  ;;  %v305_v1 = vld [vmem:[%s4642_s6 + $0x10] sm:$0xff]  ;;  %v320_v2 = vshrl.u32 %v304_v61, 16  ;;  %vm4689_vm0 = vmor %vm502_vm13, %vm503_vm15 }
  0x24   : > { %3943 = vmatpush3.bf16.msra.mxu1 %v4329_v16  ;;  %3904 = vmatprep.subr.bf16.mxu0 %v4330_v17  ;;  %v4349_v59 = vld [vmem:[%s4578_s25 + $0x1b8] sm:$0xff]   ;;  %v323_v3 = vshll.u32 %v304_v61, 16  ;;  %v331_v7 = vshll.u32 %v305_v1, 16  ;;  %v415_v8 = vld [vmem:[#allocation2 + $0x68] sm:$0x11]  ;;  %v4353_v10 = vld [vmem:[%s4578_s25 + $0x1b0] sm:$0xff]  }
  0x25   : > { %3944 = vmatprep.subr.bf16.mxu1 %v4331_v18  ;;  %v314_v46 = vrot.slane %v312_v39, 7  ;;  %v517_v6 = vrot.slane %v515_v54, 5  ;;  %v322_v11 = vrot.slane %v320_v2, 7  ;;  %v421_v12 = vld [vmem:[#allocation2 + $0x80] sm:$0x11]  ;;  %v4355_v14 = vld [vmem:[%s4578_s25 + $0x1e8] sm:$0xff]   ;;  %vm4833_vm3 = vmor %vm1068_vm1, %vm1069_vm2 }
  0x26   : > { %v307_v53 = vld [vmem:[%s4642_s6 + $0x20] sm:$0xff]  ;;  %v4363_v61 = vld [vmem:[%s4578_s25 + $0x1d8] sm:$0xff]  }
  0x27   : > { %3905 = vmatpush3.bf16.msra.mxu0 %v4332_v19  ;;  %v317_v49 = vor.u32 %v315_v40, %v314_v46  ;;  %v318_v50 = vrot.slane %v314_v46, 4  ;;  %v325_v15 = vor.u32 %v323_v3, %v322_v11  ;;  %v326_v16 = vrot.slane %v322_v11, 4  ;;  %v433_v3 = vld [vmem:[#allocation2 + $0x40] sm:$0x11] }
  0x28   : > { %3945 = vmatpush3.bf16.msra.mxu1 %v4333_v20  ;;  %3906 = vmatprep.subr.bf16.mxu0 %v4334_v21  ;;  %v518_v21 = vsel %vm4689_vm0, %v513_v5, %v517_v6 }
  0x29   : > { %3946 = vmatprep.subr.bf16.mxu1 %v4335_v22  ;;  %v4671_v51 = vsel %vm4651_vm12, %v317_v49, 0  ;;  %v410_v52 = vsel %vm4659_vm14, %v318_v50, %v409_v43  ;;  %v4702_v23 = vsel %vm4651_vm12, %v325_v15, 0  ;;  %v416_v24 = vsel %vm4659_vm14, %v326_v16, %v415_v8  ;;  %v306_v49 = vld [vmem:[%s4642_s6 + $0x18] sm:$0xff]  ;;  %v4350_v50 = vld [vmem:[%s4578_s25 + $0x170] sm:$0xff]  }
  0x2a   : > { %401 = vst [vmem:[#allocation2 + $0x50] sm:$0xff] %v4671_v51  ;;  %411 = vst [vmem:[#allocation2 + $0x18] sm:$0x11] %v410_v52  ;;  %v520_v55 = vshrl.u32 %v4671_v51, 16  ;;  %v523_v56 = vshll.u32 %v4671_v51, 16  ;;  %v3414_v57 = vcombine.high %v4501_v0, %v4671_v51  ;;  %v3413_v58 = vcombine.low %v4501_v0, %v4671_v51 }
  0x2b   : > { %3907 = vmatpush3.bf16.msra.mxu0 %v4336_v25  ;;  %v328_v0 = vshrl.u32 %v305_v1, 16  ;;  %v4357_v25 = vld [vmem:[%s4578_s25 + $0x1a8] sm:$0xff]   ;;  %414 = vst [vmem:[#allocation2 + $0x30] sm:$0xff] %v4702_v23  ;;  %417 = vst [vmem:[#allocation2 + $0x68] sm:$0x11] %v416_v24  ;;  %v336_v54 = vshrl.u32 %v306_v49, 16 }
  0x2c   : > { %3947 = vmatpush3.bf16.msra.mxu1 %v4337_v28  ;;  %3908 = vmatprep.subr.bf16.mxu0 %v4338_v29  ;;  %v522_v62 = vrot.slane %v520_v55, 4  ;;  %v525_v63 = vrot.slane %v523_v56, 5  ;;  %v534_v28 = vshrl.u32 %v4702_v23, 16  ;;  %v537_v29 = vshll.u32 %v4702_v23, 16  ;;  %v4352_v56 = vld [vmem:[%s4578_s25 + $0x130] sm:$0xff]   ;;  %v4354_v1 = vld [vmem:[%s4578_s25 + $0x168] sm:$0xff]  }
  0x2d   : > { %3948 = vmatprep.subr.bf16.mxu1 %v4339_v30  ;;  %1011 = vmatprep.mubr.bf16.mxu1 %v3414_v57  ;;  %v330_v13 = vrot.slane %v328_v0, 7  ;;  %v4359_v30 = vld [vmem:[%s4578_s25 + $0x1e0] sm:$0xff]   ;;  %v339_v55 = vshll.u32 %v306_v49, 16  ;;  %v338_v2 = vrot.slane %v336_v54, 7  ;;  %v309_v49 = vld [vmem:[%s4642_s6 + $0x30] sm:$0xff] }
  0x2e   : > { %v526_v9 = vor.u32 %v525_v63, %v522_v62  ;;  %v539_v37 = vrot.slane %v537_v29, 5  ;;  %v360_v54 = vshrl.u32 %v309_v49, 16 }
  0x2f   : > { %3909 = vmatpush3.bf16.msra.mxu0 %v4340_v31  ;;  %v333_v19 = vor.u32 %v331_v7, %v330_v13  ;;  %v334_v20 = vrot.slane %v330_v13, 4  ;;  %v341_v8 = vor.u32 %v339_v55, %v338_v2  ;;  %v363_v55 = vshll.u32 %v309_v49, 16 }
  0x30   : > { %3949 = vmatpush3.bf16.msra.mxu1 %v4341_v32  ;;  %3910 = vmatprep.subr.bf16.mxu0 %v4342_v33  ;;  %v527_v18 = vrot.slane %v526_v9, 4  ;;  %v342_v9 = vrot.slane %v338_v2, 4 }
  0x31   : > { %3950 = vmatprep.subr.bf16.mxu1 %v4343_v34  ;;  %v4695_v17 = vld [vmem:[#allocation2 + $0x18] sm:$0x11]  ;;  %v4710_v26 = vsel %vm4651_vm12, %v333_v19, 0  ;;  %v422_v27 = vsel %vm4659_vm14, %v334_v20, %v421_v12  ;;  %v4745_v15 = vsel %vm4651_vm12, %v341_v8, 0 }
  0x32   : > { %v529_v22 = vshll.u32 %v4695_v17, 16  ;;  %420 = vst [vmem:[#allocation2 + $0x78] sm:$0xff] %v4710_v26  ;;  %423 = vst [vmem:[#allocation2 + $0x80] sm:$0x11] %v422_v27  ;;  %v548_v32 = vshrl.u32 %v4710_v26, 16  ;;  %v551_v33 = vshll.u32 %v4710_v26, 16  ;;  %v3416_v34 = vcombine.high %v4702_v23, %v4710_v26 }
  0x33   : > { %3911 = vmatpush3.bf16.msra.mxu0 %v4344_v35  ;;  %v4348_v35 = vld [vmem:[%s4578_s25 + $0x138] sm:$0xff]   ;;  %v3415_v39 = vcombine.low %v4702_v23, %v4710_v26  ;;  %v4735_v62 = vld [vmem:[#allocation2 + $0x68] sm:$0x11]  ;;  %426 = vst [vmem:[#allocation2 + $0x8] sm:$0xff] %v4745_v15  ;;  %v565_v27 = vshll.u32 %v4745_v15, 16 }
  0x34   : > { %3951 = vmatpush3.bf16.msra.mxu1 %v4345_v36  ;;  %3976 = vmatprep.subr.bf16.mxu0 %v4346_v45  ;;  %v531_v31 = vrot.slane %v529_v22, 5  ;;  %v536_v36 = vrot.slane %v534_v28, 4  ;;  %v550_v42 = vrot.slane %v548_v32, 4  ;;  %v553_v43 = vrot.slane %v551_v33, 5  ;;  %v4365_v22 = vld [vmem:[%s4578_s25 + $0x198] sm:$0xff]  }
  0x35   : > { %4016 = vmatprep.subr.bf16.mxu1 %v4347_v48  ;;  %v4361_v48 = vld [vmem:[%s4578_s25 + $0x1a0] sm:$0xff]   ;;  %v543_v6 = vshll.u32 %v4735_v62, 16 }
  0x36   : > { %v532_v40 = vsel %vm4689_vm0, %v527_v18, %v531_v31  ;;  %v540_v46 = vor.u32 %v539_v37, %v536_v36  ;;  %v554_v52 = vor.u32 %v553_v43, %v550_v42  ;;  %v567_v36 = vrot.slane %v565_v27, 5  ;;  %v4369_v42 = vld [vmem:[%s4578_s25 + $0x190] sm:$0xff]  }
  0x37   : > { %1012 = vmatmul.mubr.bf16.vlgmr.msra.gmra.mxu1 %v3413_v58  ;;  %v3389_v44 = vcombine.low %v518_v21, %v532_v40  ;;  %v3390_v45 = vcombine.high %v518_v21, %v532_v40  ;;  %v344_v58 = vshrl.u32 %v307_v53, 16  ;;  %v562_v21 = vshrl.u32 %v4745_v15, 16 }
  0x38   : > { %4017 = vmatpush3.bf16.msra.mxu1 %v4349_v59  ;;  %1019 = vmatprep.mubr.bf16.mxu1 %v3416_v34  ;;  %v4732_v57 = vrot.slane %v540_v46, 4  ;;  %v347_v59 = vshll.u32 %v307_v53, 16  ;;  %v555_v63 = vrot.slane %v554_v52, 4  ;;  %v4367_v34 = vld [vmem:[%s4578_s25 + $0x1d0] sm:$0xff]   ;;  %v1073_v43 = vrot.slane %v4666_v47, 5  ;;  %v4362_v46 = vld [vmem:[%s4578_s25 + $0x158] sm:$0xff]  }
  0x39   : > { %4018 = vmatprep.subr.bf16.mxu1 %v4351_v60  ;;  %810 = vmatprep.mubr.bf16.mxu0 %v3390_v45  ;;  %v427_v60 = vld [vmem:[#allocation2 + $0x88] sm:$0x11]  ;;  %v4738_v5 = vld [vmem:[#allocation2 + $0x80] sm:$0x11]  ;;  %v346_v0 = vrot.slane %v344_v58, 7  ;;  %v564_v32 = vrot.slane %v562_v21, 4 }
  0x3a   : > { %811 = vmatmul.mubr.bf16.vlgmr.msra.gmra.mxu0 %v3389_v44  ;;  %v557_v7 = vshll.u32 %v4738_v5, 16  ;;  %v428_v16 = vsel %vm4659_vm14, %v342_v9, %v427_v60  ;;  %v439_v60 = vld [vmem:[#allocation2 + $0x10] sm:$0x11]  ;;  %v1081_v47 = vrot.slane %v4735_v62, 5  ;;  %v3535_v62 = vcombine.low %v4710_v26, %v4745_v15 }
  0x3b   : > { %3977 = vmatpush3.bf16.msra.mxu0 %v4348_v35  ;;  %v349_v11 = vor.u32 %v347_v59, %v346_v0  ;;  %v350_v12 = vrot.slane %v346_v0, 4  ;;  %429 = vst [vmem:[#allocation2 + $0x88] sm:$0x11] %v428_v16  ;;  %v4360_v35 = vld [vmem:[%s4578_s25 + $0x120] sm:$0xff]   ;;  %v568_v44 = vor.u32 %v567_v36, %v564_v32  ;;  %v4366_v59 = vld [vmem:[%s4578_s25 + $0x150] sm:$0xff]   ;;  %v4373_v16 = vld [vmem:[%s4578_s25 + $0x188] sm:$0xff]  }
  0x3c   : > { %4019 = vmatpush3.bf16.msra.mxu1 %v4353_v10  ;;  %3978 = vmatprep.subr.bf16.mxu0 %v4350_v50  ;;  %v545_v10 = vrot.slane %v543_v6, 5  ;;  %v559_v13 = vrot.slane %v557_v7, 5  ;;  %v4364_v50 = vld [vmem:[%s4578_s25 + $0x118] sm:$0xff]   ;;  %v445_v6 = vld [vmem:[#allocation2 + $0x60] sm:$0x11]  ;;  %v4371_v7 = vld [vmem:[%s4578_s25 + $0x1c8] sm:$0xff]  }
  0x3d   : > { %4020 = vmatprep.subr.bf16.mxu1 %v4355_v14  ;;  %v4356_v14 = vld [vmem:[%s4578_s25 + $0x128] sm:$0xff]   ;;  %v4755_v19 = vsel %vm4651_vm12, %v349_v11, 0  ;;  %v434_v20 = vsel %vm4659_vm14, %v350_v12, %v433_v3  ;;  %v4782_v58 = vrot.slane %v568_v44, 4  ;;  %v362_v3 = vrot.slane %v360_v54, 7 }
  0x3e   : > { %v546_v18 = vsel %vm4689_vm0, %v4732_v57, %v545_v10  ;;  %v560_v24 = vsel %vm4689_vm0, %v555_v63, %v559_v13  ;;  %432 = vst [vmem:[#allocation2 + $0x28] sm:$0xff] %v4755_v19  ;;  %435 = vst [vmem:[#allocation2 + $0x40] sm:$0x11] %v434_v20  ;;  %v576_v28 = vshrl.u32 %v4755_v19, 16  ;;  %v579_v29 = vshll.u32 %v4755_v19, 16  ;;  %v4368_v13 = vld [vmem:[%s4578_s25 + $0x110] sm:$0xff]  }
  0x3f   : > { %1020 = vmatmul.mubr.bf16.gmra.mxu1 %v3415_v39  ;;  %3979 = vmatpush3.bf16.msra.mxu0 %v4352_v56  ;;  %v3391_v31 = vcombine.low %v546_v18, %v560_v24  ;;  %v3418_v33 = vcombine.high %v4745_v15, %v4755_v19  ;;  %v3417_v40 = vcombine.low %v4745_v15, %v4755_v19  ;;  %v4372_v36 = vld [vmem:[%s4578_s25 + $0x108] sm:$0xff]  }
  0x40   : > { %4021 = vmatpush3.bf16.msra.mxu1 %v4357_v25  ;;  %3980 = vmatprep.subr.bf16.mxu0 %v4354_v1  ;;  %v4358_v25 = vld [vmem:[%s4578_s25 + $0x160] sm:$0xff]   ;;  %v578_v37 = vrot.slane %v576_v28, 4  ;;  %v581_v39 = vrot.slane %v579_v29, 5  ;;  %v365_v11 = vor.u32 %v363_v55, %v362_v3 }
  0x41   : > { %4022 = vmatprep.subr.bf16.mxu1 %v4359_v30  ;;  %v3392_v30 = vcombine.high %v546_v18, %v560_v24  ;;  %1027 = vmatprep.mubr.bf16.mxu1 %v3418_v33  ;;  %v3534_v18 = vcombine.high %v4671_v51, %v4702_v23  ;;  %v4376_v55 = vld [vmem:[%s4578_s25 + $0x100] sm:$0xff]  }
  0x42   : > { %v582_v45 = vor.u32 %v581_v39, %v578_v37  ;;  %v4780_v56 = vld [vmem:[#allocation2 + $0x88] sm:$0x11]  ;;  %v4807_v24 = vsel %vm4651_vm12, %v365_v11, 0 }
  0x43   : > { %818 = vmatprep.mubr.bf16.mxu0 %v3392_v30  ;;  %3981 = vmatpush3.bf16.msra.mxu0 %v4356_v14  ;;  %v571_v63 = vshll.u32 %v4780_v56, 16  ;;  %v366_v14 = vrot.slane %v362_v3, 4  ;;  %444 = vst [vmem:[#allocation2 + $0x98] sm:$0xff] %v4807_v24  ;;  %v4370_v30 = vld [vmem:[%s4578_s25 + $0x148] sm:$0xff]  }
  0x44   : > { %4023 = vmatpush3.bf16.msra.mxu1 %v4361_v48  ;;  %819 = vmatmul.mubr.bf16.gmra.mxu0 %v3391_v31  ;;  %v308_v48 = vld [vmem:[%s4642_s6 + $0x28] sm:$0xff]  ;;  %v4788_v1 = vrot.slane %v582_v45, 4  ;;  %v4375_v31 = vld [vmem:[%s4578_s25 + $0x1c0] sm:$0xff]  }
  0x45   : > { %4024 = vmatprep.subr.bf16.mxu1 %v4363_v61  ;;  %3982 = vmatprep.subr.bf16.mxu0 %v4358_v25  ;;  %v352_v52 = vshrl.u32 %v308_v48, 16  ;;  %v355_v53 = vshll.u32 %v308_v48, 16  ;;  %v4785_v61 = vld [vmem:[#allocation2 + $0x40] sm:$0x11]  ;;  %v573_v8 = vrot.slane %v571_v63, 5  ;;  %v446_v27 = vsel %vm4659_vm14, %v366_v14, %v445_v6 }
  0x46   : > { %v585_v0 = vshll.u32 %v4785_v61, 16  ;;  %447 = vst [vmem:[#allocation2 + $0x60] sm:$0x11] %v446_v27  ;;  %v4377_v48 = vld [vmem:[%s4578_s25 + $0x180] sm:$0xff]  }
  0x47   : > { %1028 = vmatmul.mubr.bf16.gmra.mxu1 %v3417_v40  ;;  %3983 = vmatpush3.bf16.msra.mxu0 %v4360_v35  ;;  %v354_v2 = vrot.slane %v352_v52, 7  ;;  %v574_v20 = vsel %vm4689_vm0, %v4782_v58, %v573_v8  ;;  %v607_v35 = vshll.u32 %v4807_v24, 16  ;;  %v1045_v52 = vld [vmem:[#allocation2 + $0x50] sm:$0xee] }
  0x48   : > { %4025 = vmatpush3.bf16.msra.mxu1 %v4365_v22  ;;  %3984 = vmatprep.subr.bf16.mxu0 %v4362_v46  ;;  %v587_v12 = vrot.slane %v585_v0, 5  ;;  %v4374_v46 = vld [vmem:[%s4578_s25 + $0x140] sm:$0xff]   ;;  %v3438_v63 = vrot.slane %v1045_v52, 9 }
  0x49   : > { %4026 = vmatprep.subr.bf16.mxu1 %v4367_v34  ;;  %v357_v9 = vor.u32 %v355_v53, %v354_v2  ;;  %v358_v10 = vrot.slane %v354_v2, 4  ;;  %v604_v34 = vshrl.u32 %v4807_v24, 16  ;;  %v609_v45 = vrot.slane %v607_v35, 5 }
  0x4a   : > { %v588_v25 = vsel %vm4689_vm0, %v4788_v1, %v587_v12  ;;  %v1077_v53 = vrot.slane %v4695_v17, 5  ;;  %v4379_v17 = vld [vmem:[%s4578_s25 + $0x2f8] sm:$0xff]  }
  0x4b   : > { %3985 = vmatpush3.bf16.msra.mxu0 %v4364_v50  ;;  %v4801_v21 = vsel %vm4651_vm12, %v357_v9, 0  ;;  %v440_v22 = vsel %vm4659_vm14, %v358_v10, %v439_v60  ;;  %v3394_v32 = vcombine.high %v574_v20, %v588_v25  ;;  %v3393_v33 = vcombine.low %v574_v20, %v588_v25  ;;  %v1044_v50 = vld [vmem:[#allocation2] sm:$0xee]  ;;  %v4381_v12 = vld [vmem:[%s4578_s25 + $0x2b8] sm:$0xff]   ;;  %v4383_v20 = vld [vmem:[%s4578_s25 + $0x2f0] sm:$0xff]  }
  0x4c   : > { %4027 = vmatpush3.bf16.msra.mxu1 %v4369_v42  ;;  %3986 = vmatprep.subr.bf16.mxu0 %v4366_v59  ;;  %438 = vst [vmem:[#allocation2 + $0x58] sm:$0xff] %v4801_v21  ;;  %441 = vst [vmem:[#allocation2 + $0x10] sm:$0x11] %v440_v22  ;;  %v590_v28 = vshrl.u32 %v4801_v21, 16  ;;  %v593_v29 = vshll.u32 %v4801_v21, 16  ;;  %v3420_v40 = vcombine.high %v4801_v21, %v4807_v24  ;;  %v606_v44 = vrot.slane %v604_v34, 4 }
  0x4d   : > { %4028 = vmatprep.subr.bf16.mxu1 %v4371_v7  ;;  %v3419_v42 = vcombine.low %v4801_v21, %v4807_v24  ;;  %826 = vmatprep.mubr.bf16.mxu0 %v3394_v32  ;;  %v3437_v60 = vrot.slane %v1044_v50, 9  ;;  %v4842_v6 = vld [vmem:[#allocation2 + $0x60] sm:$0x11]  ;;  %v4378_v7 = vld [vmem:[%s4578_s25 + $0x278] sm:$0xff]   ;;  %v3533_v10 = vcombine.low %v4671_v51, %v4702_v23  ;;  %v4385_v22 = vld [vmem:[%s4578_s25 + $0x2b0] sm:$0xff]   ;;  %v1085_v32 = vrot.slane %v4738_v5, 5 }
  0x4e   : > { %v592_v37 = vrot.slane %v590_v28, 4  ;;  %v595_v39 = vrot.slane %v593_v29, 5  ;;  %827 = vmatmul.mubr.bf16.gmra.mxu0 %v3393_v33  ;;  %1035 = vmatprep.mubr.bf16.mxu1 %v3420_v40  ;;  %v610_v54 = vor.u32 %v609_v45, %v606_v44  ;;  %v613_v9 = vshll.u32 %v4842_v6, 16  ;;  %v1046_v28 = vld [vmem:[#allocation2 + $0x30] sm:$0xee]  ;;  %v4387_v33 = vld [vmem:[%s4578_s25 + $0x2e8] sm:$0xff]  }
  0x4f   : > { %3987 = vmatpush3.bf16.msra.mxu0 %v4368_v13  ;;  %1036 = vmatmul.mubr.bf16.gmra.mxu1 %v3419_v42  ;;  %v3536_v13 = vcombine.high %v4710_v26, %v4745_v15  ;;  %v1047_v29 = vld [vmem:[#allocation2 + $0x78] sm:$0xee]  ;;  %v4389_v34 = vld [vmem:[%s4578_s25 + $0x2a8] sm:$0xff]   ;;  %v3538_v35 = vcombine.high %v4755_v19, %v4801_v21  ;;  %v4382_v26 = vld [vmem:[%s4578_s25 + $0x270] sm:$0xff]   ;;  %v1089_v44 = vrot.slane %v4780_v56, 5  ;;  %v1093_v45 = vrot.slane %v4785_v61, 5 }
  0x50   : > { %4029 = vmatpush3.bf16.msra.mxu1 %v4373_v16  ;;  %v596_v49 = vor.u32 %v595_v39, %v592_v37  ;;  %3988 = vmatprep.subr.bf16.mxu0 %v4370_v30  ;;  %v4846_v8 = vrot.slane %v610_v54, 4  ;;  %v615_v14 = vrot.slane %v613_v9, 5  ;;  %v1074_v16 = vsel %vm4833_vm3, %v3437_v60, %v1073_v43  ;;  %v4380_v5 = vld [vmem:[%s4578_s25 + $0x238] sm:$0xff]   ;;  %v4391_v39 = vld [vmem:[%s4578_s25 + $0x2e0] sm:$0xff]   ;;  %v1048_v42 = vld [vmem:[#allocation2 + $0x8] sm:$0xee] }
  0x51   : > { %4030 = vmatprep.subr.bf16.mxu1 %v4375_v31  ;;  %1546 = vmatprep.mubr.bf16.mxu1 %v3534_v18  ;;  %v1078_v18 = vsel %vm4833_vm3, %v3438_v63, %v1077_v53  ;;  %v3439_v30 = vrot.slane %v1046_v28, 9  ;;  %v3440_v31 = vrot.slane %v1047_v29, 9  ;;  %v4384_v50 = vld [vmem:[%s4578_s25 + $0x230] sm:$0xff]   ;;  %v4395_v53 = vld [vmem:[%s4578_s25 + $0x2d8] sm:$0xff]   ;;  %v3537_v54 = vcombine.low %v4755_v19, %v4801_v21  ;;  %v4386_v56 = vld [vmem:[%s4578_s25 + $0x268] sm:$0xff]  }
  0x52   : > { %v4839_v3 = vrot.slane %v596_v49, 4  ;;  %v616_v23 = vsel %vm4689_vm0, %v4846_v8, %v615_v14  ;;  %v3478_v27 = vcombine.high %v1074_v16, %v1078_v18  ;;  %v3477_v40 = vcombine.low %v1074_v16, %v1078_v18  ;;  %v4397_v60 = vld [vmem:[%s4578_s25 + $0x298] sm:$0xff]   ;;  %v4388_v63 = vld [vmem:[%s4578_s25 + $0x228] sm:$0xff]   ;;  %v4399_v19 = vld [vmem:[%s4578_s25 + $0x2d0] sm:$0xff]  }
  0x53   : > { %v4837_v2 = vld [vmem:[#allocation2 + $0x10] sm:$0x11]  ;;  %3989 = vmatpush3.bf16.msra.mxu0 %v4372_v36  ;;  %v1082_v36 = vsel %vm4833_vm3, %v3439_v30, %v1081_v47  ;;  %v1086_v37 = vsel %vm4833_vm3, %v3440_v31, %v1085_v32  ;;  %v3441_v49 = vrot.slane %v1048_v42, 9  ;;  %v4390_v21 = vld [vmem:[%s4578_s25 + $0x260] sm:$0xff]   ;;  %v310_v18 = vld [vmem:[%s4642_s6 + $0x38] sm:$0xff] }
  0x54   : > { %4031 = vmatpush3.bf16.msra.mxu1 %v4377_v48  ;;  %v599_v0 = vshll.u32 %v4837_v2, 16  ;;  %3990 = vmatprep.subr.bf16.mxu0 %v4374_v46  ;;  %v3480_v15 = vcombine.high %v1082_v36, %v1086_v37  ;;  %v4393_v46 = vld [vmem:[%s4578_s25 + $0x2a0] sm:$0xff]   ;;  %v1049_v48 = vld [vmem:[#allocation2 + $0x28] sm:$0xee]  ;;  %v4401_v9 = vld [vmem:[%s4578_s25 + $0x290] sm:$0xff]  }
  0x55   : > { %4096 = vmatprep.subr.bf16.mxu1 %v4379_v17  ;;  %v3442_v52 = vrot.slane %v1049_v48, 9  ;;  %v1090_v61 = vsel %vm4833_vm3, %v3441_v49, %v1089_v44  ;;  %v3479_v17 = vcombine.low %v1082_v36, %v1086_v37  ;;  %v4407_v30 = vld [vmem:[%s4578_s25 + $0x2c0] sm:$0xff]   ;;  %v4398_v31 = vld [vmem:[%s4578_s25 + $0x250] sm:$0xff]  }
  0x56   : > { %v601_v11 = vrot.slane %v599_v0, 5  ;;  %v4917_v32 = vld [vmem:[#allocation2] sm:$0xff]  ;;  %v1587_v37 = vld [vmem:[#allocation2 + $0x50] sm:$0xff] }
  0x57   : > { %3991 = vmatpush3.bf16.msra.mxu0 %v4376_v55  ;;  %1547 = vmatmul.mubr.bf16.vlgmr.msra.gmra.mxu1 %v3533_v10  ;;  %v1094_v55 = vsel %vm4833_vm3, %v3442_v52, %v1093_v45  ;;  %v1050_v10 = vld [vmem:[#allocation2 + $0x58] sm:$0xee]  ;;  %v4409_v36 = vld [vmem:[%s4578_s25 + $0x280] sm:$0xff]   ;;  %v1604_v38 = vshrl.u32 %v1587_v37, 16  ;;  %v1949_v44 = vld [vmem:[#allocation2 + $0x50] sm:$0xee] }
  0x58   : > { %v602_v51 = vsel %vm4689_vm0, %v4839_v3, %v601_v11  ;;  %4056 = vmatprep.subr.bf16.mxu0 %v4378_v7  ;;  %4097 = vmatpush3.bf16.msra.mxu1 %v4381_v12  ;;  %v3482_v0 = vcombine.high %v1090_v61, %v1094_v55  ;;  %v1097_v7 = vrot.slane %v4837_v2, 5  ;;  %v1051_v11 = vld [vmem:[#allocation2 + $0x98] sm:$0xee]  ;;  %v1101_v12 = vrot.slane %v4842_v6, 5  ;;  %v4403_v2 = vld [vmem:[%s4578_s25 + $0x2c8] sm:$0xff]  }
  0x59   : > { %v3396_v25 = vcombine.high %v602_v51, %v616_v23  ;;  %v3395_v43 = vcombine.low %v602_v51, %v616_v23  ;;  %1554 = vmatprep.mubr.bf16.mxu1 %v3536_v13  ;;  %4098 = vmatprep.subr.bf16.mxu1 %v4383_v20  ;;  %v4392_v13 = vld [vmem:[%s4578_s25 + $0x220] sm:$0xff]   ;;  %v3443_v14 = vrot.slane %v1050_v10, 9  ;;  %v3444_v16 = vrot.slane %v1051_v11, 9  ;;  %v4394_v23 = vld [vmem:[%s4578_s25 + $0x258] sm:$0xff]   ;;  %v1950_v45 = vld [vmem:[#allocation2 + $0x30] sm:$0xee] }
  0x5a   : > { %v368_v20 = vshrl.u32 %v310_v18, 16  ;;  %v371_v51 = vshll.u32 %v310_v18, 16  ;;  %v3613_v48 = vrot.slane %v1949_v44, 9  ;;  %v3614_v52 = vrot.slane %v1950_v45, 9 }
  0x5b   : > { %834 = vmatprep.mubr.bf16.mxu0 %v3396_v25  ;;  %v1098_v6 = vsel %vm4833_vm3, %v3443_v14, %v1097_v7  ;;  %v4405_v25 = vld [vmem:[%s4578_s25 + $0x288] sm:$0xff]   ;;  %v4415_v14 = vld [vmem:[%s4578_s25 + $0x3f0] sm:$0xff]  }
  0x5c   : > { %835 = vmatmul.mubr.bf16.gmra.mxu0 %v3395_v43  ;;  %4099 = vmatpush3.bf16.msra.mxu1 %v4385_v22  ;;  %v1102_v22 = vsel %vm4833_vm3, %v3444_v16, %v1101_v12  ;;  %v4910_v47 = vrot.slane %v368_v20, 7  ;;  %v3481_v43 = vcombine.low %v1090_v61, %v1094_v55  ;;  %v4413_v12 = vld [vmem:[%s4578_s25 + $0x3b8] sm:$0xff]   ;;  %v4417_v20 = vld [vmem:[%s4578_s25 + $0x3b0] sm:$0xff]  }
  0x5d   : > { %1296 = vmatprep.mubr.bf16.mxu0 %v3478_v27  ;;  %4100 = vmatprep.subr.bf16.mxu1 %v4387_v33  ;;  %v4396_v27 = vld [vmem:[%s4578_s25 + $0x218] sm:$0xff]   ;;  %v3484_v29 = vcombine.high %v1098_v6, %v1102_v22 }
  0x5e   : > { %v373_v28 = vor.u32 %v371_v51, %v4910_v47  ;;  %v4410_v16 = vld [vmem:[%s4578_s25 + $0x378] sm:$0xff]  }
  0x5f   : > { %1555 = vmatmul.mubr.bf16.gmra.mxu1 %v3535_v62  ;;  %v4400_v62 = vld [vmem:[%s4578_s25 + $0x210] sm:$0xff]   ;;  %v4950_v51 = vld [vmem:[#allocation2 + $0x78] sm:$0xff] }
  0x60   : > { %4101 = vmatpush3.bf16.msra.mxu1 %v4389_v34  ;;  %1562 = vmatprep.mubr.bf16.mxu1 %v3538_v35  ;;  %v4922_v33 = vsel %vm4651_vm12, %v373_v28, %v4917_v32  ;;  %v1951_v28 = vld [vmem:[#allocation2 + $0x78] sm:$0xee] }
  0x61   : > { %4102 = vmatprep.subr.bf16.mxu1 %v4391_v39  ;;  %450 = vst [vmem:[#allocation2 + $0x20] sm:$0xff] %v4922_v33  ;;  %v3540_v34 = vcombine.high %v4807_v24, %v4922_v33  ;;  %v3539_v35 = vcombine.low %v4807_v24, %v4922_v33  ;;  %v1588_v39 = vld [vmem:[#allocation2 + $0x18] sm:$0x11] }
  0x62   : > { %v1975_v49 = vrot.slane %v1588_v39, 5 }
  0x64   : > { %1297 = vmatmul.mubr.bf16.vlgmr.msra.gmra.mxu0 %v3477_v40  ;;  %4103 = vmatpush3.bf16.msra.mxu1 %v4393_v46  ;;  %v1590_v40 = vld [vmem:[#allocation2 + $0x68] sm:$0x11]  ;;  %v1606_v46 = vrot.slane %v1604_v38, 4 }
  0x65   : > { %4057 = vmatpush3.bf16.msra.mxu0 %v4380_v5  ;;  %1304 = vmatprep.mubr.bf16.mxu0 %v3480_v15  ;;  %v4402_v5 = vld [vmem:[%s4578_s25 + $0x248] sm:$0xff]   ;;  %v1613_v15 = vshll.u32 %v1588_v39, 16  ;;  %v1627_v42 = vshll.u32 %v1590_v40, 16 }
  0x66   : > { %4058 = vmatprep.subr.bf16.mxu0 %v4382_v26  ;;  %4104 = vmatprep.subr.bf16.mxu1 %v4395_v53  ;;  %v1607_v26 = vshll.u32 %v1587_v37, 16  ;;  %v1979_v53 = vrot.slane %v1590_v40, 5  ;;  %v4419_v40 = vld [vmem:[%s4578_s25 + $0x3e8] sm:$0xff]  }
  0x67   : > { %1563 = vmatmul.mubr.bf16.gmra.mxu1 %v3537_v54  ;;  %v3483_v54 = vcombine.low %v1098_v6, %v1102_v22  ;;  %v1615_v55 = vrot.slane %v1613_v15, 5  ;;  %v1632_v6 = vshrl.u32 %v4950_v51, 16  ;;  %v1635_v22 = vshll.u32 %v4950_v51, 16 }
  0x68   : > { %4105 = vmatpush3.bf16.msra.mxu1 %v4397_v60  ;;  %1570 = vmatprep.mubr.bf16.mxu1 %v3540_v34  ;;  %v1609_v24 = vrot.slane %v1607_v26, 5  ;;  %v1976_v60 = vsel %vm4833_vm3, %v3613_v48, %v1975_v49  ;;  %v4421_v48 = vld [vmem:[%s4578_s25 + $0x3a8] sm:$0xff]  }
  0x69   : > { %4059 = vmatpush3.bf16.msra.mxu0 %v4384_v50  ;;  %4106 = vmatprep.subr.bf16.mxu1 %v4399_v19  ;;  %v1629_v50 = vrot.slane %v1627_v42, 5  ;;  %v4406_v19 = vld [vmem:[%s4578_s25 + $0x240] sm:$0xff]   ;;  %v1637_v34 = vrot.slane %v1635_v22, 5  ;;  %v4418_v42 = vld [vmem:[%s4578_s25 + $0x368] sm:$0xff]  }
  0x6a   : > { %4060 = vmatprep.subr.bf16.mxu0 %v4386_v56  ;;  %v4404_v56 = vld [vmem:[%s4578_s25 + $0x208] sm:$0xff]   ;;  %v1610_v61 = vor.u32 %v1609_v24, %v1606_v46 }
  0x6b   : > { %v4420_v49 = vld [vmem:[%s4578_s25 + $0x328] sm:$0xff]  }
  0x6c   : > { %1305 = vmatmul.mubr.bf16.gmra.mxu0 %v3479_v17  ;;  %4107 = vmatpush3.bf16.msra.mxu1 %v4401_v9  ;;  %v4411_v17 = vld [vmem:[%s4578_s25 + $0x3f8] sm:$0xff]   ;;  %v4408_v9 = vld [vmem:[%s4578_s25 + $0x200] sm:$0xff]  }
  0x6d   : > { %4061 = vmatpush3.bf16.msra.mxu0 %v4388_v63  ;;  %1312 = vmatprep.mubr.bf16.mxu0 %v3482_v0  ;;  %v1980_v63 = vsel %vm4833_vm3, %v3614_v52, %v1979_v53  ;;  %v1630_v0 = vsel %vm4689_vm0, %v4732_v57, %v1629_v50  ;;  %v4412_v57 = vld [vmem:[%s4578_s25 + $0x338] sm:$0xff]   ;;  %v4423_v52 = vld [vmem:[%s4578_s25 + $0x3e0] sm:$0xff]  }
  0x6e   : > { %4062 = vmatprep.subr.bf16.mxu0 %v4390_v21  ;;  %4108 = vmatprep.subr.bf16.mxu1 %v4403_v2  ;;  %v1611_v21 = vrot.slane %v1610_v61, 4  ;;  %v3654_v7 = vcombine.high %v1976_v60, %v1980_v63  ;;  %v3653_v10 = vcombine.low %v1976_v60, %v1980_v63  ;;  %v1592_v2 = vld [vmem:[#allocation2 + $0x80] sm:$0x11]  ;;  %v1598_v60 = vld [vmem:[#allocation2 + $0x10] sm:$0x11] }
  0x6f   : > { %1571 = vmatmul.mubr.bf16.gmra.mxu1 %v3539_v35  ;;  %v3615_v35 = vrot.slane %v1951_v28, 9  ;;  %v1596_v61 = vld [vmem:[#allocation2 + $0x40] sm:$0x11]  ;;  %v1702_v28 = vshrl.u32 %v4922_v33, 16 }
  0x70   : > { %4109 = vmatpush3.bf16.msra.mxu1 %v4405_v25  ;;  %v1616_v11 = vsel %vm4689_vm0, %v1611_v21, %v1615_v55  ;;  %2198 = vmatprep.mubr.bf16.mxu1 %v3654_v7  ;;  %v1641_v25 = vshll.u32 %v1592_v2, 16  ;;  %v4424_v55 = vld [vmem:[%s4578_s25 + $0x320] sm:$0xff]   ;;  %v1669_v63 = vshll.u32 %v1596_v61, 16  ;;  %v1683_v21 = vshll.u32 %v1598_v60, 16 }
  0x71   : > { %4063 = vmatpush3.bf16.msra.mxu0 %v4392_v13  ;;  %4110 = vmatprep.subr.bf16.mxu1 %v4407_v30  ;;  %v3590_v13 = vcombine.high %v1616_v11, %v1630_v0  ;;  %v3589_v18 = vcombine.low %v1616_v11, %v1630_v0  ;;  %v1954_v0 = vld [vmem:[#allocation2 + $0x58] sm:$0xee] }
  0x72   : > { %4064 = vmatprep.subr.bf16.mxu0 %v4394_v23  ;;  %v1594_v23 = vld [vmem:[#allocation2 + $0x88] sm:$0x11]  ;;  %v1643_v37 = vrot.slane %v1641_v25, 5  ;;  %v1671_v11 = vrot.slane %v1669_v63, 5  ;;  %v4429_v25 = vld [vmem:[%s4578_s25 + $0x398] sm:$0xff]  }
  0x73   : > { %v1987_v30 = vrot.slane %v1594_v23, 5  ;;  %v5014_v63 = vld [vmem:[#allocation2 + $0x68] sm:$0x11] }
  0x74   : > { %1313 = vmatmul.mubr.bf16.gmra.mxu0 %v3481_v43  ;;  %4111 = vmatpush3.bf16.msra.mxu1 %v4409_v36  ;;  %v1983_v43 = vrot.slane %v1592_v2, 5  ;;  %v4416_v36 = vld [vmem:[%s4578_s25 + $0x330] sm:$0xff]   ;;  %v374_v2 = vrot.slane %v4910_v47, 4  ;;  %v1705_v47 = vshll.u32 %v4922_v33, 16 }
  0x75   : > { %4065 = vmatpush3.bf16.msra.mxu0 %v4396_v27  ;;  %1320 = vmatprep.mubr.bf16.mxu0 %v3484_v29  ;;  %v1655_v27 = vshll.u32 %v1594_v23, 16  ;;  %v1952_v29 = vld [vmem:[#allocation2 + $0x8] sm:$0xee] }
  0x76   : > { %4066 = vmatprep.subr.bf16.mxu0 %v4398_v31  ;;  %4176 = vmatprep.subr.bf16.mxu1 %v4411_v17  ;;  %v4414_v31 = vld [vmem:[%s4578_s25 + $0x370] sm:$0xff]   ;;  %v3616_v39 = vrot.slane %v1952_v29, 9  ;;  %v1984_v26 = vsel %vm4833_vm3, %v3615_v35, %v1983_v43  ;;  %v1953_v17 = vld [vmem:[#allocation2 + $0x28] sm:$0xee]  ;;  %v1704_v35 = vrot.slane %v1702_v28, 4 }
  0x77   : > { %2199 = vmatmul.mubr.bf16.vlgmr.msra.gmra.mxu1 %v3653_v10  ;;  %v3617_v7 = vrot.slane %v1953_v17, 9  ;;  %v4426_v10 = vld [vmem:[%s4578_s25 + $0x358] sm:$0xff]   ;;  %v4431_v29 = vld [vmem:[%s4578_s25 + $0x3d0] sm:$0xff]  }
  0x78   : > { %4177 = vmatpush3.bf16.msra.mxu1 %v4413_v12  ;;  %v1988_v15 = vsel %vm4833_vm3, %v3616_v39, %v1987_v30  ;;  %v3618_v12 = vrot.slane %v1954_v0, 9  ;;  %v4432_v30 = vld [vmem:[%s4578_s25 + $0x310] sm:$0xff]   ;;  %v4435_v39 = vld [vmem:[%s4578_s25 + $0x3c8] sm:$0xff]   ;;  %v4444_v17 = vld [vmem:[%s4578_s25 + $0x478] sm:$0xff]  }
  0x79   : > { %4067 = vmatpush3.bf16.msra.mxu0 %v4400_v62  ;;  %4178 = vmatprep.subr.bf16.mxu1 %v4415_v14  ;;  %v1634_v62 = vrot.slane %v1632_v6, 4  ;;  %v3656_v46 = vcombine.high %v1984_v26, %v1988_v15  ;;  %v3655_v24 = vcombine.low %v1984_v26, %v1988_v15  ;;  %v1956_v26 = vld [vmem:[#allocation2 + $0x20] sm:$0xee]  ;;  %v4436_v15 = vld [vmem:[%s4578_s25 + $0x308] sm:$0xff]  }
  0x7a   : > { %4068 = vmatprep.subr.bf16.mxu0 %v4402_v5  ;;  %v1657_v5 = vrot.slane %v1655_v27, 5  ;;  %v4430_v27 = vld [vmem:[%s4578_s25 + $0x350] sm:$0xff]  }
  0x7b   : > { %v1638_v38 = vor.u32 %v1637_v34, %v1634_v62  ;;  %2206 = vmatprep.mubr.bf16.mxu1 %v3656_v46  ;;  %v1600_v62 = vld [vmem:[#allocation2 + $0x60] sm:$0x11] }
  0x7c   : > { %1321 = vmatmul.mubr.bf16.gmra.mxu0 %v3483_v54  ;;  %4179 = vmatpush3.bf16.msra.mxu1 %v4417_v20  ;;  %v1658_v45 = vsel %vm4689_vm0, %v4782_v58, %v1657_v5  ;;  %v4425_v58 = vld [vmem:[%s4578_s25 + $0x3a0] sm:$0xff]   ;;  %v4428_v20 = vld [vmem:[%s4578_s25 + $0x318] sm:$0xff]   ;;  %v4434_v5 = vld [vmem:[%s4578_s25 + $0x348] sm:$0xff]   ;;  %v1999_v46 = vrot.slane %v1600_v62, 5 }
  0x7d   : > { %4069 = vmatpush3.bf16.msra.mxu0 %v4404_v56  ;;  %1908 = vmatprep.mubr.bf16.mxu0 %v3590_v13  ;;  %v4962_v44 = vrot.slane %v1638_v38, 4  ;;  %v4422_v56 = vld [vmem:[%s4578_s25 + $0x360] sm:$0xff]   ;;  %v1685_v13 = vrot.slane %v1683_v21, 5  ;;  %v1697_v38 = vshll.u32 %v1600_v62, 16 }
  0x7e   : > { %4070 = vmatprep.subr.bf16.mxu0 %v4406_v19  ;;  %4180 = vmatprep.subr.bf16.mxu1 %v4419_v40  ;;  %v1991_v19 = vrot.slane %v1596_v61, 5  ;;  %v2605_v40 = vshrl.u32 %v4917_v32, 16  ;;  %v5020_v21 = vld [vmem:[#allocation2 + $0x80] sm:$0x11] }
  0x7f   : > { %v1644_v50 = vsel %vm4689_vm0, %v4962_v44, %v1643_v37  ;;  %2207 = vmatmul.mubr.bf16.gmra.mxu1 %v3655_v24  ;;  %v1686_v23 = vsel %vm4689_vm0, %v4839_v3, %v1685_v13  ;;  %v4433_v3 = vld [vmem:[%s4578_s25 + $0x390] sm:$0xff]   ;;  %v1955_v37 = vld [vmem:[#allocation2 + $0x98] sm:$0xee]  ;;  %v4438_v24 = vld [vmem:[%s4578_s25 + $0x340] sm:$0xff]  }
  0x80   : > { %4181 = vmatpush3.bf16.msra.mxu1 %v4421_v48  ;;  %v3592_v53 = vcombine.high %v1644_v50, %v1658_v45  ;;  %v3591_v54 = vcombine.low %v1644_v50, %v1658_v45  ;;  %v1992_v14 = vsel %vm4833_vm3, %v3617_v7, %v1991_v19  ;;  %v4437_v45 = vld [vmem:[%s4578_s25 + $0x388] sm:$0xff]   ;;  %v1699_v48 = vrot.slane %v1697_v38, 5 }
  0x81   : > { %4071 = vmatpush3.bf16.msra.mxu0 %v4408_v9  ;;  %4182 = vmatprep.subr.bf16.mxu1 %v4423_v52  ;;  %v1995_v9 = vrot.slane %v1598_v60, 5  ;;  %v3620_v50 = vrot.slane %v1956_v26, 9  ;;  %v4440_v52 = vld [vmem:[%s4578_s25 + $0x300] sm:$0xff]   ;;  %v5012_v60 = vld [vmem:[#allocation2 + $0x30] sm:$0xff] }
  0x82   : > { %4136 = vmatprep.subr.bf16.mxu0 %v4410_v16  ;;  %v4427_v16 = vld [vmem:[%s4578_s25 + $0x3d8] sm:$0xff]   ;;  %v1700_v19 = vsel %vm4689_vm0, %v4846_v8, %v1699_v48  ;;  %v2507_v0 = vshrl.u32 %v5012_v60, 16  ;;  %v2510_v7 = vshll.u32 %v5012_v60, 16  ;;  %v4446_v26 = vld [vmem:[%s4578_s25 + $0x470] sm:$0xff]  }
  0x84   : > { %1909 = vmatmul.mubr.bf16.vlgmr.msra.gmra.mxu0 %v3589_v18  ;;  %4183 = vmatpush3.bf16.msra.mxu1 %v4425_v58  ;;  %v1672_v18 = vsel %vm4689_vm0, %v4788_v1, %v1671_v11  ;;  %v2516_v11 = vshll.u32 %v5014_v63, 16  ;;  %v2509_v8 = vrot.slane %v2507_v0, 4 }
  0x85   : > { %4137 = vmatpush3.bf16.msra.mxu0 %v4412_v57  ;;  %1916 = vmatprep.mubr.bf16.mxu0 %v3592_v53  ;;  %v1996_v57 = vsel %vm4833_vm3, %v3618_v12, %v1995_v9  ;;  %v3594_v43 = vcombine.high %v1672_v18, %v1686_v23  ;;  %v3593_v1 = vcombine.low %v1672_v18, %v1686_v23  ;;  %v2530_v12 = vshll.u32 %v5020_v21, 16 }
  0x86   : > { %4138 = vmatprep.subr.bf16.mxu0 %v4414_v31  ;;  %v3658_v6 = vcombine.high %v1992_v14, %v1996_v57  ;;  %v3657_v22 = vcombine.low %v1992_v14, %v1996_v57  ;;  %4184 = vmatprep.subr.bf16.mxu1 %v4427_v16  ;;  %v451_v31 = vld [vmem:[#allocation2 + $0x48] sm:$0x11]  ;;  %v2512_v16 = vrot.slane %v2510_v7, 5  ;;  %v3710_v57 = vcombine.high %v5012_v60, %v4950_v51 }
  0x87   : > { %v452_v34 = vsel %vm4659_vm14, %v374_v2, %v451_v31 }
  0x88   : > { %2214 = vmatprep.mubr.bf16.mxu1 %v3658_v6  ;;  %4185 = vmatpush3.bf16.msra.mxu1 %v4429_v25  ;;  %453 = vst [vmem:[#allocation2 + $0x48] sm:$0x11] %v452_v34  ;;  %v2513_v6 = vor.u32 %v2512_v16, %v2509_v8  ;;  %v5033_v25 = vld [vmem:[#allocation2 + $0x8] sm:$0xff] }
  0x89   : > { %4139 = vmatpush3.bf16.msra.mxu0 %v4416_v36  ;;  %2215 = vmatmul.mubr.bf16.gmra.mxu1 %v3657_v22  ;;  %v1707_v36 = vrot.slane %v1705_v47, 5  ;;  %v2518_v22 = vrot.slane %v2516_v11, 5  ;;  %v5044_v47 = vld [vmem:[#allocation2 + $0x40] sm:$0x11] }
  0x8a   : > { %4140 = vmatprep.subr.bf16.mxu0 %v4418_v42  ;;  %4186 = vmatprep.subr.bf16.mxu1 %v4431_v29  ;;  %v3619_v42 = vrot.slane %v1955_v37, 9  ;;  %v5042_v29 = vld [vmem:[#allocation2 + $0x88] sm:$0x11]  ;;  %v2608_v37 = vshll.u32 %v4917_v32, 16 }
  0x8b   : > { %v1708_v41 = vor.u32 %v1707_v36, %v1704_v35  ;;  %v2544_v31 = vshll.u32 %v5042_v29, 16  ;;  %v2558_v36 = vshll.u32 %v5044_v47, 16 }
  0x8c   : > { %1917 = vmatmul.mubr.bf16.gmra.mxu0 %v3591_v54  ;;  %4187 = vmatpush3.bf16.msra.mxu1 %v4433_v3  ;;  %v2000_v61 = vsel %vm4833_vm3, %v3619_v42, %v1999_v46  ;;  %v2535_v3 = vshrl.u32 %v5033_v25, 16 }
  0x8d   : > { %4141 = vmatpush3.bf16.msra.mxu0 %v4420_v49  ;;  %1924 = vmatprep.mubr.bf16.mxu0 %v3594_v43  ;;  %v4439_v49 = vld [vmem:[%s4578_s25 + $0x3c0] sm:$0xff]   ;;  %v5007_v54 = vrot.slane %v1708_v41, 4  ;;  %v5035_v43 = vld [vmem:[#allocation2 + $0x28] sm:$0xff] }
  0x8e   : > { %4142 = vmatprep.subr.bf16.mxu0 %v4422_v56  ;;  %4188 = vmatprep.subr.bf16.mxu1 %v4435_v39  ;;  %v4441_v56 = vld [vmem:[%s4578_s25 + $0x380] sm:$0xff]   ;;  %v2549_v62 = vshrl.u32 %v5035_v43, 16  ;;  %v2552_v34 = vshll.u32 %v5035_v43, 16  ;;  %v2537_v35 = vrot.slane %v2535_v3, 4  ;;  %v3712_v48 = vcombine.high %v5033_v25, %v5035_v43 }
  0x8f   : > { %v1602_v53 = vld [vmem:[#allocation2 + $0x48] sm:$0x11] }
  0x90   : > { %4189 = vmatpush3.bf16.msra.mxu1 %v4437_v45  ;;  %v1711_v58 = vshll.u32 %v1602_v53, 16  ;;  %v2551_v41 = vrot.slane %v2549_v62, 4  ;;  %v2554_v42 = vrot.slane %v2552_v34, 5  ;;  %v3709_v45 = vcombine.low %v5012_v60, %v4950_v51  ;;  %v5090_v62 = vld [vmem:[#allocation2 + $0x90] sm:$0x11] }
  0x91   : > { %4143 = vmatpush3.bf16.msra.mxu0 %v4424_v55  ;;  %4190 = vmatprep.subr.bf16.mxu1 %v4439_v49  ;;  %v2003_v55 = vrot.slane %v1602_v53, 5  ;;  %v5064_v53 = vld [vmem:[#allocation2 + $0x98] sm:$0xff] }
  0x92   : > { %4144 = vmatprep.subr.bf16.mxu0 %v4426_v10  ;;  %v1713_v9 = vrot.slane %v1711_v58, 5  ;;  %v2555_v49 = vor.u32 %v2554_v42, %v2551_v41  ;;  %v2577_v0 = vshrl.u32 %v5064_v53, 16  ;;  %v2580_v11 = vshll.u32 %v5064_v53, 16  ;;  %v4453_v41 = vld [vmem:[%s4578_s25 + $0x418] sm:$0xff]  }
  0x93   : > { %v2004_v10 = vsel %vm4833_vm3, %v3620_v50, %v2003_v55  ;;  %v2560_v50 = vrot.slane %v2558_v36, 5  ;;  %v5068_v55 = vld [vmem:[#allocation2 + $0x60] sm:$0x11] }
  0x94   : > { %1925 = vmatmul.mubr.bf16.gmra.mxu0 %v3593_v1  ;;  %4191 = vmatpush3.bf16.msra.mxu1 %v4441_v56  ;;  %v3660_v13 = vcombine.high %v2000_v61, %v2004_v10  ;;  %v3659_v14 = vcombine.low %v2000_v61, %v2004_v10  ;;  %v1714_v18 = vsel %vm4689_vm0, %v5007_v54, %v1713_v9  ;;  %v5037_v1 = vrot.slane %v2605_v40, 4  ;;  %v4445_v40 = vld [vmem:[%s4578_s25 + $0x438] sm:$0xff]   ;;  %v5066_v61 = vld [vmem:[#allocation2 + $0x10] sm:$0x11]  ;;  %v4448_v9 = vld [vmem:[%s4578_s25 + $0x468] sm:$0xff]  }
  0x95   : > { %4145 = vmatpush3.bf16.msra.mxu0 %v4428_v20  ;;  %4256 = vmatprep.subr.bf16.mxu1 %v4444_v17  ;;  %v2532_v20 = vrot.slane %v2530_v12, 5  ;;  %v3596_v2 = vcombine.high %v1700_v19, %v1714_v18  ;;  %v3595_v23 = vcombine.low %v1700_v19, %v1714_v18  ;;  %v2610_v56 = vrot.slane %v2608_v37, 5 }
  0x96   : > { %4146 = vmatprep.subr.bf16.mxu0 %v4430_v27  ;;  %2222 = vmatprep.mubr.bf16.mxu1 %v3660_v13  ;;  %v2514_v27 = vrot.slane %v2513_v6, 4  ;;  %v2556_v60 = vrot.slane %v2555_v49, 4  ;;  %v2572_v19 = vshll.u32 %v5066_v61, 16  ;;  %v2586_v12 = vshll.u32 %v5068_v55, 16  ;;  %v2853_v49 = vld [vmem:[#allocation2 + $0x78] sm:$0xee] }
  0x97   : > { %2223 = vmatmul.mubr.bf16.gmra.mxu1 %v3659_v14  ;;  %1932 = vmatprep.mubr.bf16.mxu0 %v3596_v2  ;;  %v2533_v28 = vsel %vm4689_vm0, %v4962_v44, %v2532_v20  ;;  %v2579_v8 = vrot.slane %v2577_v0, 4  ;;  %v2611_v20 = vor.u32 %v2610_v56, %v5037_v1  ;;  %v4449_v2 = vld [vmem:[%s4578_s25 + $0x428] sm:$0xff]   ;;  %v4454_v56 = vld [vmem:[%s4578_s25 + $0x450] sm:$0xff]   ;;  %v2898_v4 = vrot.slane %v5068_v55, 5 }
  0x98   : > { %v2519_v44 = vsel %vm4689_vm0, %v2514_v27, %v2518_v22  ;;  %v2561_v13 = vsel %vm4689_vm0, %v2556_v60, %v2560_v50  ;;  %v2574_v6 = vrot.slane %v2572_v19, 5  ;;  %v3711_v22 = vcombine.low %v5033_v25, %v5035_v43  ;;  %v4450_v27 = vld [vmem:[%s4578_s25 + $0x460] sm:$0xff]   ;;  %v2857_v50 = vld [vmem:[#allocation2 + $0x98] sm:$0xee]  ;;  %v4455_v0 = vld [vmem:[%s4578_s25 + $0x410] sm:$0xff]  }
  0x99   : > { %4147 = vmatpush3.bf16.msra.mxu0 %v4432_v30  ;;  %v2538_v30 = vshll.u32 %v5033_v25, 16  ;;  %v3766_v39 = vcombine.high %v2519_v44, %v2533_v28  ;;  %v2588_v3 = vrot.slane %v2586_v12, 5  ;;  %v2612_v43 = vrot.slane %v2611_v20, 4 }
  0x9a   : > { %4148 = vmatprep.subr.bf16.mxu0 %v4434_v5  ;;  %v3765_v5 = vcombine.low %v2519_v44, %v2533_v28  ;;  %v2614_v44 = vshll.u32 %v5090_v62, 16  ;;  %v3716_v60 = vcombine.high %v4922_v33, %v4917_v32  ;;  %v2882_v19 = vrot.slane %v5020_v21, 5 }
  0x9b   : > { %v2540_v38 = vrot.slane %v2538_v30, 5  ;;  %2811 = vmatprep.mubr.bf16.mxu1 %v3766_v39  ;;  %v5086_v30 = vld [vmem:[#allocation2 + $0x48] sm:$0x11]  ;;  %v4452_v39 = vld [vmem:[%s4578_s25 + $0x458] sm:$0xff]   ;;  %v3715_v12 = vcombine.low %v4922_v33, %v4917_v32  ;;  %v2886_v32 = vrot.slane %v5042_v29, 5 }
  0x9c   : > { %1933 = vmatmul.mubr.bf16.gmra.mxu0 %v3595_v23  ;;  %v2600_v34 = vshll.u32 %v5086_v30, 16  ;;  %v2902_v20 = vrot.slane %v5086_v30, 5 }
  0x9d   : > { %4149 = vmatpush3.bf16.msra.mxu0 %v4436_v15  ;;  %2449 = vmatprep.mubr.bf16.mxu0 %v3710_v57  ;;  %v2546_v15 = vrot.slane %v2544_v31, 5  ;;  %v2541_v46 = vor.u32 %v2540_v38, %v2537_v35  ;;  %v2582_v57 = vrot.slane %v2580_v11, 5  ;;  %v4451_v35 = vld [vmem:[%s4578_s25 + $0x420] sm:$0xff]  }
  0x9e   : > { %4150 = vmatprep.subr.bf16.mxu0 %v4438_v24  ;;  %v4447_v24 = vld [vmem:[%s4578_s25 + $0x430] sm:$0xff]   ;;  %v2602_v37 = vrot.slane %v2600_v34, 5 }
  0x9f   : > { %2812 = vmatmul.mubr.bf16.vlgmr.msra.gmra.mxu1 %v3765_v5  ;;  %v2542_v58 = vrot.slane %v2541_v46, 4  ;;  %v2583_v28 = vor.u32 %v2582_v57, %v2579_v8  ;;  %v2854_v8 = vld [vmem:[#allocation2 + $0x8] sm:$0xee] }
  0xa0   : > { %4264 = vmatpush3.bf16.msra.mxu1 %v4445_v40 }
  0xa1   : > { %4151 = vmatpush3.bf16.msra.mxu0 %v4440_v52  ;;  %v5062_v52 = vld [vmem:[#allocation2 + $0x58] sm:$0xff]  ;;  %4257 = vmatprep.subr.bf16.mxu1 %v4446_v26  ;;  %v2547_v7 = vsel %vm4689_vm0, %v2542_v58, %v2546_v15  ;;  %v2584_v25 = vrot.slane %v2583_v28, 4  ;;  %v2894_v58 = vrot.slane %v5066_v61, 5  ;;  %v4456_v61 = vld [vmem:[%s4578_s25 + $0x448] sm:$0xff]   ;;  %v4459_v28 = vld [vmem:[%s4578_s25 + $0x400] sm:$0xff]  }
  0xa2   : > { %4216 = vmatprep.subr.bf16.mxu0 %v4444_v17  ;;  %v2563_v51 = vshrl.u32 %v5062_v52, 16  ;;  %v2566_v17 = vshll.u32 %v5062_v52, 16  ;;  %v3768_v16 = vcombine.high %v2547_v7, %v2561_v13  ;;  %v3767_v18 = vcombine.low %v2547_v7, %v2561_v13  ;;  %v4457_v13 = vld [vmem:[%s4578_s25 + $0x408] sm:$0xff]  }
  0xa3   : > { %v3714_v31 = vcombine.high %v5062_v52, %v5064_v53  ;;  %v2589_v5 = vsel %vm4689_vm0, %v2584_v25, %v2588_v3  ;;  %v3713_v46 = vcombine.low %v5062_v52, %v5064_v53  ;;  %v2878_v53 = vrot.slane %v5014_v63, 5  ;;  %v2858_v63 = vld [vmem:[#allocation2 + $0x20] sm:$0xee] }
  0xa4   : > { %2450 = vmatmul.mubr.bf16.vlgmr.msra.gmra.mxu0 %v3709_v45  ;;  %v2565_v10 = vrot.slane %v2563_v51, 4  ;;  %v2568_v14 = vrot.slane %v2566_v17, 5  ;;  %4265 = vmatpush3.bf16.msra.mxu1 %v4447_v24  ;;  %v2856_v45 = vld [vmem:[#allocation2 + $0x58] sm:$0xee]  ;;  %v3794_v51 = vrot.slane %v2857_v50, 9  ;;  %v3790_v17 = vrot.slane %v2853_v49, 9 }
  0xa5   : > { %4217 = vmatpush3.bf16.msra.mxu0 %v4445_v40  ;;  %2457 = vmatprep.mubr.bf16.mxu0 %v3712_v48  ;;  %v2616_v40 = vrot.slane %v2614_v44, 5  ;;  %v2852_v48 = vld [vmem:[#allocation2 + $0x30] sm:$0xee]  ;;  %v3795_v57 = vrot.slane %v2858_v63, 9 }
  0xa6   : > { %4218 = vmatprep.subr.bf16.mxu0 %v4446_v26  ;;  %v2569_v23 = vor.u32 %v2568_v14, %v2565_v10  ;;  %2819 = vmatprep.mubr.bf16.mxu1 %v3768_v16  ;;  %v2603_v26 = vsel %vm4689_vm0, %v5007_v54, %v2602_v37  ;;  %v3793_v54 = vrot.slane %v2856_v45, 9  ;;  %v3789_v52 = vrot.slane %v2852_v48, 9  ;;  %v2855_v16 = vld [vmem:[#allocation2 + $0x28] sm:$0xee] }
  0xa7   : > { %4258 = vmatprep.subr.bf16.mxu1 %v4448_v9  ;;  %2820 = vmatmul.mubr.bf16.gmra.mxu1 %v3767_v18  ;;  %v2617_v42 = vsel %vm4689_vm0, %v2612_v43, %v2616_v40  ;;  %v2899_v7 = vsel %vm4833_vm3, %v3794_v51, %v2898_v4  ;;  %v2883_v11 = vsel %vm4833_vm3, %v3790_v17, %v2882_v19  ;;  %v4458_v18 = vld [vmem:[%s4578_s25 + $0x440] sm:$0xff]   ;;  %v3792_v33 = vrot.slane %v2855_v16, 9 }
  0xa8   : > { %v2570_v1 = vrot.slane %v2569_v23, 4  ;;  %4266 = vmatpush3.bf16.msra.mxu1 %v4449_v2  ;;  %v2895_v55 = vsel %vm4833_vm3, %v3793_v54, %v2894_v58  ;;  %v3771_v21 = vcombine.low %v2603_v26, %v2617_v42  ;;  %v2879_v10 = vsel %vm4833_vm3, %v3789_v52, %v2878_v53 }
  0xa9   : > { %4219 = vmatpush3.bf16.msra.mxu0 %v4447_v24  ;;  %4259 = vmatprep.subr.bf16.mxu1 %v4450_v27  ;;  %v3772_v24 = vcombine.high %v2603_v26, %v2617_v42  ;;  %v3834_v14 = vcombine.high %v2895_v55, %v2899_v7  ;;  %v2906_v23 = vrot.slane %v5090_v62, 5  ;;  %v2903_v3 = vsel %vm4833_vm3, %v3795_v57, %v2902_v20 }
  0xaa   : > { %4220 = vmatprep.subr.bf16.mxu0 %v4448_v9  ;;  %v2575_v36 = vsel %vm4689_vm0, %v2570_v1, %v2574_v6  ;;  %v2859_v9 = vld [vmem:[#allocation2 + $0x70] sm:$0xee]  ;;  %v3830_v6 = vcombine.high %v2879_v10, %v2883_v11  ;;  %v3829_v62 = vcombine.low %v2879_v10, %v2883_v11 }
  0xab   : > { %v3770_v38 = vcombine.high %v2575_v36, %v2589_v5  ;;  %v3769_v15 = vcombine.low %v2575_v36, %v2589_v5 }
  0xac   : > { %2458 = vmatmul.mubr.bf16.gmra.mxu0 %v3711_v22  ;;  %4267 = vmatpush3.bf16.msra.mxu1 %v4451_v35  ;;  %v3791_v22 = vrot.slane %v2854_v8, 9 }
  0xad   : > { %4221 = vmatpush3.bf16.msra.mxu0 %v4449_v2  ;;  %2465 = vmatprep.mubr.bf16.mxu0 %v3714_v31  ;;  %v3796_v2 = vrot.slane %v2859_v9, 9  ;;  %v3833_v31 = vcombine.low %v2895_v55, %v2899_v7 }
  0xae   : > { %4222 = vmatprep.subr.bf16.mxu0 %v4450_v27  ;;  %2827 = vmatprep.mubr.bf16.mxu1 %v3770_v38  ;;  %v2890_v27 = vrot.slane %v5044_v47, 5  ;;  %v2887_v29 = vsel %vm4833_vm3, %v3791_v22, %v2886_v32 }
  0xaf   : > { %4260 = vmatprep.subr.bf16.mxu1 %v4452_v39  ;;  %2828 = vmatmul.mubr.bf16.gmra.mxu1 %v3769_v15  ;;  %v2907_v30 = vsel %vm4833_vm3, %v3796_v2, %v2906_v23 }
  0xb0   : > { %4268 = vmatpush3.bf16.msra.mxu1 %v4453_v41  ;;  %2835 = vmatprep.mubr.bf16.mxu1 %v3772_v24  ;;  %v2891_v47 = vsel %vm4833_vm3, %v3792_v33, %v2890_v27  ;;  %v3836_v1 = vcombine.high %v2903_v3, %v2907_v30  ;;  %v3835_v25 = vcombine.low %v2903_v3, %v2907_v30 }
  0xb1   : > { %4223 = vmatpush3.bf16.msra.mxu0 %v4451_v35  ;;  %4261 = vmatprep.subr.bf16.mxu1 %v4454_v56  ;;  %v3832_v34 = vcombine.high %v2887_v29, %v2891_v47  ;;  %v3831_v43 = vcombine.low %v2887_v29, %v2891_v47 }
  0xb2   : > { %4224 = vmatprep.subr.bf16.mxu0 %v4452_v39 }
  0xb4   : > { %2466 = vmatmul.mubr.bf16.gmra.mxu0 %v3713_v46  ;;  %4269 = vmatpush3.bf16.msra.mxu1 %v4455_v0 }
  0xb5   : > { %4225 = vmatpush3.bf16.msra.mxu0 %v4453_v41  ;;  %2473 = vmatprep.mubr.bf16.mxu0 %v3716_v60 }
  0xb6   : > { %4226 = vmatprep.subr.bf16.mxu0 %v4454_v56  ;;  %4262 = vmatprep.subr.bf16.mxu1 %v4456_v61 }
  0xb7   : > { %2836 = vmatmul.mubr.bf16.gmra.mxu1 %v3771_v21 }
  0xb8   : > { %4270 = vmatpush3.bf16.msra.mxu1 %v4457_v13  ;;  %3117 = vmatprep.mubr.bf16.mxu1 %v3834_v14 }
  0xb9   : > { %4227 = vmatpush3.bf16.msra.mxu0 %v4455_v0  ;;  %4263 = vmatprep.subr.bf16.mxu1 %v4458_v18 }
  0xba   : > { %4228 = vmatprep.subr.bf16.mxu0 %v4456_v61 }
  0xbc   : > { %2474 = vmatmul.mubr.bf16.gmra.mxu0 %v3715_v12  ;;  %4271 = vmatpush3.bf16.msra.mxu1 %v4459_v28 }
  0xbd   : > { %4229 = vmatpush3.bf16.msra.mxu0 %v4457_v13  ;;  %3101 = vmatprep.mubr.bf16.mxu0 %v3830_v6 }
  0xbe   : > { %4230 = vmatprep.subr.bf16.mxu0 %v4458_v18 }
  0xbf   : > { %3118 = vmatmul.mubr.bf16.vlgmr.msra.gmra.mxu1 %v3833_v31 }
  0xc0   : > { %3125 = vmatprep.mubr.bf16.mxu1 %v3836_v1 }
  0xc1   : > { %4231 = vmatpush3.bf16.msra.mxu0 %v4459_v28 }
  0xc4   : > { %3102 = vmatmul.mubr.bf16.vlgmr.msra.gmra.mxu0 %v3829_v62 }
  0xc5   : > { %3109 = vmatprep.mubr.bf16.mxu0 %v3832_v34 }
  0xc7   : > { %3126 = vmatmul.mubr.bf16.gmra.mxu1 %v3835_v25 }
  0xcc   : > { %3110 = vmatmul.mubr.bf16.gmra.mxu0 %v3831_v43 }
  0xf7   : > { %v3952_v44 = vpop.f32.mrf.mxu1 }
  0xf9   : > { %v3953_v35 = vpop.f32.mrf.mxu1 }
  0xfa   : > { %v3954_v36 = vadd.f32 %v3953_v35, %v3952_v44  ;;  %v3912_v38 = vpop.f32.mrf.mxu0 }
  0xfb   : > { %v3955_v37 = vpop.f32.mrf.mxu1 }
  0xfc   : > { %v3913_v41 = vpop.f32.mrf.mxu0 }
  0xfd   : > { %v3956_v5 = vpop.f32.mrf.mxu1  ;;  %v3914_v42 = vadd.f32 %v3913_v41, %v3912_v38 }
  0xfe   : > { %v3957_v59 = vadd.f32 %v3956_v5, %v3955_v37  ;;  %v3915_v46 = vpop.f32.mrf.mxu0 }
  0xff   : > { %v3958_v39 = vpop.f32.mrf.mxu1  ;;  %v1014_v48 = vadd.f32 %v3954_v36, %v3914_v42 }
 0x100   : > { %v3916_v49 = vpop.f32.mrf.mxu0 }
 0x101   : > { %v3959_v40 = vpop.f32.mrf.mxu1  ;;  %v3917_v50 = vadd.f32 %v3916_v49, %v3915_v46 }
 0x102   : > { %v3960_v26 = vadd.f32 %v3959_v40, %v3958_v39 }
 0x103   : > { %v3961_v15 = vpop.f32.mrf.mxu1  ;;  %v1017_v56 = vadd.f32 %v3957_v59, %v3917_v50 }
 0x104   : > { %v3918_v54 = vpop.f32.mrf.mxu0 }
 0x105   : > { %v3962_v45 = vpop.f32.mrf.mxu1 }
 0x106   : > { %v3963_v24 = vadd.f32 %v3962_v45, %v3961_v15  ;;  %v3919_v58 = vpop.f32.mrf.mxu0 }
 0x107   : > { %v3964_v51 = vpop.f32.mrf.mxu1  ;;  %v3920_v4 = vadd.f32 %v3919_v58, %v3918_v54 }
 0x108   : > { %v3921_v60 = vpop.f32.mrf.mxu0 }
 0x109   : > { %v3965_v52 = vpop.f32.mrf.mxu1  ;;  %v1022_v53 = vadd.f32 %v3960_v26, %v3920_v4 }
 0x10a   : > { %v3966_v17 = vadd.f32 %v3965_v52, %v3964_v51  ;;  %v3922_v19 = vpop.f32.mrf.mxu0 }
 0x10b   : > { %v3967_v0 = vpop.f32.mrf.mxu1  ;;  %v3923_v61 = vadd.f32 %v3922_v19, %v3921_v60 }
 0x10d   : > { %v3968_v55 = vpop.f32.mrf.mxu1  ;;  %v1025_v7 = vadd.f32 %v3963_v24, %v3923_v61 }
 0x10e   : > { %v3969_v63 = vadd.f32 %v3968_v55, %v3967_v0  ;;  %v3924_v9 = vpop.f32.mrf.mxu0 }
 0x10f   : > { %v3970_v21 = vpop.f32.mrf.mxu1 }
 0x110   : > { %v3925_v10 = vpop.f32.mrf.mxu0 }
 0x111   : > { %v3926_v11 = vadd.f32 %v3925_v10, %v3924_v9  ;;  %v3971_v12 = vpop.f32.mrf.mxu1 }
 0x112   : > { %v3927_v13 = vpop.f32.mrf.mxu0  ;;  %v3972_v14 = vadd.f32 %v3971_v12, %v3970_v21 }
 0x113   : > { %v1030_v8 = vadd.f32 %v3966_v17, %v3926_v11  ;;  %v3973_v16 = vpop.f32.mrf.mxu1 }
 0x114   : > { %v3928_v18 = vpop.f32.mrf.mxu0 }
 0x115   : > { %v3929_v57 = vadd.f32 %v3928_v18, %v3927_v13  ;;  %v3974_v20 = vpop.f32.mrf.mxu1 }
 0x116   : > { %v3975_v2 = vadd.f32 %v3974_v20, %v3973_v16 }
 0x117   : > { %v1033_v23 = vadd.f32 %v3969_v63, %v3929_v57  ;;  %v4032_v6 = vpop.f32.mrf.mxu1 }
 0x119   : > { %v4033_v22 = vpop.f32.mrf.mxu1 }
 0x11a   : > { %v4034_v32 = vadd.f32 %v4033_v22, %v4032_v6 }
 0x11b   : > { %v4035_v27 = vpop.f32.mrf.mxu1 }
 0x11c   : > { %v3930_v33 = vpop.f32.mrf.mxu0 }
 0x11d   : > { %v4036_v3 = vpop.f32.mrf.mxu1 }
 0x11e   : > { %v3931_v28 = vpop.f32.mrf.mxu0  ;;  %v4037_v31 = vadd.f32 %v4036_v3, %v4035_v27 }
 0x11f   : > { %v3932_v30 = vadd.f32 %v3931_v28, %v3930_v33  ;;  %v4038_v47 = vpop.f32.mrf.mxu1 }
 0x120   : > { %v3933_v29 = vpop.f32.mrf.mxu0 }
 0x121   : > { %v1038_v1 = vadd.f32 %v3972_v14, %v3932_v30  ;;  %v4039_v34 = vpop.f32.mrf.mxu1 }
 0x122   : > { %v3934_v62 = vpop.f32.mrf.mxu0  ;;  %v4040_v43 = vadd.f32 %v4039_v34, %v4038_v47 }
 0x123   : > { %v3935_v25 = vadd.f32 %v3934_v62, %v3933_v29  ;;  %v4041_v35 = vpop.f32.mrf.mxu1 }
 0x124   : > { %v3992_v44 = vpop.f32.mrf.mxu0 }
 0x125   : > { %v1041_v36 = vadd.f32 %v3975_v2, %v3935_v25  ;;  %v4042_v5 = vpop.f32.mrf.mxu1 }
 0x126   : > { %v3993_v37 = vpop.f32.mrf.mxu0  ;;  %v4043_v39 = vadd.f32 %v4042_v5, %v4041_v35 }
 0x127   : > { %v3994_v59 = vadd.f32 %v3993_v37, %v3992_v44  ;;  %v4044_v38 = vpop.f32.mrf.mxu1 }
 0x128   : > { %v3995_v40 = vpop.f32.mrf.mxu0 }
 0x129   : > { %v1329_v26 = vadd.f32 %v3994_v59, %v1014_v48  ;;  %v4045_v41 = vpop.f32.mrf.mxu1 }
 0x12a   : > { %v3996_v15 = vpop.f32.mrf.mxu0  ;;  %v4046_v46 = vadd.f32 %v4045_v41, %v4044_v38 }
 0x12b   : > { %v1579_v42 = vadd.f32 %v4034_v32, %v1329_v26  ;;  %v3997_v45 = vadd.f32 %v3996_v15, %v3995_v40  ;;  %v4047_v49 = vpop.f32.mrf.mxu1 }
 0x12c   : > { %v3998_v24 = vpop.f32.mrf.mxu0 }
 0x12d   : > { %v1330_v50 = vadd.f32 %v3997_v45, %v1017_v56  ;;  %v4048_v58 = vpop.f32.mrf.mxu1 }
 0x12e   : > { %v3999_v54 = vpop.f32.mrf.mxu0  ;;  %v4049_v60 = vadd.f32 %v4048_v58, %v4047_v49 }
 0x12f   : > { %v5142_v51 = vadd.f32 %v4037_v31, %v1330_v50  ;;  %v4000_v4 = vadd.f32 %v3999_v54, %v3998_v24  ;;  %v4050_v10 = vpop.f32.mrf.mxu1 }
 0x130   : > { %v4001_v52 = vpop.f32.mrf.mxu0 }
 0x131   : > { %v1331_v17 = vadd.f32 %v4000_v4, %v1022_v53  ;;  %v4051_v12 = vpop.f32.mrf.mxu1 }
 0x132   : > { %v4002_v19 = vpop.f32.mrf.mxu0  ;;  %v4052_v14 = vadd.f32 %v4051_v12, %v4050_v10 }
 0x133   : > { %v1581_v0 = vadd.f32 %v4040_v43, %v1331_v17  ;;  %v4003_v61 = vadd.f32 %v4002_v19, %v4001_v52  ;;  %v4053_v57 = vpop.f32.mrf.mxu1 }
 0x134   : > { %v4004_v48 = vpop.f32.mrf.mxu0 }
 0x135   : > { %v1332_v55 = vadd.f32 %v4003_v61, %v1025_v7  ;;  %v4054_v2 = vpop.f32.mrf.mxu1 }
 0x136   : > { %v4005_v63 = vpop.f32.mrf.mxu0  ;;  %v4055_v22 = vadd.f32 %v4054_v2, %v4053_v57 }
 0x137   : > { %v5144_v9 = vadd.f32 %v4043_v39, %v1332_v55  ;;  %v4006_v21 = vadd.f32 %v4005_v63, %v4004_v48  ;;  %v4112_v33 = vpop.f32.mrf.mxu1 }
 0x138   : > { %v4007_v11 = vpop.f32.mrf.mxu0 }
 0x139   : > { %v1333_v56 = vadd.f32 %v4006_v21, %v1030_v8  ;;  %v4113_v3 = vpop.f32.mrf.mxu1 }
 0x13a   : > { %v4008_v13 = vpop.f32.mrf.mxu0  ;;  %v4114_v30 = vadd.f32 %v4113_v3, %v4112_v33 }
 0x13b   : > { %v5146_v16 = vadd.f32 %v4046_v46, %v1333_v56  ;;  %v4009_v18 = vadd.f32 %v4008_v13, %v4007_v11  ;;  %v5152_v47 = vpop.f32.mrf.mxu1 }
 0x13c   : > { %v4010_v53 = vpop.f32.mrf.mxu0 }
 0x13d   : > { %v1334_v20 = vadd.f32 %v4009_v18, %v1033_v23  ;;  %v5154_v23 = vpop.f32.mrf.mxu1 }
 0x13e   : > { %v4011_v6 = vpop.f32.mrf.mxu0 }
 0x13f   : > { %v5148_v7 = vadd.f32 %v4049_v60, %v1334_v20  ;;  %v4012_v32 = vadd.f32 %v4011_v6, %v4010_v53  ;;  %v4118_v5 = vpop.f32.mrf.mxu1 }
 0x140   : > { %v4013_v27 = vpop.f32.mrf.mxu0 }
 0x141   : > { %v1335_v28 = vadd.f32 %v4012_v32, %v1038_v1  ;;  %v4119_v39 = vpop.f32.mrf.mxu1 }
 0x142   : > { %v4014_v8 = vpop.f32.mrf.mxu0  ;;  %v4120_v38 = vadd.f32 %v4119_v39, %v4118_v5 }
 0x143   : > { %v5150_v31 = vadd.f32 %v4052_v14, %v1335_v28  ;;  %v4015_v29 = vadd.f32 %v4014_v8, %v4013_v27  ;;  %v5160_v26 = vpop.f32.mrf.mxu1 }
 0x144   : > { %v4072_v62 = vpop.f32.mrf.mxu0 }
 0x145   : > { %v1336_v34 = vadd.f32 %v4015_v29, %v1041_v36  ;;  %v5162_v46 = vpop.f32.mrf.mxu1 }
 0x146   : > { %v4073_v25 = vpop.f32.mrf.mxu0 }
 0x147   : > { %v5156_v43 = vadd.f32 %v4055_v22, %v1336_v34  ;;  %v4074_v44 = vadd.f32 %v4073_v25, %v4072_v62 }
 0x148   : > { %v4075_v35 = vpop.f32.mrf.mxu0 }
 0x149   : > { %v1941_v37 = vadd.f32 %v4074_v44, %v1579_v42  ;;  %v4124_v50 = vpop.f32.mrf.mxu1 }
 0x14a   : > { %v4076_v1 = vpop.f32.mrf.mxu0 }
 0x14b   : > { %v5158_v59 = vadd.f32 %v4114_v30, %v1941_v37  ;;  %v4125_v54 = vpop.f32.mrf.mxu1 }
 0x14c   : > { %v4078_v40 = vpop.f32.mrf.mxu0 }
 0x14d   : > { %v4127_v4 = vpop.f32.mrf.mxu1 }
 0x14e   : > { %v4079_v15 = vpop.f32.mrf.mxu0 }
 0x14f   : > { %v4080_v41 = vadd.f32 %v4079_v15, %v4078_v40  ;;  %v4128_v52 = vpop.f32.mrf.mxu1 }
 0x150   : > { %v4081_v36 = vpop.f32.mrf.mxu0 }
 0x151   : > { %v1943_v45 = vadd.f32 %v4080_v41, %v1581_v0 }
 0x152   : > { %v4082_v49 = vpop.f32.mrf.mxu0 }
 0x153   : > { %v5164_v24 = vadd.f32 %v4120_v38, %v1943_v45  ;;  %v4077_v38 = vadd.f32 %v4076_v1, %v4075_v35  ;;  %v4083_v45 = vadd.f32 %v4082_v49, %v4081_v36  ;;  %v4129_v1 = vadd.f32 %v4128_v52, %v4127_v4 }
 0x154   : > { %v4084_v42 = vpop.f32.mrf.mxu0 }
 0x155   : > { %5304 = vst [vmem:[#allocation3_spill] sm:$0xff] %v5164_v24  ;;  %v1944_v35 = vadd.f32 %v4083_v45, %v5144_v9 }
 0x156   : > { %v4085_v58 = vpop.f32.mrf.mxu0 }
 0x157   : > { %v5166_v19 = vpop.f32.mrf.mxu1  ;;  %v4086_v34 = vadd.f32 %v4085_v58, %v4084_v42 }
 0x158   : > { %v4087_v60 = vpop.f32.mrf.mxu0 }
 0x159   : > { %v5168_v48 = vpop.f32.mrf.mxu1  ;;  %v1945_v39 = vadd.f32 %v4086_v34, %v5146_v16 }
 0x15a   : > { %v4088_v17 = vpop.f32.mrf.mxu0 }
 0x15b   : > { %v5170_v0 = vpop.f32.mrf.mxu1  ;;  %v4089_v40 = vadd.f32 %v4088_v17, %v4087_v60 }
 0x15c   : > { %v4090_v61 = vpop.f32.mrf.mxu0 }
 0x15d   : > { %v5172_v21 = vpop.f32.mrf.mxu1  ;;  %v1946_v58 = vadd.f32 %v4089_v40, %v5148_v7 }
 0x15e   : > { %v4091_v55 = vpop.f32.mrf.mxu0  ;;  %5305 = vst [vmem:[#allocation4_spill] sm:$0xff] %v5172_v21  ;;  %v1942_v21 = vadd.f32 %v4077_v38, %v5142_v51  ;;  %v4123_v51 = vadd.f32 %v5162_v46, %v5160_v26  ;;  %v4132_v26 = vadd.f32 %v5168_v48, %v5166_v19 }
 0x15f   : > { %v4192_v11 = vpop.f32.mrf.mxu1 }
 0x160   : > { %v4093_v63 = vpop.f32.mrf.mxu0 }
 0x161   : > { %v4193_v12 = vpop.f32.mrf.mxu1 }
 0x162   : > { %v4094_v10 = vpop.f32.mrf.mxu0 }
 0x163   : > { %v5174_v14 = vpop.f32.mrf.mxu1  ;;  %v4095_v52 = vadd.f32 %v4094_v10, %v4093_v63 }
 0x164   : > { %v4152_v56 = vpop.f32.mrf.mxu0 }
 0x165   : > { %v5176_v57 = vpop.f32.mrf.mxu1  ;;  %v1948_v48 = vadd.f32 %v4095_v52, %v5156_v43 }
 0x166   : > { %v4153_v13 = vpop.f32.mrf.mxu0 }
 0x167   : > { %v5178_v20 = vpop.f32.mrf.mxu1 }
 0x168   : > { %v4155_v18 = vpop.f32.mrf.mxu0  ;;  %5306 = vst [vmem:[#allocation5_spill] sm:$0xff] %v5178_v20 }
 0x169   : > { %v5182_v6 = vpop.f32.mrf.mxu1 }
 0x16a   : > { %v4156_v53 = vpop.f32.mrf.mxu0  ;;  %5307 = vst [vmem:[#allocation6_spill] sm:$0xff] %v5182_v6  ;;  %v4154_v6 = vadd.f32 %v4153_v13, %v4152_v56  ;;  %v2234_v13 = vadd.f32 %v4123_v51, %v1944_v35 }
 0x16b   : > { %v5186_v32 = vpop.f32.mrf.mxu1  ;;  %v4157_v17 = vadd.f32 %v4156_v53, %v4155_v18 }
 0x16c   : > { %v5180_v2 = vpop.f32.mrf.mxu0  ;;  %5308 = vst [vmem:[#allocation7_spill] sm:$0xff] %v5186_v32 }
 0x16d   : > { %v5190_v27 = vpop.f32.mrf.mxu1 }
 0x16e   : > { %v5184_v22 = vpop.f32.mrf.mxu0  ;;  %5309 = vst [vmem:[#allocation8_spill] sm:$0xff] %v5190_v27  ;;  %v4126_v27 = vadd.f32 %v4125_v54, %v4124_v50  ;;  %v4117_v50 = vadd.f32 %v5154_v23, %v5152_v47  ;;  %v2482_v54 = vadd.f32 %v4154_v6, %v5158_v59  ;;  %v4194_v47 = vadd.f32 %v4193_v12, %v4192_v11 }
 0x16f   : > { %v4204_v3 = vpop.f32.mrf.mxu1  ;;  %v4160_v10 = vadd.f32 %v5184_v22, %v5180_v2 }
 0x170   : > { %v5188_v33 = vpop.f32.mrf.mxu0  ;;  %v2235_v42 = vadd.f32 %v4126_v27, %v1945_v39  ;;  %v2232_v9 = vadd.f32 %v4117_v50, %v1942_v21  ;;  %v2844_v46 = vadd.f32 %v4194_v47, %v2482_v54 }
 0x171   : > { %v4205_v30 = vpop.f32.mrf.mxu1 }
 0x172   : > { %v5192_v28 = vpop.f32.mrf.mxu0 }
 0x173   : > { %v4207_v62 = vpop.f32.mrf.mxu1 }
 0x174   : > { %v4164_v8 = vpop.f32.mrf.mxu0 }
 0x175   : > { %v4208_v44 = vpop.f32.mrf.mxu1 }
 0x176   : > { %v4165_v29 = vpop.f32.mrf.mxu0  ;;  %v4209_v11 = vadd.f32 %v4208_v44, %v4207_v62  ;;  %v5311_v62 = vld [vmem:[#allocation4_spill] sm:$0xff] }
 0x177   : > { %v5194_v5 = vpop.f32.mrf.mxu1  ;;  %v4166_v32 = vadd.f32 %v4165_v29, %v4164_v8  ;;  %v4163_v8 = vadd.f32 %v5192_v28, %v5188_v33  ;;  %v4135_v43 = vadd.f32 %v5311_v62, %v5170_v0  ;;  %v5312_v33 = vld [vmem:[#allocation3_spill] sm:$0xff] }
 0x178   : > { %v4167_v25 = vpop.f32.mrf.mxu0  ;;  %5310 = vst [vmem:[#allocation9_spill] sm:$0xff] %v5194_v5  ;;  %v4092_v5 = vadd.f32 %v4091_v55, %v4090_v61  ;;  %v2236_v61 = vadd.f32 %v4129_v1, %v1946_v58  ;;  %v4206_v55 = vadd.f32 %v4205_v30, %v4204_v3  ;;  %v2484_v28 = vadd.f32 %v4160_v10, %v5312_v33 }
 0x179   : > { %v5197_v41 = vpop.f32.mrf.mxu1  ;;  %v2486_v36 = vadd.f32 %v4166_v32, %v2235_v42  ;;  %v2483_v32 = vadd.f32 %v4157_v17, %v2232_v9  ;;  %v2238_v45 = vadd.f32 %v4135_v43, %v1948_v48  ;;  %v2485_v50 = vadd.f32 %v4163_v8, %v2234_v13 }
 0x17a   : > { %v4168_v37 = vpop.f32.mrf.mxu0  ;;  %v1947_v4 = vadd.f32 %v4092_v5, %v5150_v31  ;;  %v5222_v31 = vld [vmem:[%s269_s9] ss:$0 sm:$0xff] }
 0x17b   : > { %v5199_v24 = vpop.f32.mrf.mxu1  ;;  %v4169_v49 = vadd.f32 %v4168_v37, %v4167_v25  ;;  %v2848_v18 = vadd.f32 %v4206_v55, %v2486_v36  ;;  %v5231_v37 = vld [vmem:[%s272_s12] ss:$0 sm:$0xff]  ;;  %v5315_v36 = vld [vmem:[#allocation6_spill] sm:$0xff] }
 0x17c   : > { %v4170_v15 = vpop.f32.mrf.mxu0  ;;  %v2237_v19 = vadd.f32 %v4132_v26, %v1947_v4 }
 0x17d   : > { %v5203_v60 = vpop.f32.mrf.mxu1  ;;  %v2487_v53 = vadd.f32 %v4169_v49, %v2236_v61 }
 0x17e   : > { %v4171_v20 = vpop.f32.mrf.mxu0 }
 0x17f   : > { %v4244_v7 = vpop.f32.mrf.mxu1  ;;  %v4172_v27 = vadd.f32 %v4171_v20, %v4170_v15  ;;  %v4197_v20 = vadd.f32 %v5176_v57, %v5174_v14  ;;  %v2849_v34 = vadd.f32 %v4209_v11, %v2487_v53  ;;  %v5313_v42 = vld [vmem:[#allocation9_spill] sm:$0xff] }
 0x180   : > { %v4173_v16 = vpop.f32.mrf.mxu0  ;;  %v4212_v58 = vadd.f32 %v5197_v41, %v5313_v42 }
 0x181   : > { %v4245_v59 = vpop.f32.mrf.mxu1  ;;  %v2845_v44 = vadd.f32 %v4197_v20, %v2483_v32  ;;  %v2488_v5 = vadd.f32 %v4172_v27, %v2237_v19 }
 0x182   : > { %v4174_v56 = vpop.f32.mrf.mxu0  ;;  %v4246_v6 = vadd.f32 %v4245_v59, %v4244_v7  ;;  %v5317_v59 = vld [vmem:[#allocation8_spill] sm:$0xff] }
 0x183   : > { %v4247_v63 = vpop.f32.mrf.mxu1  ;;  %v4175_v14 = vadd.f32 %v4174_v56, %v4173_v16  ;;  %v5314_v16 = vld [vmem:[#allocation5_spill] sm:$0xff]  ;;  %v2850_v56 = vadd.f32 %v4212_v58, %v2488_v5 }
 0x184   : > { %v4232_v23 = vpop.f32.mrf.mxu0  ;;  %v3138_v3 = vadd.f32 %v4246_v6, %v2848_v18  ;;  %v4200_v49 = vadd.f32 %v5315_v36, %v5314_v16  ;;  %v4215_v18 = vadd.f32 %v5203_v60, %v5199_v24 }
 0x185   : > { %v4248_v29 = vpop.f32.mrf.mxu1  ;;  %v2489_v7 = vadd.f32 %v4175_v14, %v2238_v45 }
 0x186   : > { %v4233_v21 = vpop.f32.mrf.mxu0  ;;  %v3153_v2 = vmul.f32 %v5222_v31, %v3138_v3  ;;  %v4249_v22 = vadd.f32 %v4248_v29, %v4247_v63  ;;  %v2846_v9 = vadd.f32 %v4200_v49, %v2484_v28 }
 0x187   : > { %v4234_v12 = vadd.f32 %v4233_v21, %v4232_v23  ;;  %v4250_v39 = vpop.f32.mrf.mxu1  ;;  %v5316_v23 = vld [vmem:[#allocation7_spill] sm:$0xff]  ;;  %v2851_v11 = vadd.f32 %v4215_v18, %v2489_v7 }
 0x188   : > { %v4235_v30 = vpop.f32.mrf.mxu0  ;;  %v3139_v15 = vadd.f32 %v4249_v22, %v2849_v34  ;;  %v3168_v35 = vadd.f32 %v5231_v37, %v3153_v2  ;;  %v4203_v13 = vadd.f32 %v5317_v59, %v5316_v23 }
 0x189   : > { %v3134_v25 = vadd.f32 %v4234_v12, %v2844_v46  ;;  %v4251_v1 = vpop.f32.mrf.mxu1 }
 0x18a   : > { %v4236_v57 = vpop.f32.mrf.mxu0  ;;  %v3154_v17 = vmul.f32 %v5222_v31, %v3139_v15  ;;  %v4252_v41 = vadd.f32 %v4251_v1, %v4250_v39  ;;  %v3176_v53 = vmax.f32 %v3168_v35, 0.0  ;;  %v2847_v10 = vadd.f32 %v4203_v13, %v2485_v50 }
 0x18b   : > { %v3149_v40 = vmul.f32 %v5222_v31, %v3134_v25  ;;  %v4237_v38 = vadd.f32 %v4236_v57, %v4235_v30  ;;  %v4253_v55 = vpop.f32.mrf.mxu1 }
 0x18c   : > { %v4238_v0 = vpop.f32.mrf.mxu0  ;;  %v3169_v52 = vadd.f32 %v5231_v37, %v3154_v17  ;;  %v3140_v6 = vadd.f32 %v4252_v41, %v2850_v56 }
 0x18d   : > { %v3135_v54 = vadd.f32 %v4237_v38, %v2845_v44  ;;  %v3164_v51 = vadd.f32 %v5231_v37, %v3149_v40  ;;  %v4254_v46 = vpop.f32.mrf.mxu1 }
 0x18e   : > { %v4239_v61 = vpop.f32.mrf.mxu0  ;;  %v3177_v27 = vmax.f32 %v3169_v52, 0.0  ;;  %v4255_v63 = vadd.f32 %v4254_v46, %v4253_v55  ;;  %v3155_v3 = vmul.f32 %v5222_v31, %v3140_v6 }
 0x18f   : > { %v3150_v4 = vmul.f32 %v5222_v31, %v3135_v54  ;;  %v4240_v47 = vadd.f32 %v4239_v61, %v4238_v0  ;;  %v3172_v12 = vmax.f32 %v3164_v51, 0.0 }
 0x190   : > { %v4241_v26 = vpop.f32.mrf.mxu0  ;;  %v3886_v60 = vpack.c.bf16 %v3177_v27, %v3176_v53  ;;  %v3141_v8 = vadd.f32 %v4255_v63, %v2851_v11  ;;  %v3170_v34 = vadd.f32 %v5231_v37, %v3155_v3 }
 0x191   : > { %v3165_v32 = vadd.f32 %v5231_v37, %v3150_v4  ;;  %v3136_v21 = vadd.f32 %v4240_v47, %v2846_v9 }
 0x192   : > { %v4242_v19 = vpop.f32.mrf.mxu0  ;;  %3894 = vst [vmem:[%s281_s24 + $0x10] sm:$0xff] %v3886_v60   ;;  %v3156_v25 = vmul.f32 %v5222_v31, %v3141_v8  ;;  %v3178_v44 = vmax.f32 %v3170_v34, 0.0 }
 0x193   : > { %v3173_v24 = vmax.f32 %v3165_v32, 0.0  ;;  %v3151_v48 = vmul.f32 %v5222_v31, %v3136_v21  ;;  %v4243_v20 = vadd.f32 %v4242_v19, %v4241_v26 }
 0x194   : > { %v3171_v62 = vadd.f32 %v5231_v37, %v3156_v25 }
 0x195   : > { %v3876_v30 = vpack.c.bf16 %v3173_v24, %v3172_v12  ;;  %v3137_v29 = vadd.f32 %v4243_v20, %v2847_v10  ;;  %v3166_v2 = vadd.f32 %v5231_v37, %v3151_v48 }
 0x196   : > { %v3179_v5 = vmax.f32 %v3171_v62, 0.0 }
 0x197   : > { %3877 = vst [vmem:[%s281_s24] sm:$0xff] %v3876_v30   ;;  %v3152_v22 = vmul.f32 %v5222_v31, %v3137_v29  ;;  %v3174_v14 = vmax.f32 %v3166_v2, 0.0 }
 0x198   : > { %v3891_v39 = vpack.c.bf16 %v3179_v5, %v3178_v44 }
 0x199   : > { %v3167_v43 = vadd.f32 %v5231_v37, %v3152_v22 }
 0x19a   : > { %3895 = vst [vmem:[%s281_s24 + $0x18] sm:$0xff] %v3891_v39  }
 0x19b   : > { %v3175_v57 = vmax.f32 %v3167_v43, 0.0 }
 0x19d   : > { %v3881_v33 = vpack.c.bf16 %v3175_v57, %v3174_v14 }
 0x19f   : > { %3893 = vst [vmem:[%s281_s24 + $0x8] sm:$0xff] %v3881_v33  }
 0x1a0 PF: > { %s14_s19 = sadd.s32 1, %s4499_s19   ;;  %s5318_s15 = smov %s4491_s17 }
 0x1a1   : > { %p11_p7 = scmp.ge.s32.totalorder %s14_s19, 10   ;;  %s5319_s16 = smov %s4495_s18 }
 0x1a2   : > { %s5320_s17 = smov %s5323_s20  ;;  %s5321_s18 = smov %s5327_s21 }
 0x1a3   :  { %13 = sbr.rel (!%p11_p7) target bundleno = 3 (0x3), region = 85 }

// kernel: mla_head_forward.5
= control target key start
LH: loop header
LB: loop body
LE: loop exit
PB: predicated region body
PF: predicated region fallthrough
CT: control target
= control target key end

     0   :  { %s2749_s15 = smov 0   ;;  %s2751_s16 = smov 0   ;;  %s3465_s0 = inlined_call_operand.vmem [shape: bf16[4,2,8,4096], index: 0, kind: input, shape index: {}]   ;;  %s3466_s1 = inlined_call_operand.vmem [shape: bf16[4,2,8,4096], index: 1, kind: input, shape index: {}]   ;;  %s3467_s2 = inlined_call_operand.vmem [shape: f32[1,4096], index: 2, kind: input, shape index: {}]   ;;  %s3468_s3 = inlined_call_operand.vmem [shape: f32[32,8], index: 3, kind: input, shape index: {}]   ;;  %s3469_s4 = inlined_call_operand.vmem [shape: f32[4,2,32,4096], index: 4, kind: output, shape index: {}]  }
   0x1   :  { %s2753_s17 = smov 0   ;;  %s2755_s18 = smov 0  }
   0x2   :  { %s2757_s19 = smov 0  }
   0x3 LB: > { %s29_s20 = sadd.s32 1, %s2713_s17  ;;  %s33_s21 = sadd.s32 1, %s2717_s18  ;;  %s2721_s19 = sphi %s2757_s19, %s14_s19   ;;  %s2717_s18 = sphi %s2755_s18, %s3473_s18   ;;  %s2713_s17 = sphi %s2753_s17, %s3472_s17   ;;  %s2709_s16 = sphi %s2751_s16, %s3471_s16   ;;  %s2705_s15 = sphi %s2749_s15, %s3470_s15  }
   0x4   : > { %p31_p0 = scmp.ge.s32.totalorder %s29_s20, 2  ;;  %p2566_p1 = scmp.ge.s32.totalorder %s2721_s19, 1 }
   0x5   : > { %p218_p2 = scmp.lt.s32.totalorder %s2721_s19, 9 }
   0x6   : > { %s3475_s20 = smov (%p31_p0, %s29_s20), 0  ;;  %s3477_s21 = smov (!%p31_p0, %s33_s21), %s2717_s18 }
   0x7   : > { %p219_p3 = pnand %p2566_p1, %p218_p2  ;;  %p35_p4 = scmp.ge.s32.totalorder %s3477_s21, 4 }
   0x8   : > { %p271_p5 = scmp.lt.s32.totalorder (!%p219_p3), %s2709_s16, 3  ;;  %p273_p6 = scmp.lt.s32.totalorder (!%p219_p3), %s2705_s15, 1 }
   0x9   : > { %s3479_s21 = smov (%p35_p4, %s3477_s21), 0  ;;  %222 = sbr.rel (%p219_p3) target bundleno = 355 (0x163), region = 36 }
   0xe   : > { %v2782_v0 = vld [vmem:[%s3467_s2] sm:$0xff]  ;;  %v418_v1 = vlaneseq  ;;  %v2723_v2 = vmov 0.0   ;;  %s3481_s16 = smov (!%p271_p5, %s2709_s16), 3  ;;  %v2792_v5 = vld [vmem:[%s3467_s2 + $0x8] sm:$0xff]  ;;  %s3483_s15 = smov (!%p273_p6, %s2705_s15), 1  ;;  %vm842_vm0 = vcmask 64512  }
   0xf   : > { %919 = vmatprep.mubr.f32.mxu0 %v2723_v2  ;;  %1008 = vmatprep.mubr.f32.mxu1 %v2723_v2  ;;  %v2787_v3 = vsub.f32 1.0, %v2782_v0  ;;  %v2795_v6 = vsub.f32 1.0, %v2792_v5  ;;  %s2568_s26 = sshll.u32 %s3481_s16, 6  ;;  %s2574_s27 = sshll.u32 %s3481_s16, 8  ;;  %v2868_v62 = vld [vmem:[%s3468_s3] sm:$0xff] }
  0x10   : > { %v419_v4 = vshrl.u32 %v418_v1, 7  ;;  %s2567_s28 = sshll.u32 %s3483_s15, 5  ;;  %s2573_s29 = sshll.u32 %s3483_s15, 7 }
  0x11   : > { %s277_s30 = sadd.s32 %s2568_s26, %s2567_s28  ;;  %s2813_s5 = sadd.s32 %s2574_s27, %s2573_s29 }
  0x12   : > { %v2797_v7 = vsub.s32 1, %v419_v4  ;;  %v2799_v8 = vsub.s32 3, %v419_v4  ;;  %v2801_v9 = vsub.s32 0, %v419_v4  ;;  %v2803_v10 = vsub.s32 2, %v419_v4  ;;  %s2569_s6 = sshll.u32 %s277_s30, 2  ;;  %s2575_s30 = sshll.u32 %s2813_s5, 3 }
  0x13   : > { %v2805_v11 = vsub.s32 5, %v419_v4  ;;  %v2807_v12 = vsub.s32 7, %v419_v4  ;;  %v2809_v13 = vsub.s32 4, %v419_v4  ;;  %v2811_v14 = vsub.s32 6, %v419_v4  ;;  %s2834_s9 = scalar_lea.vmem %s3465_s0, %s2569_s6  ;;  %s2839_s12 = scalar_lea.vmem %s3466_s1, %s2569_s6 }
  0x14   : > { %v425_v15 = vrot.slane %v2787_v3, %v2797_v7  ;;  %v621_v16 = vrot.slane %v2782_v0, %v2797_v7  ;;  %v433_v17 = vrot.slane %v2787_v3, %v2799_v8  ;;  %v629_v18 = vrot.slane %v2782_v0, %v2799_v8  ;;  %v314_v27 = vld [vmem:[%s2834_s9] sm:$0xff]  ;;  %v315_v29 = vld [vmem:[%s2834_s9 + $0x8] sm:$0xff]  ;;  %v316_v43 = vld [vmem:[%s2834_s9 + $0x10] sm:$0xff]  ;;  %s3320_s8 = scalar_lea.vmem %s3469_s4, %s2575_s30 }
  0x15   : > { %v421_v19 = vrot.slane %v2787_v3, %v2801_v9  ;;  %v617_v20 = vrot.slane %v2782_v0, %v2801_v9  ;;  %v429_v21 = vrot.slane %v2787_v3, %v2803_v10  ;;  %v625_v22 = vrot.slane %v2782_v0, %v2803_v10  ;;  %v362_v28 = vld [vmem:[%s2839_s12] sm:$0xff]  ;;  %v363_v37 = vld [vmem:[%s2839_s12 + $0x8] sm:$0xff]  ;;  %v364_v44 = vld [vmem:[%s2839_s12 + $0x10] sm:$0xff] }
  0x16   : > { %v441_v23 = vrot.slane %v2787_v3, %v2805_v11  ;;  %v637_v24 = vrot.slane %v2782_v0, %v2805_v11  ;;  %v449_v25 = vrot.slane %v2787_v3, %v2807_v12  ;;  %v645_v26 = vrot.slane %v2782_v0, %v2807_v12  ;;  %v317_v53 = vld [vmem:[%s2834_s9 + $0x18] sm:$0xff] }
  0x17   : > { %v437_v30 = vrot.slane %v2787_v3, %v2809_v13  ;;  %v633_v31 = vrot.slane %v2782_v0, %v2809_v13  ;;  %v445_v32 = vrot.slane %v2787_v3, %v2811_v14  ;;  %v641_v33 = vrot.slane %v2782_v0, %v2811_v14  ;;  %v365_v54 = vld [vmem:[%s2839_s12 + $0x18] sm:$0xff] }
  0x18   : > { %v331_v34 = vunpack.c.h.bf16 %v314_v27  ;;  %v379_v35 = vunpack.c.h.bf16 %v362_v28  ;;  %v333_v36 = vunpack.c.h.bf16 %v315_v29  ;;  %v330_v38 = vunpack.c.l.bf16 %v314_v27  ;;  %v2877_v27 = vld [vmem:[%s2834_s9 + $0x28] sm:$0xff] }
  0x19   : > { %v381_v39 = vunpack.c.h.bf16 %v363_v37  ;;  %v378_v40 = vunpack.c.l.bf16 %v362_v28  ;;  %v332_v41 = vunpack.c.l.bf16 %v315_v29  ;;  %v380_v42 = vunpack.c.l.bf16 %v363_v37 }
  0x1a   : > { %v579_v45 = vmul.f32 %v425_v15, %v331_v34  ;;  %v775_v46 = vmul.f32 %v621_v16, %v379_v35  ;;  %v581_v47 = vmul.f32 %v433_v17, %v333_v36  ;;  %v578_v48 = vmul.f32 %v421_v19, %v330_v38  ;;  %v2871_v15 = vld [vmem:[%s2834_s9 + $0x20] sm:$0xff] }
  0x1b   : > { %v777_v49 = vmul.f32 %v629_v18, %v381_v39  ;;  %v774_v50 = vmul.f32 %v617_v20, %v378_v40  ;;  %v580_v51 = vmul.f32 %v429_v21, %v332_v41  ;;  %v776_v52 = vmul.f32 %v625_v22, %v380_v42  ;;  %v366_v20 = vld [vmem:[%s2839_s12 + $0x20] sm:$0xff]  ;;  %v2898_v40 = vld [vmem:[%s2834_s9 + $0x30] sm:$0xff] }
  0x1c   : > { %v807_v55 = vadd.f32 %v775_v46, %v579_v45  ;;  %v334_v56 = vunpack.c.l.bf16 %v316_v43  ;;  %v335_v57 = vunpack.c.h.bf16 %v316_v43  ;;  %v382_v58 = vunpack.c.l.bf16 %v364_v44  ;;  %v2912_v45 = vld [vmem:[%s3468_s3 + $0x10] sm:$0xff] }
  0x1d   : > { %v809_v59 = vadd.f32 %v777_v49, %v581_v47  ;;  %v806_v60 = vadd.f32 %v774_v50, %v578_v48  ;;  %v808_v61 = vadd.f32 %v776_v52, %v580_v51  ;;  %v383_v63 = vunpack.c.h.bf16 %v364_v44  ;;  %v2906_v44 = vld [vmem:[%s2839_s12 + $0x30] sm:$0xff] }
  0x1e   : > { %885 = vmatprep.subr.mxu0 %v807_v55  ;;  %v583_v0 = vmul.f32 %v441_v23, %v335_v57  ;;  %v336_v1 = vunpack.c.l.bf16 %v317_v53  ;;  %v337_v3 = vunpack.c.h.bf16 %v317_v53  ;;  %v384_v4 = vunpack.c.l.bf16 %v365_v54 }
  0x1f   : > { %974 = vmatprep.subr.mxu1 %v809_v59  ;;  %886 = vmatpush1.msra.mxu0 %v806_v60  ;;  %v779_v16 = vmul.f32 %v637_v24, %v383_v63  ;;  %v385_v17 = vunpack.c.h.bf16 %v365_v54  ;;  %v582_v18 = vmul.f32 %v437_v30, %v334_v56  ;;  %v778_v19 = vmul.f32 %v633_v31, %v382_v58  ;;  %v367_v31 = vld [vmem:[%s2839_s12 + $0x28] sm:$0xff]  ;;  %v2923_v54 = vld [vmem:[%s2834_s9 + $0x38] sm:$0xff] }
  0x20   : > { %975 = vmatpush1.msra.mxu1 %v808_v61  ;;  %2576 = vmatmul.mubr.msk.f32.vlgmr.msra.gmra.mxu0 %vm842_vm0, %v2868_v62  ;;  %v585_v21 = vmul.f32 %v449_v25, %v337_v3  ;;  %v584_v22 = vmul.f32 %v445_v32, %v336_v1  ;;  %v780_v23 = vmul.f32 %v641_v33, %v384_v4  ;;  %v339_v30 = vunpack.c.h.bf16 %v2871_v15  ;;  %v2888_v25 = vld [vmem:[%s3468_s3 + $0x8] sm:$0xff]  ;;  %v2932_v59 = vld [vmem:[%s2839_s12 + $0x38] sm:$0xff] }
  0x21   : > { %2580 = vmatmul.mubr.msk.f32.vlgmr.msra.gmra.mxu1 %vm842_vm0, %v2868_v62  ;;  %v811_v28 = vadd.f32 %v779_v16, %v583_v0  ;;  %v781_v29 = vmul.f32 %v645_v26, %v385_v17  ;;  %v810_v24 = vadd.f32 %v778_v19, %v582_v18  ;;  %925 = vmatprep.mubr.f32.mxu0 %v2723_v2  ;;  %v387_v32 = vunpack.c.h.bf16 %v366_v20  ;;  %v2942_v63 = vld [vmem:[%s3468_s3 + $0x18] sm:$0xff] }
  0x22   : > { %v812_v34 = vadd.f32 %v780_v23, %v584_v22  ;;  %1014 = vmatprep.mubr.f32.mxu1 %v2723_v2  ;;  %v457_v26 = vrot.slane %v2795_v6, %v2797_v7  ;;  %v653_v35 = vrot.slane %v2792_v5, %v2797_v7  ;;  %v341_v36 = vunpack.c.h.bf16 %v2877_v27  ;;  %v2958_v22 = vld [vmem:[%s3467_s2 + $0x10] sm:$0xff] }
  0x23   : > { %1063 = vmatprep.subr.mxu0 %v811_v28  ;;  %v813_v33 = vadd.f32 %v781_v29, %v585_v21  ;;  %v389_v38 = vunpack.c.h.bf16 %v367_v31  ;;  %v465_v39 = vrot.slane %v2795_v6, %v2799_v8  ;;  %v338_v41 = vunpack.c.l.bf16 %v2871_v15 }
  0x24   : > { %1064 = vmatpush1.msra.mxu0 %v810_v24  ;;  %v587_v37 = vmul.f32 %v457_v26, %v339_v30  ;;  %v783_v42 = vmul.f32 %v653_v35, %v387_v32  ;;  %v661_v43 = vrot.slane %v2792_v5, %v2799_v8  ;;  %v386_v46 = vunpack.c.l.bf16 %v366_v20  ;;  %v370_v32 = vld [vmem:[%s2839_s12 + $0x40] sm:$0xff] }
  0x25   : > { %1152 = vmatprep.subr.mxu1 %v813_v33  ;;  %2577 = vmatmul.mubr.msk.f32.gmra.mxu0 %vm842_vm0, %v2888_v25  ;;  %v589_v47 = vmul.f32 %v465_v39, %v341_v36  ;;  %v453_v48 = vrot.slane %v2795_v6, %v2801_v9  ;;  %v649_v49 = vrot.slane %v2792_v5, %v2801_v9  ;;  %v340_v51 = vunpack.c.l.bf16 %v2877_v27 }
  0x26   : > { %1153 = vmatpush1.msra.mxu1 %v812_v34  ;;  %931 = vmatprep.mubr.f32.mxu0 %v2723_v2  ;;  %v815_v50 = vadd.f32 %v783_v42, %v587_v37  ;;  %v785_v52 = vmul.f32 %v661_v43, %v389_v38  ;;  %v343_v53 = vunpack.c.h.bf16 %v2898_v40  ;;  %v388_v55 = vunpack.c.l.bf16 %v367_v31  ;;  %v322_v34 = vld [vmem:[%s2834_s9 + $0x40] sm:$0xff]  ;;  %v2980_v37 = vld [vmem:[%s2834_s9 + $0x48] sm:$0xff] }
  0x27   : > { %2581 = vmatmul.mubr.msk.f32.gmra.mxu1 %vm842_vm0, %v2888_v25  ;;  %v461_v56 = vrot.slane %v2795_v6, %v2803_v10  ;;  %v657_v57 = vrot.slane %v2792_v5, %v2803_v10  ;;  %v391_v58 = vunpack.c.h.bf16 %v2906_v44  ;;  %v473_v61 = vrot.slane %v2795_v6, %v2805_v11  ;;  %v2983_v38 = vld [vmem:[%s2839_s12 + $0x48] sm:$0xff] }
  0x28   : > { %1020 = vmatprep.mubr.f32.mxu1 %v2723_v2  ;;  %1241 = vmatprep.subr.mxu0 %v815_v50  ;;  %v817_v60 = vadd.f32 %v785_v52, %v589_v47  ;;  %v586_v0 = vmul.f32 %v453_v48, %v338_v41  ;;  %v782_v1 = vmul.f32 %v649_v49, %v386_v46  ;;  %v345_v4 = vunpack.c.h.bf16 %v2923_v54 }
  0x29   : > { %2578 = vmatmul.mubr.msk.f32.gmra.mxu0 %vm842_vm0, %v2912_v45  ;;  %v669_v3 = vrot.slane %v2792_v5, %v2805_v11  ;;  %v591_v15 = vmul.f32 %v473_v61, %v343_v53  ;;  %v393_v16 = vunpack.c.h.bf16 %v2932_v59  ;;  %v481_v17 = vrot.slane %v2795_v6, %v2807_v12 }
  0x2a   : > { %937 = vmatprep.mubr.f32.mxu0 %v2723_v2  ;;  %1330 = vmatprep.subr.mxu1 %v817_v60  ;;  %v588_v18 = vmul.f32 %v461_v56, %v340_v51  ;;  %v784_v19 = vmul.f32 %v657_v57, %v388_v55  ;;  %v677_v21 = vrot.slane %v2792_v5, %v2807_v12  ;;  %v2966_v24 = vsub.f32 1.0, %v2958_v22  ;;  %v3011_v56 = vld [vmem:[%s3467_s2 + $0x18] sm:$0xff] }
  0x2b   : > { %2582 = vmatmul.mubr.msk.f32.gmra.mxu1 %vm842_vm0, %v2912_v45  ;;  %v787_v20 = vmul.f32 %v669_v3, %v391_v58  ;;  %v593_v23 = vmul.f32 %v481_v17, %v345_v4  ;;  %v814_v27 = vadd.f32 %v782_v1, %v586_v0  ;;  %v342_v31 = vunpack.c.l.bf16 %v2898_v40  ;;  %v3021_v1 = vld [vmem:[%s2834_s9 + $0x50] sm:$0xff] }
  0x2c   : > { %1026 = vmatprep.mubr.f32.mxu1 %v2723_v2  ;;  %v789_v28 = vmul.f32 %v677_v21, %v393_v16  ;;  %v816_v30 = vadd.f32 %v784_v19, %v588_v18  ;;  %v390_v26 = vunpack.c.l.bf16 %v2906_v44  ;;  %v469_v35 = vrot.slane %v2795_v6, %v2809_v13  ;;  %v3026_v4 = vld [vmem:[%s2839_s12 + $0x50] sm:$0xff]  ;;  %v3040_v21 = vld [vmem:[%s2839_s12 + $0x58] sm:$0xff] }
  0x2d   : > { %2579 = vmatmul.mubr.msk.f32.gmra.mxu0 %vm842_vm0, %v2942_v63  ;;  %v819_v29 = vadd.f32 %v787_v20, %v591_v15  ;;  %v665_v36 = vrot.slane %v2792_v5, %v2809_v13  ;;  %v344_v39 = vunpack.c.l.bf16 %v2923_v54  ;;  %v392_v40 = vunpack.c.l.bf16 %v2932_v59  ;;  %v3037_v20 = vld [vmem:[%s2834_s9 + $0x58] sm:$0xff] }
  0x2e   : > { %1097 = vmatprep.mubr.f32.mxu0 %v2723_v2  ;;  %v821_v33 = vadd.f32 %v789_v28, %v593_v23  ;;  %v477_v41 = vrot.slane %v2795_v6, %v2811_v14  ;;  %v673_v42 = vrot.slane %v2792_v5, %v2811_v14  ;;  %v347_v43 = vunpack.c.h.bf16 %v322_v34  ;;  %v326_v23 = vld [vmem:[%s2834_s9 + $0x60] sm:$0xff] }
  0x2f   : > { %2583 = vmatmul.mubr.msk.f32.gmra.mxu1 %vm842_vm0, %v2942_v63  ;;  %v395_v44 = vunpack.c.h.bf16 %v370_v32  ;;  %v489_v46 = vrot.slane %v2966_v24, %v2797_v7  ;;  %v685_v47 = vrot.slane %v2958_v22, %v2797_v7  ;;  %v349_v6 = vunpack.c.h.bf16 %v2980_v37 }
  0x30   : > { %1186 = vmatprep.mubr.f32.mxu1 %v2723_v2  ;;  %v397_v48 = vunpack.c.h.bf16 %v2983_v38  ;;  %v497_v5 = vrot.slane %v2966_v24, %v2799_v8  ;;  %v693_v49 = vrot.slane %v2958_v22, %v2799_v8  ;;  %v590_v50 = vmul.f32 %v469_v35, %v342_v31  ;;  %v374_v31 = vld [vmem:[%s2839_s12 + $0x60] sm:$0xff]  ;;  %v327_v35 = vld [vmem:[%s2834_s9 + $0x68] sm:$0xff] }
  0x31   : > { %2584 = vmatmul.mubr.msk.f32.vlgmr.msra.gmra.mxu0 %vm842_vm0, %v2868_v62  ;;  %v786_v51 = vmul.f32 %v665_v36, %v390_v26  ;;  %v592_v52 = vmul.f32 %v477_v41, %v344_v39  ;;  %v788_v53 = vmul.f32 %v673_v42, %v392_v40  ;;  %v346_v54 = vunpack.c.l.bf16 %v322_v34  ;;  %v375_v42 = vld [vmem:[%s2839_s12 + $0x68] sm:$0xff] }
  0x32   : > { %1242 = vmatpush1.msra.mxu0 %v814_v27  ;;  %1103 = vmatprep.mubr.f32.mxu0 %v2723_v2  ;;  %v394_v55 = vunpack.c.l.bf16 %v370_v32  ;;  %v595_v57 = vmul.f32 %v489_v46, %v347_v43  ;;  %v791_v58 = vmul.f32 %v685_v47, %v395_v44  ;;  %v485_v59 = vrot.slane %v2966_v24, %v2801_v9 }
  0x33   : > { %2588 = vmatmul.mubr.msk.f32.vlgmr.msra.gmra.mxu1 %vm842_vm0, %v2868_v62  ;;  %1419 = vmatprep.subr.mxu0 %v819_v29  ;;  %v681_v60 = vrot.slane %v2958_v22, %v2801_v9  ;;  %v597_v61 = vmul.f32 %v497_v5, %v349_v6  ;;  %v793_v0 = vmul.f32 %v693_v49, %v397_v48  ;;  %v3029_v15 = vsub.f32 1.0, %v3011_v56 }
  0x34   : > { %1331 = vmatpush1.msra.mxu1 %v816_v30  ;;  %1192 = vmatprep.mubr.f32.mxu1 %v2723_v2  ;;  %v818_v3 = vadd.f32 %v786_v51, %v590_v50  ;;  %v820_v16 = vadd.f32 %v788_v53, %v592_v52  ;;  %v348_v17 = vunpack.c.l.bf16 %v2980_v37  ;;  %v396_v18 = vunpack.c.l.bf16 %v2983_v38  ;;  %v328_v50 = vld [vmem:[%s2834_s9 + $0x70] sm:$0xff] }
  0x35   : > { %2585 = vmatmul.mubr.msk.f32.gmra.mxu0 %vm842_vm0, %v2888_v25  ;;  %1508 = vmatprep.subr.mxu1 %v821_v33  ;;  %v493_v19 = vrot.slane %v2966_v24, %v2803_v10  ;;  %v823_v27 = vadd.f32 %v791_v58, %v595_v57  ;;  %v3045_v28 = vmul.f32 %v485_v59, %v346_v54  ;;  %v351_v30 = vunpack.c.h.bf16 %v3021_v1  ;;  %v376_v59 = vld [vmem:[%s2839_s12 + $0x70] sm:$0xff] }
  0x36   : > { %1109 = vmatprep.mubr.f32.mxu0 %v2723_v2  ;;  %v3047_v29 = vmul.f32 %v681_v60, %v394_v55  ;;  %v825_v34 = vadd.f32 %v793_v0, %v597_v61  ;;  %v689_v32 = vrot.slane %v2958_v22, %v2803_v10  ;;  %v399_v26 = vunpack.c.h.bf16 %v3026_v4 }
  0x37   : > { %2589 = vmatmul.mubr.msk.f32.gmra.mxu1 %vm842_vm0, %v2888_v25  ;;  %v505_v33 = vrot.slane %v2966_v24, %v2805_v11  ;;  %v701_v36 = vrot.slane %v2958_v22, %v2805_v11  ;;  %v353_v39 = vunpack.c.h.bf16 %v3037_v20  ;;  %v401_v40 = vunpack.c.h.bf16 %v3040_v21 }
  0x38   : > { %1198 = vmatprep.mubr.f32.mxu1 %v2723_v2  ;;  %v355_v41 = vunpack.c.h.bf16 %v326_v23  ;;  %v513_v43 = vrot.slane %v2966_v24, %v2807_v12  ;;  %v354_v44 = vunpack.c.l.bf16 %v326_v23  ;;  %v403_v46 = vunpack.c.h.bf16 %v374_v31 }
  0x39   : > { %2586 = vmatmul.mubr.msk.f32.gmra.mxu0 %vm842_vm0, %v2912_v45  ;;  %v521_v47 = vrot.slane %v3029_v15, %v2797_v7  ;;  %v402_v6 = vunpack.c.l.bf16 %v374_v31  ;;  %v717_v48 = vrot.slane %v3011_v56, %v2797_v7  ;;  %v356_v5 = vunpack.c.l.bf16 %v327_v35 }
  0x3a   : > { %1115 = vmatprep.mubr.f32.mxu0 %v2723_v2  ;;  %v357_v49 = vunpack.c.h.bf16 %v327_v35  ;;  %v404_v52 = vunpack.c.l.bf16 %v375_v42  ;;  %v405_v53 = vunpack.c.h.bf16 %v375_v42  ;;  %v529_v54 = vrot.slane %v3029_v15, %v2799_v8  ;;  %v329_v35 = vld [vmem:[%s2834_s9 + $0x78] sm:$0xff] }
  0x3b   : > { %2590 = vmatmul.mubr.msk.f32.gmra.mxu1 %vm842_vm0, %v2912_v45  ;;  %v603_v51 = vmul.f32 %v521_v47, %v355_v41  ;;  %v799_v55 = vmul.f32 %v717_v48, %v403_v46  ;;  %v725_v57 = vrot.slane %v3011_v56, %v2799_v8  ;;  %v517_v7 = vrot.slane %v3029_v15, %v2801_v9  ;;  %v377_v48 = vld [vmem:[%s2839_s12 + $0x78] sm:$0xff] }
  0x3c   : > { %1204 = vmatprep.mubr.f32.mxu1 %v2723_v2  ;;  %v713_v58 = vrot.slane %v3011_v56, %v2801_v9  ;;  %v605_v60 = vmul.f32 %v529_v54, %v357_v49  ;;  %v525_v61 = vrot.slane %v3029_v15, %v2803_v10  ;;  %v721_v0 = vrot.slane %v3011_v56, %v2803_v10 }
  0x3d   : > { %2587 = vmatmul.mubr.msk.f32.gmra.mxu0 %vm842_vm0, %v2942_v63  ;;  %v358_v8 = vunpack.c.l.bf16 %v328_v50  ;;  %v3094_v23 = vadd.f32 %v799_v55, %v603_v51  ;;  %v801_v9 = vmul.f32 %v725_v57, %v405_v53  ;;  %v602_v31 = vmul.f32 %v517_v7, %v354_v44 }
  0x3e   : > { %1275 = vmatprep.mubr.f32.mxu0 %v2723_v2  ;;  %v798_v41 = vmul.f32 %v713_v58, %v402_v6  ;;  %v604_v42 = vmul.f32 %v525_v61, %v356_v5  ;;  %v800_v46 = vmul.f32 %v721_v0, %v404_v52  ;;  %v406_v47 = vunpack.c.l.bf16 %v376_v59 }
  0x3f   : > { %2591 = vmatmul.mubr.msk.f32.gmra.mxu1 %vm842_vm0, %v2942_v63  ;;  %v3101_v49 = vadd.f32 %v801_v9, %v605_v60  ;;  %v537_v44 = vrot.slane %v3029_v15, %v2805_v11  ;;  %v361_v51 = vunpack.c.h.bf16 %v329_v35  ;;  %v408_v53 = vunpack.c.l.bf16 %v377_v48 }
  0x40   : > { %1364 = vmatprep.mubr.f32.mxu1 %v2723_v2  ;;  %v3108_v6 = vadd.f32 %v798_v41, %v602_v31  ;;  %v3110_v5 = vadd.f32 %v800_v46, %v604_v42  ;;  %v409_v54 = vunpack.c.h.bf16 %v377_v48  ;;  %v545_v55 = vrot.slane %v3029_v15, %v2807_v12 }
  0x41   : > { %2592 = vmatmul.mubr.msk.f32.vlgmr.msra.gmra.mxu0 %vm842_vm0, %v2868_v62  ;;  %v741_v57 = vrot.slane %v3011_v56, %v2807_v12  ;;  %v533_v7 = vrot.slane %v3029_v15, %v2809_v13  ;;  %v729_v58 = vrot.slane %v3011_v56, %v2809_v13  ;;  %v541_v61 = vrot.slane %v3029_v15, %v2811_v14 }
  0x42   : > { %1420 = vmatpush1.msra.mxu0 %v818_v3  ;;  %1281 = vmatprep.mubr.f32.mxu0 %v2723_v2  ;;  %v359_v3 = vunpack.c.h.bf16 %v328_v50  ;;  %v360_v50 = vunpack.c.l.bf16 %v329_v35  ;;  %v737_v0 = vrot.slane %v3011_v56, %v2811_v14  ;;  %v609_v9 = vmul.f32 %v545_v55, %v361_v51 }
  0x43   : > { %2596 = vmatmul.mubr.msk.f32.vlgmr.msra.gmra.mxu1 %vm842_vm0, %v2868_v62  ;;  %1597 = vmatprep.subr.mxu0 %v823_v27  ;;  %v407_v27 = vunpack.c.h.bf16 %v376_v59  ;;  %v709_v59 = vrot.slane %v2958_v22, %v2807_v12  ;;  %v805_v31 = vmul.f32 %v741_v57, %v409_v54  ;;  %v802_v35 = vmul.f32 %v729_v58, %v406_v47 }
  0x44   : > { %1509 = vmatpush1.msra.mxu1 %v820_v16  ;;  %1370 = vmatprep.mubr.f32.mxu1 %v2723_v2  ;;  %v733_v16 = vrot.slane %v3011_v56, %v2805_v11  ;;  %v599_v41 = vmul.f32 %v505_v33, %v351_v30  ;;  %v795_v56 = vmul.f32 %v701_v36, %v399_v26  ;;  %v352_v36 = vunpack.c.l.bf16 %v3037_v20 }
  0x45   : > { %2593 = vmatmul.mubr.msk.f32.gmra.mxu0 %vm842_vm0, %v2888_v25  ;;  %1686 = vmatprep.subr.mxu1 %v825_v34  ;;  %v607_v34 = vmul.f32 %v537_v44, %v359_v3  ;;  %v606_v3 = vmul.f32 %v533_v7, %v358_v8  ;;  %v608_v15 = vmul.f32 %v541_v61, %v360_v50 }
  0x46   : > { %1287 = vmatprep.mubr.f32.mxu0 %v2723_v2  ;;  %v803_v52 = vmul.f32 %v733_v16, %v407_v27  ;;  %v804_v42 = vmul.f32 %v737_v0, %v408_v53  ;;  %v596_v8 = vmul.f32 %v493_v19, %v348_v17  ;;  %v792_v30 = vmul.f32 %v689_v32, %v396_v18 }
  0x47   : > { %2597 = vmatmul.mubr.msk.f32.gmra.mxu1 %vm842_vm0, %v2888_v25  ;;  %v3157_v33 = vadd.f32 %v805_v31, %v609_v9  ;;  %v3159_v11 = vadd.f32 %v802_v35, %v606_v3  ;;  %v601_v37 = vmul.f32 %v513_v43, %v353_v39  ;;  %v797_v38 = vmul.f32 %v709_v59, %v401_v40 }
  0x48   : > { %1376 = vmatprep.mubr.f32.mxu1 %v2723_v2  ;;  %v3127_v60 = vadd.f32 %v803_v52, %v607_v34  ;;  %v3170_v17 = vadd.f32 %v804_v42, %v608_v15  ;;  %v822_v10 = vadd.f32 %v3047_v29, %v3045_v28  ;;  %v827_v18 = vadd.f32 %v795_v56, %v599_v41 }
  0x49   : > { %2594 = vmatmul.mubr.msk.f32.gmra.mxu0 %vm842_vm0, %v2912_v45  ;;  %v824_v19 = vadd.f32 %v792_v30, %v596_v8  ;;  %v829_v12 = vadd.f32 %v797_v38, %v601_v37  ;;  %v350_v28 = vunpack.c.l.bf16 %v3021_v1  ;;  %v398_v29 = vunpack.c.l.bf16 %v3026_v4 }
  0x4a   : > { %1293 = vmatprep.mubr.f32.mxu0 %v2723_v2  ;;  %v501_v32 = vrot.slane %v2966_v24, %v2809_v13  ;;  %v697_v26 = vrot.slane %v2958_v22, %v2809_v13  ;;  %v400_v39 = vunpack.c.l.bf16 %v3040_v21  ;;  %v509_v1 = vrot.slane %v2966_v24, %v2811_v14 }
  0x4b   : > { %2598 = vmatmul.mubr.msk.f32.gmra.mxu1 %vm842_vm0, %v2912_v45  ;;  %v705_v4 = vrot.slane %v2958_v22, %v2811_v14 }
  0x4c   : > { %1382 = vmatprep.mubr.f32.mxu1 %v2723_v2  ;;  %v598_v13 = vmul.f32 %v501_v32, %v350_v28  ;;  %v794_v40 = vmul.f32 %v697_v26, %v398_v29  ;;  %v600_v20 = vmul.f32 %v509_v1, %v352_v36 }
  0x4d   : > { %2595 = vmatmul.mubr.msk.f32.gmra.mxu0 %vm842_vm0, %v2942_v63  ;;  %v796_v21 = vmul.f32 %v705_v4, %v400_v39 }
  0x4e   : > { %1453 = vmatprep.mubr.f32.mxu0 %v2723_v2  ;;  %v826_v14 = vadd.f32 %v794_v40, %v598_v13 }
  0x4f   : > { %2599 = vmatmul.mubr.msk.f32.gmra.mxu1 %vm842_vm0, %v2942_v63  ;;  %v828_v22 = vadd.f32 %v796_v21, %v600_v20 }
  0x50   : > { %1542 = vmatprep.mubr.f32.mxu1 %v2723_v2 }
  0x51   : > { %2600 = vmatmul.mubr.msk.f32.vlgmr.msra.gmra.mxu0 %vm842_vm0, %v2868_v62 }
  0x52   : > { %1598 = vmatpush1.msra.mxu0 %v822_v10  ;;  %1459 = vmatprep.mubr.f32.mxu0 %v2723_v2 }
  0x53   : > { %2604 = vmatmul.mubr.msk.f32.vlgmr.msra.gmra.mxu1 %vm842_vm0, %v2868_v62  ;;  %1775 = vmatprep.subr.mxu0 %v827_v18 }
  0x54   : > { %1687 = vmatpush1.msra.mxu1 %v824_v19  ;;  %1548 = vmatprep.mubr.f32.mxu1 %v2723_v2 }
  0x55   : > { %2601 = vmatmul.mubr.msk.f32.gmra.mxu0 %vm842_vm0, %v2888_v25  ;;  %1864 = vmatprep.subr.mxu1 %v829_v12 }
  0x56   : > { %1465 = vmatprep.mubr.f32.mxu0 %v2723_v2 }
  0x57   : > { %2605 = vmatmul.mubr.msk.f32.gmra.mxu1 %vm842_vm0, %v2888_v25 }
  0x58   : > { %1554 = vmatprep.mubr.f32.mxu1 %v2723_v2 }
  0x59   : > { %2602 = vmatmul.mubr.msk.f32.gmra.mxu0 %vm842_vm0, %v2912_v45 }
  0x5a   : > { %1471 = vmatprep.mubr.f32.mxu0 %v2723_v2 }
  0x5b   : > { %2606 = vmatmul.mubr.msk.f32.gmra.mxu1 %vm842_vm0, %v2912_v45 }
  0x5c   : > { %1560 = vmatprep.mubr.f32.mxu1 %v2723_v2 }
  0x5d   : > { %2603 = vmatmul.mubr.msk.f32.gmra.mxu0 %vm842_vm0, %v2942_v63 }
  0x5e   : > { %1631 = vmatprep.mubr.f32.mxu0 %v2723_v2 }
  0x5f   : > { %2607 = vmatmul.mubr.msk.f32.gmra.mxu1 %vm842_vm0, %v2942_v63 }
  0x60   : > { %1720 = vmatprep.mubr.f32.mxu1 %v2723_v2 }
  0x61   : > { %2608 = vmatmul.mubr.msk.f32.vlgmr.msra.gmra.mxu0 %vm842_vm0, %v2868_v62 }
  0x62   : > { %1776 = vmatpush1.msra.mxu0 %v826_v14  ;;  %1637 = vmatprep.mubr.f32.mxu0 %v2723_v2 }
  0x63   : > { %2612 = vmatmul.mubr.msk.f32.vlgmr.msra.gmra.mxu1 %vm842_vm0, %v2868_v62  ;;  %1953 = vmatprep.subr.mxu0 %v3094_v23 }
  0x64   : > { %1865 = vmatpush1.msra.mxu1 %v828_v22  ;;  %1726 = vmatprep.mubr.f32.mxu1 %v2723_v2 }
  0x65   : > { %2609 = vmatmul.mubr.msk.f32.gmra.mxu0 %vm842_vm0, %v2888_v25  ;;  %2042 = vmatprep.subr.mxu1 %v3101_v49 }
  0x66   : > { %1643 = vmatprep.mubr.f32.mxu0 %v2723_v2 }
  0x67   : > { %2613 = vmatmul.mubr.msk.f32.gmra.mxu1 %vm842_vm0, %v2888_v25 }
  0x68   : > { %1732 = vmatprep.mubr.f32.mxu1 %v2723_v2 }
  0x69   : > { %2610 = vmatmul.mubr.msk.f32.gmra.mxu0 %vm842_vm0, %v2912_v45 }
  0x6a   : > { %1649 = vmatprep.mubr.f32.mxu0 %v2723_v2 }
  0x6b   : > { %2614 = vmatmul.mubr.msk.f32.gmra.mxu1 %vm842_vm0, %v2912_v45 }
  0x6c   : > { %1738 = vmatprep.mubr.f32.mxu1 %v2723_v2 }
  0x6d   : > { %2611 = vmatmul.mubr.msk.f32.gmra.mxu0 %vm842_vm0, %v2942_v63 }
  0x6e   : > { %1809 = vmatprep.mubr.f32.mxu0 %v2723_v2 }
  0x6f   : > { %2615 = vmatmul.mubr.msk.f32.gmra.mxu1 %vm842_vm0, %v2942_v63 }
  0x70   : > { %1898 = vmatprep.mubr.f32.mxu1 %v2723_v2 }
  0x71   : > { %2616 = vmatmul.mubr.msk.f32.vlgmr.msra.gmra.mxu0 %vm842_vm0, %v2868_v62 }
  0x72   : > { %1954 = vmatpush1.msra.mxu0 %v3108_v6  ;;  %1815 = vmatprep.mubr.f32.mxu0 %v2723_v2 }
  0x73   : > { %2620 = vmatmul.mubr.msk.f32.vlgmr.msra.gmra.mxu1 %vm842_vm0, %v2868_v62  ;;  %2131 = vmatprep.subr.mxu0 %v3127_v60 }
  0x74   : > { %2043 = vmatpush1.msra.mxu1 %v3110_v5  ;;  %1904 = vmatprep.mubr.f32.mxu1 %v2723_v2 }
  0x75   : > { %2617 = vmatmul.mubr.msk.f32.gmra.mxu0 %vm842_vm0, %v2888_v25  ;;  %2220 = vmatprep.subr.mxu1 %v3157_v33 }
  0x76   : > { %1821 = vmatprep.mubr.f32.mxu0 %v2723_v2 }
  0x77   : > { %2621 = vmatmul.mubr.msk.f32.gmra.mxu1 %vm842_vm0, %v2888_v25 }
  0x78   : > { %1910 = vmatprep.mubr.f32.mxu1 %v2723_v2 }
  0x79   : > { %2618 = vmatmul.mubr.msk.f32.gmra.mxu0 %vm842_vm0, %v2912_v45 }
  0x7a   : > { %1827 = vmatprep.mubr.f32.mxu0 %v2723_v2 }
  0x7b   : > { %2622 = vmatmul.mubr.msk.f32.gmra.mxu1 %vm842_vm0, %v2912_v45 }
  0x7c   : > { %1916 = vmatprep.mubr.f32.mxu1 %v2723_v2 }
  0x7d   : > { %2619 = vmatmul.mubr.msk.f32.gmra.mxu0 %vm842_vm0, %v2942_v63 }
  0x7e   : > { %1987 = vmatprep.mubr.f32.mxu0 %v2723_v2 }
  0x7f   : > { %2623 = vmatmul.mubr.msk.f32.gmra.mxu1 %vm842_vm0, %v2942_v63 }
  0x80   : > { %2076 = vmatprep.mubr.f32.mxu1 %v2723_v2 }
  0x81   : > { %2624 = vmatmul.mubr.msk.f32.vlgmr.msra.gmra.mxu0 %vm842_vm0, %v2868_v62 }
  0x82   : > { %2132 = vmatpush1.msra.mxu0 %v3159_v11  ;;  %1993 = vmatprep.mubr.f32.mxu0 %v2723_v2 }
  0x83   : > { %2628 = vmatmul.mubr.msk.f32.vlgmr.msra.gmra.mxu1 %vm842_vm0, %v2868_v62 }
  0x84   : > { %2221 = vmatpush1.msra.mxu1 %v3170_v17  ;;  %2082 = vmatprep.mubr.f32.mxu1 %v2723_v2 }
  0x85   : > { %2625 = vmatmul.mubr.msk.f32.gmra.mxu0 %vm842_vm0, %v2888_v25 }
  0x86   : > { %1999 = vmatprep.mubr.f32.mxu0 %v2723_v2 }
  0x87   : > { %2629 = vmatmul.mubr.msk.f32.gmra.mxu1 %vm842_vm0, %v2888_v25 }
  0x88   : > { %2088 = vmatprep.mubr.f32.mxu1 %v2723_v2 }
  0x89   : > { %2626 = vmatmul.mubr.msk.f32.gmra.mxu0 %vm842_vm0, %v2912_v45 }
  0x8a   : > { %2005 = vmatprep.mubr.f32.mxu0 %v2723_v2 }
  0x8b   : > { %2630 = vmatmul.mubr.msk.f32.gmra.mxu1 %vm842_vm0, %v2912_v45 }
  0x8c   : > { %2094 = vmatprep.mubr.f32.mxu1 %v2723_v2 }
  0x8d   : > { %2627 = vmatmul.mubr.msk.f32.gmra.mxu0 %vm842_vm0, %v2942_v63 }
  0x8e   : > { %2165 = vmatprep.mubr.f32.mxu0 %v2723_v2 }
  0x8f   : > { %2631 = vmatmul.mubr.msk.f32.gmra.mxu1 %vm842_vm0, %v2942_v63 }
  0x90   : > { %2254 = vmatprep.mubr.f32.mxu1 %v2723_v2 }
  0x91   : > { %2632 = vmatmul.mubr.msk.f32.vlgmr.msra.gmra.mxu0 %vm842_vm0, %v2868_v62 }
  0x92   : > { %2171 = vmatprep.mubr.f32.mxu0 %v2723_v2 }
  0x93   : > { %2636 = vmatmul.mubr.msk.f32.vlgmr.msra.gmra.mxu1 %vm842_vm0, %v2868_v62 }
  0x94   : > { %2260 = vmatprep.mubr.f32.mxu1 %v2723_v2 }
  0x95   : > { %2633 = vmatmul.mubr.msk.f32.gmra.mxu0 %vm842_vm0, %v2888_v25 }
  0x96   : > { %2177 = vmatprep.mubr.f32.mxu0 %v2723_v2 }
  0x97   : > { %2637 = vmatmul.mubr.msk.f32.gmra.mxu1 %vm842_vm0, %v2888_v25 }
  0x98   : > { %2266 = vmatprep.mubr.f32.mxu1 %v2723_v2 }
  0x99   : > { %2634 = vmatmul.mubr.msk.f32.gmra.mxu0 %vm842_vm0, %v2912_v45 }
  0x9a   : > { %2183 = vmatprep.mubr.f32.mxu0 %v2723_v2 }
  0x9b   : > { %2638 = vmatmul.mubr.msk.f32.gmra.mxu1 %vm842_vm0, %v2912_v45 }
  0x9c   : > { %2272 = vmatprep.mubr.f32.mxu1 %v2723_v2 }
  0x9d   : > { %2635 = vmatmul.mubr.msk.f32.gmra.mxu0 %vm842_vm0, %v2942_v63 }
  0x9f   : > { %2639 = vmatmul.mubr.msk.f32.gmra.mxu1 %vm842_vm0, %v2942_v63 }
  0xe0   : > { %v921_v2 = vpop.f32.mrf.mxu0 }
  0xe1   : > { %2279 = vst [vmem:[%s3320_s8] sm:$0xff] %v921_v2  ;;  %v1010_v62 = vpop.f32.mrf.mxu1 }
  0xe2   : > { %2281 = vst [vmem:[%s3320_s8 + $0x10] sm:$0xff] %v1010_v62  ;;  %v923_v25 = vpop.f32.mrf.mxu0 }
  0xe3   : > { %2280 = vst [vmem:[%s3320_s8 + $0x8] sm:$0xff] %v923_v25  ;;  %v1012_v45 = vpop.f32.mrf.mxu1 }
  0xe4   : > { %2282 = vst [vmem:[%s3320_s8 + $0x18] sm:$0xff] %v1012_v45 }
  0xe5   : > { %v927_v63 = vpop.f32.mrf.mxu0 }
  0xe6   : > { %2311 = vst [vmem:[%s3320_s8 + $0x100] sm:$0xff] %v927_v63 }
  0xe7   : > { %v1016_v24 = vpop.f32.mrf.mxu1  ;;  %v929_v43 = vpop.f32.mrf.mxu0 }
  0xe8   : > { %2313 = vst [vmem:[%s3320_s8 + $0x110] sm:$0xff] %v1016_v24  ;;  %2312 = vst [vmem:[%s3320_s8 + $0x108] sm:$0xff] %v929_v43 }
  0xe9   : > { %v1018_v23 = vpop.f32.mrf.mxu1  ;;  %v933_v46 = vpop.f32.mrf.mxu0 }
  0xea   : > { %2314 = vst [vmem:[%s3320_s8 + $0x118] sm:$0xff] %v1018_v23  ;;  %2343 = vst [vmem:[%s3320_s8 + $0x200] sm:$0xff] %v933_v46 }
  0xeb   : > { %v1022_v47 = vpop.f32.mrf.mxu1  ;;  %v935_v48 = vpop.f32.mrf.mxu0 }
  0xec   : > { %2345 = vst [vmem:[%s3320_s8 + $0x210] sm:$0xff] %v1022_v47  ;;  %2344 = vst [vmem:[%s3320_s8 + $0x208] sm:$0xff] %v935_v48 }
  0xed   : > { %v1024_v49 = vpop.f32.mrf.mxu1  ;;  %v939_v27 = vpop.f32.mrf.mxu0 }
  0xee   : > { %2346 = vst [vmem:[%s3320_s8 + $0x218] sm:$0xff] %v1024_v49  ;;  %2375 = vst [vmem:[%s3320_s8 + $0x300] sm:$0xff] %v939_v27 }
  0xef   : > { %v1028_v44 = vpop.f32.mrf.mxu1  ;;  %v941_v16 = vpop.f32.mrf.mxu0 }
  0xf0   : > { %2377 = vst [vmem:[%s3320_s8 + $0x310] sm:$0xff] %v1028_v44  ;;  %2376 = vst [vmem:[%s3320_s8 + $0x308] sm:$0xff] %v941_v16 }
  0xf1   : > { %v1030_v6 = vpop.f32.mrf.mxu1  ;;  %v1099_v5 = vpop.f32.mrf.mxu0 }
  0xf2   : > { %2378 = vst [vmem:[%s3320_s8 + $0x318] sm:$0xff] %v1030_v6  ;;  %2283 = vst [vmem:[%s3320_s8 + $0x20] sm:$0xff] %v1099_v5 }
  0xf3   : > { %v1188_v50 = vpop.f32.mrf.mxu1  ;;  %v1101_v51 = vpop.f32.mrf.mxu0 }
  0xf4   : > { %2285 = vst [vmem:[%s3320_s8 + $0x30] sm:$0xff] %v1188_v50  ;;  %2284 = vst [vmem:[%s3320_s8 + $0x28] sm:$0xff] %v1101_v51 }
  0xf5   : > { %v1190_v34 = vpop.f32.mrf.mxu1  ;;  %v1105_v52 = vpop.f32.mrf.mxu0 }
  0xf6   : > { %2286 = vst [vmem:[%s3320_s8 + $0x38] sm:$0xff] %v1190_v34  ;;  %2315 = vst [vmem:[%s3320_s8 + $0x120] sm:$0xff] %v1105_v52 }
  0xf7   : > { %v1194_v53 = vpop.f32.mrf.mxu1  ;;  %v1107_v54 = vpop.f32.mrf.mxu0 }
  0xf8   : > { %2317 = vst [vmem:[%s3320_s8 + $0x130] sm:$0xff] %v1194_v53  ;;  %2316 = vst [vmem:[%s3320_s8 + $0x128] sm:$0xff] %v1107_v54 }
  0xf9   : > { %v1196_v55 = vpop.f32.mrf.mxu1  ;;  %v1111_v57 = vpop.f32.mrf.mxu0 }
  0xfa   : > { %2318 = vst [vmem:[%s3320_s8 + $0x138] sm:$0xff] %v1196_v55  ;;  %2347 = vst [vmem:[%s3320_s8 + $0x220] sm:$0xff] %v1111_v57 }
  0xfb   : > { %v1200_v7 = vpop.f32.mrf.mxu1  ;;  %v1113_v58 = vpop.f32.mrf.mxu0 }
  0xfc   : > { %2349 = vst [vmem:[%s3320_s8 + $0x230] sm:$0xff] %v1200_v7  ;;  %2348 = vst [vmem:[%s3320_s8 + $0x228] sm:$0xff] %v1113_v58 }
  0xfd   : > { %v1202_v59 = vpop.f32.mrf.mxu1  ;;  %v1117_v60 = vpop.f32.mrf.mxu0 }
  0xfe   : > { %2350 = vst [vmem:[%s3320_s8 + $0x238] sm:$0xff] %v1202_v59  ;;  %2379 = vst [vmem:[%s3320_s8 + $0x320] sm:$0xff] %v1117_v60 }
  0xff   : > { %v1206_v61 = vpop.f32.mrf.mxu1  ;;  %v1119_v0 = vpop.f32.mrf.mxu0 }
 0x100   : > { %2381 = vst [vmem:[%s3320_s8 + $0x330] sm:$0xff] %v1206_v61  ;;  %2380 = vst [vmem:[%s3320_s8 + $0x328] sm:$0xff] %v1119_v0 }
 0x101   : > { %v1208_v9 = vpop.f32.mrf.mxu1  ;;  %v1277_v31 = vpop.f32.mrf.mxu0 }
 0x102   : > { %2382 = vst [vmem:[%s3320_s8 + $0x338] sm:$0xff] %v1208_v9  ;;  %2287 = vst [vmem:[%s3320_s8 + $0x40] sm:$0xff] %v1277_v31 }
 0x103   : > { %v1366_v3 = vpop.f32.mrf.mxu1  ;;  %v1279_v35 = vpop.f32.mrf.mxu0 }
 0x104   : > { %2289 = vst [vmem:[%s3320_s8 + $0x50] sm:$0xff] %v1366_v3  ;;  %2288 = vst [vmem:[%s3320_s8 + $0x48] sm:$0xff] %v1279_v35 }
 0x105   : > { %v1368_v41 = vpop.f32.mrf.mxu1  ;;  %v1283_v56 = vpop.f32.mrf.mxu0 }
 0x106   : > { %2290 = vst [vmem:[%s3320_s8 + $0x58] sm:$0xff] %v1368_v41  ;;  %2319 = vst [vmem:[%s3320_s8 + $0x140] sm:$0xff] %v1283_v56 }
 0x107   : > { %v1372_v15 = vpop.f32.mrf.mxu1  ;;  %v1285_v42 = vpop.f32.mrf.mxu0 }
 0x108   : > { %2321 = vst [vmem:[%s3320_s8 + $0x150] sm:$0xff] %v1372_v15  ;;  %2320 = vst [vmem:[%s3320_s8 + $0x148] sm:$0xff] %v1285_v42 }
 0x109   : > { %v1374_v8 = vpop.f32.mrf.mxu1  ;;  %v1289_v30 = vpop.f32.mrf.mxu0 }
 0x10a   : > { %2322 = vst [vmem:[%s3320_s8 + $0x158] sm:$0xff] %v1374_v8  ;;  %2351 = vst [vmem:[%s3320_s8 + $0x240] sm:$0xff] %v1289_v30 }
 0x10b   : > { %v1378_v33 = vpop.f32.mrf.mxu1  ;;  %v1291_v11 = vpop.f32.mrf.mxu0 }
 0x10c   : > { %2353 = vst [vmem:[%s3320_s8 + $0x250] sm:$0xff] %v1378_v33  ;;  %2352 = vst [vmem:[%s3320_s8 + $0x248] sm:$0xff] %v1291_v11 }
 0x10d   : > { %v1380_v37 = vpop.f32.mrf.mxu1  ;;  %v1295_v38 = vpop.f32.mrf.mxu0 }
 0x10e   : > { %2354 = vst [vmem:[%s3320_s8 + $0x258] sm:$0xff] %v1380_v37  ;;  %2383 = vst [vmem:[%s3320_s8 + $0x340] sm:$0xff] %v1295_v38 }
 0x10f   : > { %v1384_v17 = vpop.f32.mrf.mxu1  ;;  %v1297_v10 = vpop.f32.mrf.mxu0 }
 0x110   : > { %2385 = vst [vmem:[%s3320_s8 + $0x350] sm:$0xff] %v1384_v17  ;;  %2384 = vst [vmem:[%s3320_s8 + $0x348] sm:$0xff] %v1297_v10 }
 0x111   : > { %v1386_v18 = vpop.f32.mrf.mxu1  ;;  %v1455_v19 = vpop.f32.mrf.mxu0 }
 0x112   : > { %2386 = vst [vmem:[%s3320_s8 + $0x358] sm:$0xff] %v1386_v18  ;;  %2291 = vst [vmem:[%s3320_s8 + $0x60] sm:$0xff] %v1455_v19 }
 0x113   : > { %v1544_v12 = vpop.f32.mrf.mxu1  ;;  %v1457_v28 = vpop.f32.mrf.mxu0 }
 0x114   : > { %2293 = vst [vmem:[%s3320_s8 + $0x70] sm:$0xff] %v1544_v12  ;;  %2292 = vst [vmem:[%s3320_s8 + $0x68] sm:$0xff] %v1457_v28 }
 0x115   : > { %v1546_v29 = vpop.f32.mrf.mxu1  ;;  %v1461_v32 = vpop.f32.mrf.mxu0 }
 0x116   : > { %2294 = vst [vmem:[%s3320_s8 + $0x78] sm:$0xff] %v1546_v29  ;;  %2323 = vst [vmem:[%s3320_s8 + $0x160] sm:$0xff] %v1461_v32 }
 0x117   : > { %v1550_v26 = vpop.f32.mrf.mxu1  ;;  %v1463_v36 = vpop.f32.mrf.mxu0 }
 0x118   : > { %2325 = vst [vmem:[%s3320_s8 + $0x170] sm:$0xff] %v1550_v26  ;;  %2324 = vst [vmem:[%s3320_s8 + $0x168] sm:$0xff] %v1463_v36 }
 0x119   : > { %v1552_v39 = vpop.f32.mrf.mxu1  ;;  %v1467_v1 = vpop.f32.mrf.mxu0 }
 0x11a   : > { %2326 = vst [vmem:[%s3320_s8 + $0x178] sm:$0xff] %v1552_v39  ;;  %2355 = vst [vmem:[%s3320_s8 + $0x260] sm:$0xff] %v1467_v1 }
 0x11b   : > { %v1556_v4 = vpop.f32.mrf.mxu1  ;;  %v1469_v13 = vpop.f32.mrf.mxu0 }
 0x11c   : > { %2357 = vst [vmem:[%s3320_s8 + $0x270] sm:$0xff] %v1556_v4  ;;  %2356 = vst [vmem:[%s3320_s8 + $0x268] sm:$0xff] %v1469_v13 }
 0x11d   : > { %v1558_v40 = vpop.f32.mrf.mxu1  ;;  %v1473_v20 = vpop.f32.mrf.mxu0 }
 0x11e   : > { %2358 = vst [vmem:[%s3320_s8 + $0x278] sm:$0xff] %v1558_v40  ;;  %2387 = vst [vmem:[%s3320_s8 + $0x360] sm:$0xff] %v1473_v20 }
 0x11f   : > { %v1562_v21 = vpop.f32.mrf.mxu1  ;;  %v1475_v14 = vpop.f32.mrf.mxu0 }
 0x120   : > { %2389 = vst [vmem:[%s3320_s8 + $0x370] sm:$0xff] %v1562_v21  ;;  %2388 = vst [vmem:[%s3320_s8 + $0x368] sm:$0xff] %v1475_v14 }
 0x121   : > { %v1564_v22 = vpop.f32.mrf.mxu1  ;;  %v1633_v2 = vpop.f32.mrf.mxu0 }
 0x122   : > { %2390 = vst [vmem:[%s3320_s8 + $0x378] sm:$0xff] %v1564_v22  ;;  %2295 = vst [vmem:[%s3320_s8 + $0x80] sm:$0xff] %v1633_v2 }
 0x123   : > { %v1722_v62 = vpop.f32.mrf.mxu1  ;;  %v1635_v25 = vpop.f32.mrf.mxu0 }
 0x124   : > { %2297 = vst [vmem:[%s3320_s8 + $0x90] sm:$0xff] %v1722_v62  ;;  %2296 = vst [vmem:[%s3320_s8 + $0x88] sm:$0xff] %v1635_v25 }
 0x125   : > { %v1724_v45 = vpop.f32.mrf.mxu1  ;;  %v1639_v63 = vpop.f32.mrf.mxu0 }
 0x126   : > { %2298 = vst [vmem:[%s3320_s8 + $0x98] sm:$0xff] %v1724_v45  ;;  %2327 = vst [vmem:[%s3320_s8 + $0x180] sm:$0xff] %v1639_v63 }
 0x127   : > { %v1728_v24 = vpop.f32.mrf.mxu1  ;;  %v1641_v43 = vpop.f32.mrf.mxu0 }
 0x128   : > { %2329 = vst [vmem:[%s3320_s8 + $0x190] sm:$0xff] %v1728_v24  ;;  %2328 = vst [vmem:[%s3320_s8 + $0x188] sm:$0xff] %v1641_v43 }
 0x129   : > { %v1730_v23 = vpop.f32.mrf.mxu1  ;;  %v1645_v46 = vpop.f32.mrf.mxu0 }
 0x12a   : > { %2330 = vst [vmem:[%s3320_s8 + $0x198] sm:$0xff] %v1730_v23  ;;  %2359 = vst [vmem:[%s3320_s8 + $0x280] sm:$0xff] %v1645_v46 }
 0x12b   : > { %v1734_v47 = vpop.f32.mrf.mxu1  ;;  %v1647_v48 = vpop.f32.mrf.mxu0 }
 0x12c   : > { %2361 = vst [vmem:[%s3320_s8 + $0x290] sm:$0xff] %v1734_v47  ;;  %2360 = vst [vmem:[%s3320_s8 + $0x288] sm:$0xff] %v1647_v48 }
 0x12d   : > { %v1736_v49 = vpop.f32.mrf.mxu1  ;;  %v1651_v27 = vpop.f32.mrf.mxu0 }
 0x12e   : > { %2362 = vst [vmem:[%s3320_s8 + $0x298] sm:$0xff] %v1736_v49  ;;  %2391 = vst [vmem:[%s3320_s8 + $0x380] sm:$0xff] %v1651_v27 }
 0x12f   : > { %v1740_v44 = vpop.f32.mrf.mxu1  ;;  %v1653_v16 = vpop.f32.mrf.mxu0 }
 0x130   : > { %2393 = vst [vmem:[%s3320_s8 + $0x390] sm:$0xff] %v1740_v44  ;;  %2392 = vst [vmem:[%s3320_s8 + $0x388] sm:$0xff] %v1653_v16 }
 0x131   : > { %v1742_v6 = vpop.f32.mrf.mxu1  ;;  %v1811_v5 = vpop.f32.mrf.mxu0 }
 0x132   : > { %2394 = vst [vmem:[%s3320_s8 + $0x398] sm:$0xff] %v1742_v6  ;;  %2299 = vst [vmem:[%s3320_s8 + $0xa0] sm:$0xff] %v1811_v5 }
 0x133   : > { %v1900_v50 = vpop.f32.mrf.mxu1  ;;  %v1813_v51 = vpop.f32.mrf.mxu0 }
 0x134   : > { %2301 = vst [vmem:[%s3320_s8 + $0xb0] sm:$0xff] %v1900_v50  ;;  %2300 = vst [vmem:[%s3320_s8 + $0xa8] sm:$0xff] %v1813_v51 }
 0x135   : > { %v1902_v34 = vpop.f32.mrf.mxu1  ;;  %v1817_v52 = vpop.f32.mrf.mxu0 }
 0x136   : > { %2302 = vst [vmem:[%s3320_s8 + $0xb8] sm:$0xff] %v1902_v34  ;;  %2331 = vst [vmem:[%s3320_s8 + $0x1a0] sm:$0xff] %v1817_v52 }
 0x137   : > { %v1906_v53 = vpop.f32.mrf.mxu1  ;;  %v1819_v54 = vpop.f32.mrf.mxu0 }
 0x138   : > { %2333 = vst [vmem:[%s3320_s8 + $0x1b0] sm:$0xff] %v1906_v53  ;;  %2332 = vst [vmem:[%s3320_s8 + $0x1a8] sm:$0xff] %v1819_v54 }
 0x139   : > { %v1908_v55 = vpop.f32.mrf.mxu1  ;;  %v1823_v57 = vpop.f32.mrf.mxu0 }
 0x13a   : > { %2334 = vst [vmem:[%s3320_s8 + $0x1b8] sm:$0xff] %v1908_v55  ;;  %2363 = vst [vmem:[%s3320_s8 + $0x2a0] sm:$0xff] %v1823_v57 }
 0x13b   : > { %v1912_v7 = vpop.f32.mrf.mxu1  ;;  %v1825_v58 = vpop.f32.mrf.mxu0 }
 0x13c   : > { %2365 = vst [vmem:[%s3320_s8 + $0x2b0] sm:$0xff] %v1912_v7  ;;  %2364 = vst [vmem:[%s3320_s8 + $0x2a8] sm:$0xff] %v1825_v58 }
 0x13d   : > { %v1914_v59 = vpop.f32.mrf.mxu1  ;;  %v1829_v60 = vpop.f32.mrf.mxu0 }
 0x13e   : > { %2366 = vst [vmem:[%s3320_s8 + $0x2b8] sm:$0xff] %v1914_v59  ;;  %2395 = vst [vmem:[%s3320_s8 + $0x3a0] sm:$0xff] %v1829_v60 }
 0x13f   : > { %v1918_v61 = vpop.f32.mrf.mxu1  ;;  %v1831_v0 = vpop.f32.mrf.mxu0 }
 0x140   : > { %2397 = vst [vmem:[%s3320_s8 + $0x3b0] sm:$0xff] %v1918_v61  ;;  %2396 = vst [vmem:[%s3320_s8 + $0x3a8] sm:$0xff] %v1831_v0 }
 0x141   : > { %v1920_v9 = vpop.f32.mrf.mxu1  ;;  %v1989_v31 = vpop.f32.mrf.mxu0 }
 0x142   : > { %2398 = vst [vmem:[%s3320_s8 + $0x3b8] sm:$0xff] %v1920_v9  ;;  %2303 = vst [vmem:[%s3320_s8 + $0xc0] sm:$0xff] %v1989_v31 }
 0x143   : > { %v2078_v3 = vpop.f32.mrf.mxu1  ;;  %v1991_v35 = vpop.f32.mrf.mxu0 }
 0x144   : > { %2305 = vst [vmem:[%s3320_s8 + $0xd0] sm:$0xff] %v2078_v3  ;;  %2304 = vst [vmem:[%s3320_s8 + $0xc8] sm:$0xff] %v1991_v35 }
 0x145   : > { %v2080_v41 = vpop.f32.mrf.mxu1  ;;  %v1995_v56 = vpop.f32.mrf.mxu0 }
 0x146   : > { %2306 = vst [vmem:[%s3320_s8 + $0xd8] sm:$0xff] %v2080_v41  ;;  %2335 = vst [vmem:[%s3320_s8 + $0x1c0] sm:$0xff] %v1995_v56 }
 0x147   : > { %v2084_v15 = vpop.f32.mrf.mxu1  ;;  %v1997_v42 = vpop.f32.mrf.mxu0 }
 0x148   : > { %2337 = vst [vmem:[%s3320_s8 + $0x1d0] sm:$0xff] %v2084_v15  ;;  %2336 = vst [vmem:[%s3320_s8 + $0x1c8] sm:$0xff] %v1997_v42 }
 0x149   : > { %v2086_v8 = vpop.f32.mrf.mxu1  ;;  %v2001_v30 = vpop.f32.mrf.mxu0 }
 0x14a   : > { %2338 = vst [vmem:[%s3320_s8 + $0x1d8] sm:$0xff] %v2086_v8  ;;  %2367 = vst [vmem:[%s3320_s8 + $0x2c0] sm:$0xff] %v2001_v30 }
 0x14b   : > { %v2090_v33 = vpop.f32.mrf.mxu1  ;;  %v2003_v11 = vpop.f32.mrf.mxu0 }
 0x14c   : > { %2369 = vst [vmem:[%s3320_s8 + $0x2d0] sm:$0xff] %v2090_v33  ;;  %2368 = vst [vmem:[%s3320_s8 + $0x2c8] sm:$0xff] %v2003_v11 }
 0x14d   : > { %v2092_v37 = vpop.f32.mrf.mxu1  ;;  %v2007_v38 = vpop.f32.mrf.mxu0 }
 0x14e   : > { %2370 = vst [vmem:[%s3320_s8 + $0x2d8] sm:$0xff] %v2092_v37  ;;  %2399 = vst [vmem:[%s3320_s8 + $0x3c0] sm:$0xff] %v2007_v38 }
 0x14f   : > { %v2096_v17 = vpop.f32.mrf.mxu1  ;;  %v2009_v10 = vpop.f32.mrf.mxu0 }
 0x150   : > { %2401 = vst [vmem:[%s3320_s8 + $0x3d0] sm:$0xff] %v2096_v17  ;;  %2400 = vst [vmem:[%s3320_s8 + $0x3c8] sm:$0xff] %v2009_v10 }
 0x151   : > { %v2098_v18 = vpop.f32.mrf.mxu1  ;;  %v2167_v19 = vpop.f32.mrf.mxu0 }
 0x152   : > { %2402 = vst [vmem:[%s3320_s8 + $0x3d8] sm:$0xff] %v2098_v18  ;;  %2307 = vst [vmem:[%s3320_s8 + $0xe0] sm:$0xff] %v2167_v19 }
 0x153   : > { %v2256_v12 = vpop.f32.mrf.mxu1  ;;  %v2169_v28 = vpop.f32.mrf.mxu0 }
 0x154   : > { %2309 = vst [vmem:[%s3320_s8 + $0xf0] sm:$0xff] %v2256_v12  ;;  %2308 = vst [vmem:[%s3320_s8 + $0xe8] sm:$0xff] %v2169_v28 }
 0x155   : > { %v2258_v29 = vpop.f32.mrf.mxu1  ;;  %v2173_v32 = vpop.f32.mrf.mxu0 }
 0x156   : > { %2310 = vst [vmem:[%s3320_s8 + $0xf8] sm:$0xff] %v2258_v29  ;;  %2339 = vst [vmem:[%s3320_s8 + $0x1e0] sm:$0xff] %v2173_v32 }
 0x157   : > { %v2262_v26 = vpop.f32.mrf.mxu1  ;;  %v2175_v36 = vpop.f32.mrf.mxu0 }
 0x158   : > { %2341 = vst [vmem:[%s3320_s8 + $0x1f0] sm:$0xff] %v2262_v26  ;;  %2340 = vst [vmem:[%s3320_s8 + $0x1e8] sm:$0xff] %v2175_v36 }
 0x159   : > { %v2264_v39 = vpop.f32.mrf.mxu1  ;;  %v2179_v1 = vpop.f32.mrf.mxu0 }
 0x15a   : > { %2342 = vst [vmem:[%s3320_s8 + $0x1f8] sm:$0xff] %v2264_v39  ;;  %2371 = vst [vmem:[%s3320_s8 + $0x2e0] sm:$0xff] %v2179_v1 }
 0x15b   : > { %v2268_v4 = vpop.f32.mrf.mxu1  ;;  %v2181_v13 = vpop.f32.mrf.mxu0 }
 0x15c   : > { %2373 = vst [vmem:[%s3320_s8 + $0x2f0] sm:$0xff] %v2268_v4  ;;  %2372 = vst [vmem:[%s3320_s8 + $0x2e8] sm:$0xff] %v2181_v13 }
 0x15d   : > { %v2270_v40 = vpop.f32.mrf.mxu1  ;;  %v2185_v20 = vpop.f32.mrf.mxu0 }
 0x15e   : > { %2374 = vst [vmem:[%s3320_s8 + $0x2f8] sm:$0xff] %v2270_v40  ;;  %2403 = vst [vmem:[%s3320_s8 + $0x3e0] sm:$0xff] %v2185_v20 }
 0x15f   : > { %v2274_v21 = vpop.f32.mrf.mxu1  ;;  %v2187_v14 = vpop.f32.mrf.mxu0 }
 0x160   : > { %2405 = vst [vmem:[%s3320_s8 + $0x3f0] sm:$0xff] %v2274_v21  ;;  %2404 = vst [vmem:[%s3320_s8 + $0x3e8] sm:$0xff] %v2187_v14 }
 0x161   : > { %v2276_v22 = vpop.f32.mrf.mxu1 }
 0x162   : > { %2406 = vst [vmem:[%s3320_s8 + $0x3f8] sm:$0xff] %v2276_v22 }
 0x163 PF: > { %s14_s19 = sadd.s32 1, %s2721_s19   ;;  %s3470_s15 = smov %s2713_s17 }
 0x164   : > { %p11_p7 = scmp.ge.s32.totalorder %s14_s19, 10   ;;  %s3471_s16 = smov %s2717_s18 }
 0x165   : > { %s3472_s17 = smov %s3475_s20  ;;  %s3473_s18 = smov %s3479_s21 }
 0x166   :  { %13 = sbr.rel (!%p11_p7) target bundleno = 3 (0x3), region = 72 }

</bundles_post_ra>
